<compile_context>
chip_gen: v5e
topology: v5e:2x2
jax: 0.10.0
libtpu: 0.0.40
codegen_flags: <defaults>
</compile_context>

<pallas_src>
import functools
import math

import jax
import jax.numpy as jnp
from jax.experimental import pallas as pl
from jax.experimental.pallas import tpu as pltpu

_VMEM_LIMIT = 32 * 1024 * 1024


def _round_up(x, m):
    return (x + m - 1) // m * m


# ----------------------------- Pallas kernels ------------------------------ #

def _gemm_kernel(x_ref, w_ref, b_ref, o_ref, *rest, act_in, act_out, emit_stats):
    if emit_stats:
        stats_ref, acc_ref = rest
    else:
        (acc_ref,) = rest

    k = pl.program_id(2)

    @pl.when(k == 0)
    def _init():
        acc_ref[...] = jnp.zeros_like(acc_ref)

    x = x_ref[...]                                   # bf16 (block_m, tk)
    # NOTE: fused activations must satisfy act(0) == 0 because the patch
    # matrix contains zero-padded (conv border and M/K padding) entries.
    if act_in == "leaky":
        x = jnp.where(x > 0, x, 0.2 * x)
    elif act_in == "relu":
        x = jnp.maximum(x, 0)
    acc_ref[...] += jnp.dot(x, w_ref[...], preferred_element_type=jnp.float32)

    @pl.when(k == pl.num_programs(2) - 1)
    def _finalize():
        y = acc_ref[...] + b_ref[...]
        if act_out == "tanh":
            y = jnp.tanh(y)
        o_ref[...] = y
        if emit_stats:
            # Padded M rows are exact zeros here (bias == 0 for every BN'd
            # conv), so they do not perturb the batch statistics.
            s1 = jnp.sum(y, axis=0, keepdims=True)
            s2 = jnp.sum(y * y, axis=0, keepdims=True)
            stats_ref[...] = jnp.concatenate([s1, s2], axis=0)


def gemm_pallas(patches, weights, bias, *, act_in=None, act_out=None,
                emit_stats=False, block_m=256, block_k=512):
    """Batched GEMM: (P, M, K) @ (P, K, C) + bias(C) with fused activations.

    Returns (out[P, M, C] float32, stats or None); stats[P, n_m, 2, Cp] holds
    per-(parity, M-tile) channel sums / sums-of-squares of the conv output.
    """
    P, M, K = patches.shape
    C = weights.shape[-1]

    Cp = _round_up(C, 128)                    # lane-dense output stores
    Kp = _round_up(K, 128)
    tk = min(block_k, Kp)
    Kp = _round_up(Kp, tk)
    bm = block_m if M >= block_m else _round_up(M, 16)
    Mp = _round_up(M, bm)
    n_m, n_k = Mp // bm, Kp // tk

    x = jnp.pad(patches.astype(jnp.bfloat16), ((0, 0), (0, Mp - M), (0, Kp - K)))
    w = jnp.pad(weights.astype(jnp.bfloat16), ((0, 0), (0, Kp - K), (0, Cp - C)))
    b = jnp.pad(bias.astype(jnp.float32), (0, Cp - C)).reshape(1, Cp)

    out_spec = pl.BlockSpec((None, bm, Cp), lambda p, m, k: (p, m, 0))
    out_shape = jax.ShapeDtypeStruct((P, Mp, Cp), jnp.float32)
    if emit_stats:
        out_shape = (out_shape,
                     jax.ShapeDtypeStruct((P, n_m, 2, Cp), jnp.float32))
        out_spec = (out_spec,
                    pl.BlockSpec((None, None, 2, Cp),
                                 lambda p, m, k: (p, m, 0, 0)))

    kern = functools.partial(_gemm_kernel, act_in=act_in, act_out=act_out,
                             emit_stats=emit_stats)
    res = pl.pallas_call(
        kern,
        out_shape=out_shape,
        grid_spec=pltpu.PrefetchScalarGridSpec(
            num_scalar_prefetch=0,
            grid=(P, n_m, n_k),
            in_specs=[
                pl.BlockSpec((None, bm, tk), lambda p, m, k: (p, m, k)),
                pl.BlockSpec((None, tk, Cp), lambda p, m, k: (p, k, 0)),
                pl.BlockSpec((1, Cp), lambda p, m, k: (0, 0)),
            ],
            out_specs=out_spec,
            scratch_shapes=[pltpu.VMEM((bm, Cp), jnp.float32)],
        ),
        compiler_params=pltpu.CompilerParams(
            dimension_semantics=("parallel", "parallel", "arbitrary"),
            vmem_limit_bytes=_VMEM_LIMIT),
    )(x, w, b)

    if emit_stats:
        out, stats = res
    else:
        out, stats = res, None
    return out[:, :M, :C], stats


def _bn_apply_kernel(x_ref, mean_ref, inv_ref, o_ref):
    o_ref[...] = (x_ref[...] - mean_ref[...]) * inv_ref[...]


def _finish_bn_stats(stats, count, c):
    s = jnp.sum(stats, axis=(0, 1))[:, :c]        # (2, C)
    mean = s[0] / count
    var = jnp.maximum(s[1] / count - mean * mean, 0.0)
    return mean, jax.lax.rsqrt(var + 1e-5)


def bn_apply_pallas(x_nhwc, mean, inv):
    """y = (x - mean) * inv per channel (BatchNorm2d train mode, gamma=1, beta=0)."""
    N, H, W, C = x_nhwc.shape
    M = N * H * W
    bm = 512 if M >= 512 else _round_up(M, 8)
    Mp = _round_up(M, bm)
    flat = jnp.pad(x_nhwc.reshape(M, C), ((0, Mp - M), (0, 0)))
    out = pl.pallas_call(
        _bn_apply_kernel,
        out_shape=jax.ShapeDtypeStruct((Mp, C), jnp.float32),
        grid_spec=pltpu.PrefetchScalarGridSpec(
            num_scalar_prefetch=0,
            grid=(Mp // bm,),
            in_specs=[pl.BlockSpec((bm, C), lambda i: (i, 0)),
                      pl.BlockSpec((1, C), lambda i: (0, 0)),
                      pl.BlockSpec((1, C), lambda i: (0, 0))],
            out_specs=pl.BlockSpec((bm, C), lambda i: (i, 0)),
        ),
        compiler_params=pltpu.CompilerParams(
            dimension_semantics=("parallel",),
            vmem_limit_bytes=_VMEM_LIMIT),
    )(flat, mean.reshape(1, C), inv.reshape(1, C))
    return out[:M].reshape(N, H, W, C)


# ------------------------------ JAX glue ----------------------------------- #

def _im2col_s2(xp, k):
    """Padded NHWC -> (N*Ho*Wo, k*k*C) patches, (kh, kw, c) ordering, stride 2."""
    N, H, W, C = xp.shape
    Ho = (H - k) // 2 + 1
    Wo = (W - k) // 2 + 1
    cols = []
    for di in range(k):
        for dj in range(k):
            cols.append(xp[:, di:di + 2 * Ho:2, dj:dj + 2 * Wo:2, :])
    p = jnp.stack(cols, axis=3)                  # (N, Ho, Wo, k*k, C)
    return p.reshape(N * Ho * Wo, k * k * C), (N, Ho, Wo)


def conv2d_down(x, w_oihw, bias, *, act_in=None, with_bn=False):
    """act_in -> Conv2d(k=4, s=2, p=1) [-> BatchNorm2d]."""
    xp = jnp.pad(x, ((0, 0), (1, 1), (1, 1), (0, 0))).astype(jnp.bfloat16)
    patches, (N, Ho, Wo) = _im2col_s2(xp, 4)
    cout = w_oihw.shape[0]
    wm = jnp.transpose(w_oihw, (2, 3, 1, 0)).reshape(-1, cout)   # (kh,kw,ci) x co
    out, stats = gemm_pallas(patches[None], wm[None], bias,
                             act_in=act_in, emit_stats=with_bn)
    y = out[0].reshape(N, Ho, Wo, cout)
    if with_bn:
        mean, inv = _finish_bn_stats(stats, N * Ho * Wo, cout)
        y = bn_apply_pallas(y, mean, inv)
    return y


def conv_transpose2d_up(x, w_iohw, bias, *, act_in=None, act_out=None,
                        with_bn=False):
    """act_in -> ConvTranspose2d(k=4, s=2, p=1) [-> Tanh | BatchNorm2d].

    Sub-pixel decomposition: output pixel (2i+a, 2j+b) only needs the 2x2 input
    window starting at padded row/col (i+a, j+b) and kernel taps
    w[:, :, 3-a-2t, 3-b-2s], t,s in {0,1}.
    """
    N, H, W, C = x.shape
    cout = w_iohw.shape[1]
    M = N * H * W
    xp = jnp.pad(x, ((0, 0), (1, 1), (1, 1), (0, 0))).astype(jnp.bfloat16)

    pats, wms = [], []
    for a in range(2):
        for b in range(2):
            cols = []
            for t in range(2):
                for s in range(2):
                    cols.append(xp[:, a + t:a + t + H, b + s:b + s + W, :])
            pats.append(jnp.stack(cols, axis=3).reshape(M, 4 * C))
            w_sel = w_iohw[:, :, 3 - a::-2, 3 - b::-2]     # (ci, co, t, s)
            wms.append(jnp.transpose(w_sel, (2, 3, 0, 1)).reshape(4 * C, cout))
    patches = jnp.stack(pats, axis=0)            # (4, M, 4*C)
    weights = jnp.stack(wms, axis=0)             # (4, 4*C, cout)

    out, stats = gemm_pallas(patches, weights, bias, act_in=act_in,
                             act_out=act_out, emit_stats=with_bn)
    # out[p = a*2 + b, n*H*W + i*W + j, c]  ->  y[n, 2i+a, 2j+b, c]
    y = out.reshape(2, 2, N, H, W, cout)
    y = jnp.transpose(y, (2, 3, 0, 4, 1, 5)).reshape(N, 2 * H, 2 * W, cout)
    if with_bn:
        mean, inv = _finish_bn_stats(stats, N * 2 * H * 2 * W, cout)
        y = bn_apply_pallas(y, mean, inv)
    return y


# ------------------------- parameter construction -------------------------- #

def _conv_params(key, cout, cin, bias):
    kw, kb = jax.random.split(key)
    bound = 1.0 / math.sqrt(cin * 16)            # fan_in = cin * k * k
    w = jax.random.uniform(kw, (cout, cin, 4, 4), jnp.float32, -bound, bound)
    b = (jax.random.uniform(kb, (cout,), jnp.float32, -bound, bound)
         if bias else jnp.zeros((cout,), jnp.float32))
    return w, b


def _convT_params(key, cin, cout, bias):
    kw, kb = jax.random.split(key)
    bound = 1.0 / math.sqrt(cout * 16)           # fan_in = weight.size(1)*k*k
    w = jax.random.uniform(kw, (cin, cout, 4, 4), jnp.float32, -bound, bound)
    b = (jax.random.uniform(kb, (cout,), jnp.float32, -bound, bound)
         if bias else jnp.zeros((cout,), jnp.float32))
    return w, b


def build_unet(key, input_nc, output_nc, num_downs, ngf):
    keys = iter(jax.random.split(key, 2 * num_downs + 2))

    # innermost: LeakyReLU -> down -> ReLU -> upT -> BN ; skip-concat
    dw_i, db_i = _conv_params(next(keys), ngf * 8, ngf * 8, bias=False)
    uw_i, ub_i = _convT_params(next(keys), ngf * 8, ngf * 8, bias=False)

    def innermost(x):
        d = conv2d_down(x, dw_i, db_i, act_in="leaky")
        u = conv_transpose2d_up(d, uw_i, ub_i, act_in="relu", with_bn=True)
        return jnp.concatenate([x, u], axis=-1)

    block = innermost

    def make_middle(outer_nc, inner_nc, sub):
        dw, db = _conv_params(next(keys), inner_nc, outer_nc, bias=False)
        uw, ub = _convT_params(next(keys), inner_nc * 2, outer_nc, bias=False)

        def middle(x):
            d = conv2d_down(x, dw, db, act_in="leaky", with_bn=True)
            u = conv_transpose2d_up(sub(d), uw, ub, act_in="relu", with_bn=True)
            return jnp.concatenate([x, u], axis=-1)

        return middle

    for _ in range(num_downs - 5):
        block = make_middle(ngf * 8, ngf * 8, block)
    block = make_middle(ngf * 4, ngf * 8, block)
    block = make_middle(ngf * 2, ngf * 4, block)
    block = make_middle(ngf, ngf * 2, block)

    # outermost: down -> submodule -> ReLU -> upT -> Tanh
    dw_o, db_o = _conv_params(next(keys), ngf, input_nc, bias=False)
    uw_o, ub_o = _convT_params(next(keys), ngf * 2, output_nc, bias=True)
    inner_stack = block

    def outermost(x):
        d = conv2d_down(x, dw_o, db_o, act_in=None)
        return conv_transpose2d_up(inner_stack(d), uw_o, ub_o,
                                   act_in="relu", act_out="tanh")

    return outermost


def unet_generator_forward(net, x_nchw):
    x = jnp.transpose(x_nchw, (0, 2, 3, 1))      # NCHW -> NHWC
    return jnp.transpose(net(x), (0, 3, 1, 2))   # NHWC -> NCHW


# TODO(synk): use_dropout=True path (nn.Dropout(0.5)) not implemented; the
# reference default (use_dropout=False, BatchNorm2d) is reproduced.

if __name__ == "__main__":
    # UnetGenerator(input_nc=3, output_nc=3, num_downs=5, ngf=8)
    input_nc, output_nc, num_downs, ngf = 3, 3, 5, 8
    N, H, W = 2, 32, 32                           # H = W = 2 ** num_downs

    key = jax.random.PRNGKey(0)
    k_params, k_input = jax.random.split(key)

    net = build_unet(k_params, input_nc, output_nc, num_downs, ngf)
    x = jax.random.normal(k_input, (N, input_nc, H, W), jnp.float32)

    fwd = jax.jit(lambda inp: unet_generator_forward(net, inp))
    out = fwd(x)
    jax.block_until_ready(out)

    assert out.shape == (N, output_nc, H, W), out.shape
    assert bool(jnp.all(jnp.isfinite(out)))
    print("KERNEL_OK")
</pallas_src>

<mosaic_0001>
module attributes {stable_mosaic.version = 11 : i64} {
  func.func @_gemm_kernel(%arg0: i32, %arg1: i32, %arg2: i32, %arg3: memref<1x256x128xbf16, #tpu.memory_space<vmem>>, %arg4: memref<1x128x128xbf16, #tpu.memory_space<vmem>>, %arg5: memref<1x128xf32, #tpu.memory_space<vmem>>, %arg6: memref<1x256x128xf32, #tpu.memory_space<vmem>>, %arg7: memref<256x128xf32, #tpu.memory_space<vmem>>) attributes {dimension_semantics = [#tpu.dimension_semantics<parallel>, #tpu.dimension_semantics<parallel>, #tpu.dimension_semantics<arbitrary>], iteration_bounds = array<i64: 1, 2, 1>, scalar_prefetch = 0 : i64, scratch_operands = 1 : i64, tpu.core_type = #tpu.core_type<tc>, window_params = [{transform_indices = @transform_0, window_bounds = array<i64: 1, 256, 128>}, {transform_indices = @transform_1, window_bounds = array<i64: 1, 128, 128>}, {pipeline_mode = #tpu.pipeline_mode<synchronous>, transform_indices = @transform_2, window_bounds = array<i64: 1, 128>}, {transform_indices = @transform_3, window_bounds = array<i64: 1, 256, 128>}]} {
    %c0_i32 = arith.constant 0 : i32
    %0 = arith.cmpi eq, %arg2, %c0_i32 : i32
    %1 = arith.extui %0 : i1 to i32
    %c0_i32_0 = arith.constant 0 : i32
    %2 = arith.cmpi ne, %1, %c0_i32_0 : i32
    scf.if %2 {
      %cst_12 = arith.constant 0.000000e+00 : f32
      %14 = vector.broadcast %cst_12 : f32 to vector<256x128xf32>
      %c0_13 = arith.constant 0 : index
      %c0_14 = arith.constant 0 : index
      %15 = vector.load %arg7[%c0_13, %c0_14] : memref<256x128xf32, #tpu.memory_space<vmem>>, vector<256x128xf32>
      tpu.vector_store %arg7[%c0_13, %c0_14], %14 {strides = array<i32>} : memref<256x128xf32, #tpu.memory_space<vmem>>, vector<256x128xf32>,
    } else {
    }
    %c0 = arith.constant 0 : index
    %c0_1 = arith.constant 0 : index
    %c0_2 = arith.constant 0 : index
    %3 = vector.load %arg3[%c0, %c0_1, %c0_2] : memref<1x256x128xbf16, #tpu.memory_space<vmem>>, vector<1x256x128xbf16>
    %4 = vector.shape_cast %3 : vector<1x256x128xbf16> to vector<256x128xbf16>
    %c0_3 = arith.constant 0 : index
    %c0_4 = arith.constant 0 : index
    %5 = vector.load %arg7[%c0_3, %c0_4] : memref<256x128xf32, #tpu.memory_space<vmem>>, vector<256x128xf32>
    %c0_5 = arith.constant 0 : index
    %c0_6 = arith.constant 0 : index
    %c0_7 = arith.constant 0 : index
    %6 = vector.load %arg4[%c0_5, %c0_6, %c0_7] : memref<1x128x128xbf16, #tpu.memory_space<vmem>>, vector<1x128x128xbf16>
    %7 = vector.shape_cast %6 : vector<1x128x128xbf16> to vector<128x128xbf16>
    %cst = arith.constant dense<0.000000e+00> : vector<256x128xf32>
    %8 = tpu.matmul %4, %7, %cst {dimension_numbers = #tpu.dot_dimension_numbers<[1], [0], [0], [1], [0, 0, 1, 1], [], []>} : vector<256x128xbf16>, vector<128x128xbf16>, vector<256x128xf32> -> vector<256x128xf32>
    %9 = arith.addf %5, %8 : vector<256x128xf32>
    %c0_8 = arith.constant 0 : index
    %c0_9 = arith.constant 0 : index
    %10 = vector.load %arg7[%c0_8, %c0_9] : memref<256x128xf32, #tpu.memory_space<vmem>>, vector<256x128xf32>
    tpu.vector_store %arg7[%c0_8, %c0_9], %9 {strides = array<i32>} : memref<256x128xf32, #tpu.memory_space<vmem>>, vector<256x128xf32>,
    %c0_i32_10 = arith.constant 0 : i32
    %11 = arith.cmpi eq, %arg2, %c0_i32_10 : i32
    %12 = arith.extui %11 : i1 to i32
    %c0_i32_11 = arith.constant 0 : i32
    %13 = arith.cmpi ne, %12, %c0_i32_11 : i32
    scf.if %13 {
      %c0_12 = arith.constant 0 : index
      %c0_13 = arith.constant 0 : index
      %14 = vector.load %arg7[%c0_12, %c0_13] : memref<256x128xf32, #tpu.memory_space<vmem>>, vector<256x128xf32>
      %c0_14 = arith.constant 0 : index
      %c0_15 = arith.constant 0 : index
      %15 = vector.load %arg5[%c0_14, %c0_15] : memref<1x128xf32, #tpu.memory_space<vmem>>, vector<1x128xf32>
      %16 = vector.broadcast %15 : vector<1x128xf32> to vector<256x128xf32>
      %17 = arith.addf %14, %16 : vector<256x128xf32>
      %c0_16 = arith.constant 0 : index
      %c0_17 = arith.constant 0 : index
      %c0_18 = arith.constant 0 : index
      %18 = vector.load %arg6[%c0_16, %c0_17, %c0_18] : memref<1x256x128xf32, #tpu.memory_space<vmem>>, vector<1x256x128xf32>
      %19 = vector.shape_cast %18 : vector<1x256x128xf32> to vector<256x128xf32>
      %20 = vector.shape_cast %17 : vector<256x128xf32> to vector<1x256x128xf32>
      tpu.vector_store %arg6[%c0_16, %c0_17, %c0_18], %20 {strides = array<i32>} : memref<1x256x128xf32, #tpu.memory_space<vmem>>, vector<1x256x128xf32>,
    } else {
    }
    return
  }
  func.func @transform_0(%arg0: i32, %arg1: i32, %arg2: i32) -> (i32, i32, i32) {
    %c0_i32 = arith.constant 0 : i32
    return %arg0, %arg1, %arg2 : i32, i32, i32
  }
  func.func @transform_1(%arg0: i32, %arg1: i32, %arg2: i32) -> (i32, i32, i32) {
    %c0_i32 = arith.constant 0 : i32
    %c0_i32_0 = arith.constant 0 : i32
    return %arg0, %arg2, %c0_i32 : i32, i32, i32
  }
  func.func @transform_2(%arg0: i32, %arg1: i32, %arg2: i32) -> (i32, i32) {
    %c0_i32 = arith.constant 0 : i32
    %c0_i32_0 = arith.constant 0 : i32
    %c0_i32_1 = arith.constant 0 : i32
    return %c0_i32, %c0_i32_0 : i32, i32
  }
  func.func @transform_3(%arg0: i32, %arg1: i32, %arg2: i32) -> (i32, i32, i32) {
    %c0_i32 = arith.constant 0 : i32
    %c0_i32_0 = arith.constant 0 : i32
    return %arg0, %arg1, %c0_i32 : i32, i32, i32
  }
}

module attributes {stable_mosaic.version = 11 : i64} {
  func.func @_gemm_kernel(%arg0: i32, %arg1: i32, %arg2: i32, %arg3: memref<1x128x128xbf16, #tpu.memory_space<vmem>>, %arg4: memref<1x128x128xbf16, #tpu.memory_space<vmem>>, %arg5: memref<1x128xf32, #tpu.memory_space<vmem>>, %arg6: memref<1x128x128xf32, #tpu.memory_space<vmem>>, %arg7: memref<1x1x2x128xf32, #tpu.memory_space<vmem>>, %arg8: memref<128x128xf32, #tpu.memory_space<vmem>>) attributes {dimension_semantics = [#tpu.dimension_semantics<parallel>, #tpu.dimension_semantics<parallel>, #tpu.dimension_semantics<arbitrary>], iteration_bounds = array<i64: 1, 1, 1>, scalar_prefetch = 0 : i64, scratch_operands = 1 : i64, tpu.core_type = #tpu.core_type<tc>, window_params = [{transform_indices = @transform_0, window_bounds = array<i64: 1, 128, 128>}, {transform_indices = @transform_1, window_bounds = array<i64: 1, 128, 128>}, {pipeline_mode = #tpu.pipeline_mode<synchronous>, transform_indices = @transform_2, window_bounds = array<i64: 1, 128>}, {transform_indices = @transform_3, window_bounds = array<i64: 1, 128, 128>}, {transform_indices = @transform_4, window_bounds = array<i64: 1, 1, 2, 128>}]} {
    %c0_i32 = arith.constant 0 : i32
    %0 = arith.cmpi eq, %arg2, %c0_i32 : i32
    %1 = arith.extui %0 : i1 to i32
    %c0_i32_0 = arith.constant 0 : i32
    %2 = arith.cmpi ne, %1, %c0_i32_0 : i32
    scf.if %2 {
      %cst_14 = arith.constant 0.000000e+00 : f32
      %19 = vector.broadcast %cst_14 : f32 to vector<128x128xf32>
      %c0_15 = arith.constant 0 : index
      %c0_16 = arith.constant 0 : index
      %20 = vector.load %arg8[%c0_15, %c0_16] : memref<128x128xf32, #tpu.memory_space<vmem>>, vector<128x128xf32>
      tpu.vector_store %arg8[%c0_15, %c0_16], %19 {strides = array<i32>} : memref<128x128xf32, #tpu.memory_space<vmem>>, vector<128x128xf32>,
    } else {
    }
    %c0 = arith.constant 0 : index
    %c0_1 = arith.constant 0 : index
    %c0_2 = arith.constant 0 : index
    %3 = vector.load %arg3[%c0, %c0_1, %c0_2] : memref<1x128x128xbf16, #tpu.memory_space<vmem>>, vector<1x128x128xbf16>
    %4 = vector.shape_cast %3 : vector<1x128x128xbf16> to vector<128x128xbf16>
    %cst = arith.constant 0.000000e+00 : bf16
    %5 = vector.broadcast %cst : bf16 to vector<128x128xbf16>
    %6 = arith.cmpf ogt, %4, %5 : vector<128x128xbf16>
    %cst_3 = arith.constant 2.001950e-01 : bf16
    %7 = vector.broadcast %cst_3 : bf16 to vector<128x128xbf16>
    %8 = arith.mulf %7, %4 : vector<128x128xbf16>
    %9 = arith.select %6, %4, %8 : vector<128x128xi1>, vector<128x128xbf16>
    %c0_4 = arith.constant 0 : index
    %c0_5 = arith.constant 0 : index
    %10 = vector.load %arg8[%c0_4, %c0_5] : memref<128x128xf32, #tpu.memory_space<vmem>>, vector<128x128xf32>
    %c0_6 = arith.constant 0 : index
    %c0_7 = arith.constant 0 : index
    %c0_8 = arith.constant 0 : index
    %11 = vector.load %arg4[%c0_6, %c0_7, %c0_8] : memref<1x128x128xbf16, #tpu.memory_space<vmem>>, vector<1x128x128xbf16>
    %12 = vector.shape_cast %11 : vector<1x128x128xbf16> to vector<128x128xbf16>
    %cst_9 = arith.constant dense<0.000000e+00> : vector<128x128xf32>
    %13 = tpu.matmul %9, %12, %cst_9 {dimension_numbers = #tpu.dot_dimension_numbers<[1], [0], [0], [1], [0, 0, 1, 1], [], []>} : vector<128x128xbf16>, vector<128x128xbf16>, vector<128x128xf32> -> vector<128x128xf32>
    %14 = arith.addf %10, %13 : vector<128x128xf32>
    %c0_10 = arith.constant 0 : index
    %c0_11 = arith.constant 0 : index
    %15 = vector.load %arg8[%c0_10, %c0_11] : memref<128x128xf32, #tpu.memory_space<vmem>>, vector<128x128xf32>
    tpu.vector_store %arg8[%c0_10, %c0_11], %14 {strides = array<i32>} : memref<128x128xf32, #tpu.memory_space<vmem>>, vector<128x128xf32>,
    %c0_i32_12 = arith.constant 0 : i32
    %16 = arith.cmpi eq, %arg2, %c0_i32_12 : i32
    %17 = arith.extui %16 : i1 to i32
    %c0_i32_13 = arith.constant 0 : i32
    %18 = arith.cmpi ne, %17, %c0_i32_13 : i32
    scf.if %18 {
      %c0_14 = arith.constant 0 : index
      %c0_15 = arith.constant 0 : index
      %19 = vector.load %arg8[%c0_14, %c0_15] : memref<128x128xf32, #tpu.memory_space<vmem>>, vector<128x128xf32>
      %c0_16 = arith.constant 0 : index
      %c0_17 = arith.constant 0 : index
      %20 = vector.load %arg5[%c0_16, %c0_17] : memref<1x128xf32, #tpu.memory_space<vmem>>, vector<1x128xf32>
      %21 = vector.broadcast %20 : vector<1x128xf32> to vector<128x128xf32>
      %22 = arith.addf %19, %21 : vector<128x128xf32>
      %c0_18 = arith.constant 0 : index
      %c0_19 = arith.constant 0 : index
      %c0_20 = arith.constant 0 : index
      %23 = vector.load %arg6[%c0_18, %c0_19, %c0_20] : memref<1x128x128xf32, #tpu.memory_space<vmem>>, vector<1x128x128xf32>
      %24 = vector.shape_cast %23 : vector<1x128x128xf32> to vector<128x128xf32>
      %25 = vector.shape_cast %22 : vector<128x128xf32> to vector<1x128x128xf32>
      tpu.vector_store %arg6[%c0_18, %c0_19, %c0_20], %25 {strides = array<i32>} : memref<1x128x128xf32, #tpu.memory_space<vmem>>, vector<1x128x128xf32>,
      %cst_21 = arith.constant dense<0.000000e+00> : vector<128xf32>
      %26 = vector.multi_reduction <add>, %22, %cst_21 [0] : vector<128x128xf32> to vector<128xf32>
      %27 = vector.shape_cast %26 : vector<128xf32> to vector<1x128xf32>
      %28 = arith.mulf %22, %22 : vector<128x128xf32>
      %cst_22 = arith.constant dense<0.000000e+00> : vector<128xf32>
      %29 = vector.multi_reduction <add>, %28, %cst_22 [0] : vector<128x128xf32> to vector<128xf32>
      %30 = vector.shape_cast %29 : vector<128xf32> to vector<1x128xf32>
      %31 = tpu.concatenate %27, %30 in 0 : vector<1x128xf32>, vector<1x128xf32> -> vector<2x128xf32>
      %c0_23 = arith.constant 0 : index
      %c0_24 = arith.constant 0 : index
      %c0_25 = arith.constant 0 : index
      %c0_26 = arith.constant 0 : index
      %32 = vector.load %arg7[%c0_23, %c0_24, %c0_25, %c0_26] : memref<1x1x2x128xf32, #tpu.memory_space<vmem>>, vector<1x1x2x128xf32>
      %33 = vector.shape_cast %32 : vector<1x1x2x128xf32> to vector<2x128xf32>
      %34 = vector.shape_cast %31 : vector<2x128xf32> to vector<1x1x2x128xf32>
      tpu.vector_store %arg7[%c0_23, %c0_24, %c0_25, %c0_26], %34 {strides = array<i32>} : memref<1x1x2x128xf32, #tpu.memory_space<vmem>>, vector<1x1x2x128xf32>,
    } else {
    }
    return
  }
  func.func @transform_0(%arg0: i32, %arg1: i32, %arg2: i32) -> (i32, i32, i32) {
    %c0_i32 = arith.constant 0 : i32
    return %arg0, %arg1, %arg2 : i32, i32, i32
  }
  func.func @transform_1(%arg0: i32, %arg1: i32, %arg2: i32) -> (i32, i32, i32) {
    %c0_i32 = arith.constant 0 : i32
    %c0_i32_0 = arith.constant 0 : i32
    return %arg0, %arg2, %c0_i32 : i32, i32, i32
  }
  func.func @transform_2(%arg0: i32, %arg1: i32, %arg2: i32) -> (i32, i32) {
    %c0_i32 = arith.constant 0 : i32
    %c0_i32_0 = arith.constant 0 : i32
    %c0_i32_1 = arith.constant 0 : i32
    return %c0_i32, %c0_i32_0 : i32, i32
  }
  func.func @transform_3(%arg0: i32, %arg1: i32, %arg2: i32) -> (i32, i32, i32) {
    %c0_i32 = arith.constant 0 : i32
    %c0_i32_0 = arith.constant 0 : i32
    return %arg0, %arg1, %c0_i32 : i32, i32, i32
  }
  func.func @transform_4(%arg0: i32, %arg1: i32, %arg2: i32) -> (i32, i32, i32, i32) {
    %c0_i32 = arith.constant 0 : i32
    %c0_i32_0 = arith.constant 0 : i32
    %c0_i32_1 = arith.constant 0 : i32
    return %arg0, %arg1, %c0_i32, %c0_i32_0 : i32, i32, i32, i32
  }
}

module attributes {stable_mosaic.version = 11 : i64} {
  func.func @_bn_apply_kernel(%arg0: i32, %arg1: memref<128x16xf32, #tpu.memory_space<vmem>>, %arg2: memref<1x16xf32, #tpu.memory_space<vmem>>, %arg3: memref<1x16xf32, #tpu.memory_space<vmem>>, %arg4: memref<128x16xf32, #tpu.memory_space<vmem>>) attributes {dimension_semantics = [#tpu.dimension_semantics<parallel>], iteration_bounds = array<i64: 1>, scalar_prefetch = 0 : i64, scratch_operands = 0 : i64, tpu.core_type = #tpu.core_type<tc>, window_params = [{transform_indices = @transform_0, window_bounds = array<i64: 128, 16>}, {pipeline_mode = #tpu.pipeline_mode<synchronous>, transform_indices = @transform_1, window_bounds = array<i64: 1, 16>}, {pipeline_mode = #tpu.pipeline_mode<synchronous>, transform_indices = @transform_2, window_bounds = array<i64: 1, 16>}, {transform_indices = @transform_3, window_bounds = array<i64: 128, 16>}]} {
    %c0 = arith.constant 0 : index
    %c0_0 = arith.constant 0 : index
    %0 = vector.load %arg1[%c0, %c0_0] : memref<128x16xf32, #tpu.memory_space<vmem>>, vector<128x16xf32>
    %c0_1 = arith.constant 0 : index
    %c0_2 = arith.constant 0 : index
    %1 = vector.load %arg2[%c0_1, %c0_2] : memref<1x16xf32, #tpu.memory_space<vmem>>, vector<1x16xf32>
    %2 = vector.broadcast %1 : vector<1x16xf32> to vector<128x16xf32>
    %3 = arith.subf %0, %2 : vector<128x16xf32>
    %c0_3 = arith.constant 0 : index
    %c0_4 = arith.constant 0 : index
    %4 = vector.load %arg3[%c0_3, %c0_4] : memref<1x16xf32, #tpu.memory_space<vmem>>, vector<1x16xf32>
    %5 = vector.broadcast %4 : vector<1x16xf32> to vector<128x16xf32>
    %6 = arith.mulf %3, %5 : vector<128x16xf32>
    %c0_5 = arith.constant 0 : index
    %c0_6 = arith.constant 0 : index
    %7 = vector.load %arg4[%c0_5, %c0_6] : memref<128x16xf32, #tpu.memory_space<vmem>>, vector<128x16xf32>
    tpu.vector_store %arg4[%c0_5, %c0_6], %6 {strides = array<i32>} : memref<128x16xf32, #tpu.memory_space<vmem>>, vector<128x16xf32>,
    return
  }
  func.func @transform_0(%arg0: i32) -> (i32, i32) {
    %c0_i32 = arith.constant 0 : i32
    %c0_i32_0 = arith.constant 0 : i32
    return %arg0, %c0_i32 : i32, i32
  }
  func.func @transform_1(%arg0: i32) -> (i32, i32) {
    %c0_i32 = arith.constant 0 : i32
    %c0_i32_0 = arith.constant 0 : i32
    %c0_i32_1 = arith.constant 0 : i32
    return %c0_i32, %c0_i32_0 : i32, i32
  }
  func.func @transform_2(%arg0: i32) -> (i32, i32) {
    %c0_i32 = arith.constant 0 : i32
    %c0_i32_0 = arith.constant 0 : i32
    %c0_i32_1 = arith.constant 0 : i32
    return %c0_i32, %c0_i32_0 : i32, i32
  }
  func.func @transform_3(%arg0: i32) -> (i32, i32) {
    %c0_i32 = arith.constant 0 : i32
    %c0_i32_0 = arith.constant 0 : i32
    return %arg0, %c0_i32 : i32, i32
  }
}

module attributes {stable_mosaic.version = 11 : i64} {
  func.func @_bn_apply_kernel(%arg0: i32, %arg1: memref<32x32xf32, #tpu.memory_space<vmem>>, %arg2: memref<1x32xf32, #tpu.memory_space<vmem>>, %arg3: memref<1x32xf32, #tpu.memory_space<vmem>>, %arg4: memref<32x32xf32, #tpu.memory_space<vmem>>) attributes {dimension_semantics = [#tpu.dimension_semantics<parallel>], iteration_bounds = array<i64: 1>, scalar_prefetch = 0 : i64, scratch_operands = 0 : i64, tpu.core_type = #tpu.core_type<tc>, window_params = [{transform_indices = @transform_0, window_bounds = array<i64: 32, 32>}, {pipeline_mode = #tpu.pipeline_mode<synchronous>, transform_indices = @transform_1, window_bounds = array<i64: 1, 32>}, {pipeline_mode = #tpu.pipeline_mode<synchronous>, transform_indices = @transform_2, window_bounds = array<i64: 1, 32>}, {transform_indices = @transform_3, window_bounds = array<i64: 32, 32>}]} {
    %c0 = arith.constant 0 : index
    %c0_0 = arith.constant 0 : index
    %0 = vector.load %arg1[%c0, %c0_0] : memref<32x32xf32, #tpu.memory_space<vmem>>, vector<32x32xf32>
    %c0_1 = arith.constant 0 : index
    %c0_2 = arith.constant 0 : index
    %1 = vector.load %arg2[%c0_1, %c0_2] : memref<1x32xf32, #tpu.memory_space<vmem>>, vector<1x32xf32>
    %2 = vector.broadcast %1 : vector<1x32xf32> to vector<32x32xf32>
    %3 = arith.subf %0, %2 : vector<32x32xf32>
    %c0_3 = arith.constant 0 : index
    %c0_4 = arith.constant 0 : index
    %4 = vector.load %arg3[%c0_3, %c0_4] : memref<1x32xf32, #tpu.memory_space<vmem>>, vector<1x32xf32>
    %5 = vector.broadcast %4 : vector<1x32xf32> to vector<32x32xf32>
    %6 = arith.mulf %3, %5 : vector<32x32xf32>
    %c0_5 = arith.constant 0 : index
    %c0_6 = arith.constant 0 : index
    %7 = vector.load %arg4[%c0_5, %c0_6] : memref<32x32xf32, #tpu.memory_space<vmem>>, vector<32x32xf32>
    tpu.vector_store %arg4[%c0_5, %c0_6], %6 {strides = array<i32>} : memref<32x32xf32, #tpu.memory_space<vmem>>, vector<32x32xf32>,
    return
  }
  func.func @transform_0(%arg0: i32) -> (i32, i32) {
    %c0_i32 = arith.constant 0 : i32
    %c0_i32_0 = arith.constant 0 : i32
    return %arg0, %c0_i32 : i32, i32
  }
  func.func @transform_1(%arg0: i32) -> (i32, i32) {
    %c0_i32 = arith.constant 0 : i32
    %c0_i32_0 = arith.constant 0 : i32
    %c0_i32_1 = arith.constant 0 : i32
    return %c0_i32, %c0_i32_0 : i32, i32
  }
  func.func @transform_2(%arg0: i32) -> (i32, i32) {
    %c0_i32 = arith.constant 0 : i32
    %c0_i32_0 = arith.constant 0 : i32
    %c0_i32_1 = arith.constant 0 : i32
    return %c0_i32, %c0_i32_0 : i32, i32
  }
  func.func @transform_3(%arg0: i32) -> (i32, i32) {
    %c0_i32 = arith.constant 0 : i32
    %c0_i32_0 = arith.constant 0 : i32
    return %arg0, %c0_i32 : i32, i32
  }
}

module attributes {stable_mosaic.version = 11 : i64} {
  func.func @_gemm_kernel(%arg0: i32, %arg1: i32, %arg2: i32, %arg3: memref<1x32x256xbf16, #tpu.memory_space<vmem>>, %arg4: memref<1x256x128xbf16, #tpu.memory_space<vmem>>, %arg5: memref<1x128xf32, #tpu.memory_space<vmem>>, %arg6: memref<1x32x128xf32, #tpu.memory_space<vmem>>, %arg7: memref<1x1x2x128xf32, #tpu.memory_space<vmem>>, %arg8: memref<32x128xf32, #tpu.memory_space<vmem>>) attributes {dimension_semantics = [#tpu.dimension_semantics<parallel>, #tpu.dimension_semantics<parallel>, #tpu.dimension_semantics<arbitrary>], iteration_bounds = array<i64: 1, 1, 1>, scalar_prefetch = 0 : i64, scratch_operands = 1 : i64, tpu.core_type = #tpu.core_type<tc>, window_params = [{transform_indices = @transform_0, window_bounds = array<i64: 1, 32, 256>}, {transform_indices = @transform_1, window_bounds = array<i64: 1, 256, 128>}, {pipeline_mode = #tpu.pipeline_mode<synchronous>, transform_indices = @transform_2, window_bounds = array<i64: 1, 128>}, {transform_indices = @transform_3, window_bounds = array<i64: 1, 32, 128>}, {transform_indices = @transform_4, window_bounds = array<i64: 1, 1, 2, 128>}]} {
    %c0_i32 = arith.constant 0 : i32
    %0 = arith.cmpi eq, %arg2, %c0_i32 : i32
    %1 = arith.extui %0 : i1 to i32
    %c0_i32_0 = arith.constant 0 : i32
    %2 = arith.cmpi ne, %1, %c0_i32_0 : i32
    scf.if %2 {
      %cst_14 = arith.constant 0.000000e+00 : f32
      %19 = vector.broadcast %cst_14 : f32 to vector<32x128xf32>
      %c0_15 = arith.constant 0 : index
      %c0_16 = arith.constant 0 : index
      %20 = vector.load %arg8[%c0_15, %c0_16] : memref<32x128xf32, #tpu.memory_space<vmem>>, vector<32x128xf32>
      tpu.vector_store %arg8[%c0_15, %c0_16], %19 {strides = array<i32>} : memref<32x128xf32, #tpu.memory_space<vmem>>, vector<32x128xf32>,
    } else {
    }
    %c0 = arith.constant 0 : index
    %c0_1 = arith.constant 0 : index
    %c0_2 = arith.constant 0 : index
    %3 = vector.load %arg3[%c0, %c0_1, %c0_2] : memref<1x32x256xbf16, #tpu.memory_space<vmem>>, vector<1x32x256xbf16>
    %4 = vector.shape_cast %3 : vector<1x32x256xbf16> to vector<32x256xbf16>
    %cst = arith.constant 0.000000e+00 : bf16
    %5 = vector.broadcast %cst : bf16 to vector<32x256xbf16>
    %6 = arith.cmpf ogt, %4, %5 : vector<32x256xbf16>
    %cst_3 = arith.constant 2.001950e-01 : bf16
    %7 = vector.broadcast %cst_3 : bf16 to vector<32x256xbf16>
    %8 = arith.mulf %7, %4 : vector<32x256xbf16>
    %9 = arith.select %6, %4, %8 : vector<32x256xi1>, vector<32x256xbf16>
    %c0_4 = arith.constant 0 : index
    %c0_5 = arith.constant 0 : index
    %10 = vector.load %arg8[%c0_4, %c0_5] : memref<32x128xf32, #tpu.memory_space<vmem>>, vector<32x128xf32>
    %c0_6 = arith.constant 0 : index
    %c0_7 = arith.constant 0 : index
    %c0_8 = arith.constant 0 : index
    %11 = vector.load %arg4[%c0_6, %c0_7, %c0_8] : memref<1x256x128xbf16, #tpu.memory_space<vmem>>, vector<1x256x128xbf16>
    %12 = vector.shape_cast %11 : vector<1x256x128xbf16> to vector<256x128xbf16>
    %cst_9 = arith.constant dense<0.000000e+00> : vector<32x128xf32>
    %13 = tpu.matmul %9, %12, %cst_9 {dimension_numbers = #tpu.dot_dimension_numbers<[1], [0], [0], [1], [0, 0, 1, 1], [], []>} : vector<32x256xbf16>, vector<256x128xbf16>, vector<32x128xf32> -> vector<32x128xf32>
    %14 = arith.addf %10, %13 : vector<32x128xf32>
    %c0_10 = arith.constant 0 : index
    %c0_11 = arith.constant 0 : index
    %15 = vector.load %arg8[%c0_10, %c0_11] : memref<32x128xf32, #tpu.memory_space<vmem>>, vector<32x128xf32>
    tpu.vector_store %arg8[%c0_10, %c0_11], %14 {strides = array<i32>} : memref<32x128xf32, #tpu.memory_space<vmem>>, vector<32x128xf32>,
    %c0_i32_12 = arith.constant 0 : i32
    %16 = arith.cmpi eq, %arg2, %c0_i32_12 : i32
    %17 = arith.extui %16 : i1 to i32
    %c0_i32_13 = arith.constant 0 : i32
    %18 = arith.cmpi ne, %17, %c0_i32_13 : i32
    scf.if %18 {
      %c0_14 = arith.constant 0 : index
      %c0_15 = arith.constant 0 : index
      %19 = vector.load %arg8[%c0_14, %c0_15] : memref<32x128xf32, #tpu.memory_space<vmem>>, vector<32x128xf32>
      %c0_16 = arith.constant 0 : index
      %c0_17 = arith.constant 0 : index
      %20 = vector.load %arg5[%c0_16, %c0_17] : memref<1x128xf32, #tpu.memory_space<vmem>>, vector<1x128xf32>
      %21 = vector.broadcast %20 : vector<1x128xf32> to vector<32x128xf32>
      %22 = arith.addf %19, %21 : vector<32x128xf32>
      %c0_18 = arith.constant 0 : index
      %c0_19 = arith.constant 0 : index
      %c0_20 = arith.constant 0 : index
      %23 = vector.load %arg6[%c0_18, %c0_19, %c0_20] : memref<1x32x128xf32, #tpu.memory_space<vmem>>, vector<1x32x128xf32>
      %24 = vector.shape_cast %23 : vector<1x32x128xf32> to vector<32x128xf32>
      %25 = vector.shape_cast %22 : vector<32x128xf32> to vector<1x32x128xf32>
      tpu.vector_store %arg6[%c0_18, %c0_19, %c0_20], %25 {strides = array<i32>} : memref<1x32x128xf32, #tpu.memory_space<vmem>>, vector<1x32x128xf32>,
      %cst_21 = arith.constant dense<0.000000e+00> : vector<128xf32>
      %26 = vector.multi_reduction <add>, %22, %cst_21 [0] : vector<32x128xf32> to vector<128xf32>
      %27 = vector.shape_cast %26 : vector<128xf32> to vector<1x128xf32>
      %28 = arith.mulf %22, %22 : vector<32x128xf32>
      %cst_22 = arith.constant dense<0.000000e+00> : vector<128xf32>
      %29 = vector.multi_reduction <add>, %28, %cst_22 [0] : vector<32x128xf32> to vector<128xf32>
      %30 = vector.shape_cast %29 : vector<128xf32> to vector<1x128xf32>
      %31 = tpu.concatenate %27, %30 in 0 : vector<1x128xf32>, vector<1x128xf32> -> vector<2x128xf32>
      %c0_23 = arith.constant 0 : index
      %c0_24 = arith.constant 0 : index
      %c0_25 = arith.constant 0 : index
      %c0_26 = arith.constant 0 : index
      %32 = vector.load %arg7[%c0_23, %c0_24, %c0_25, %c0_26] : memref<1x1x2x128xf32, #tpu.memory_space<vmem>>, vector<1x1x2x128xf32>
      %33 = vector.shape_cast %32 : vector<1x1x2x128xf32> to vector<2x128xf32>
      %34 = vector.shape_cast %31 : vector<2x128xf32> to vector<1x1x2x128xf32>
      tpu.vector_store %arg7[%c0_23, %c0_24, %c0_25, %c0_26], %34 {strides = array<i32>} : memref<1x1x2x128xf32, #tpu.memory_space<vmem>>, vector<1x1x2x128xf32>,
    } else {
    }
    return
  }
  func.func @transform_0(%arg0: i32, %arg1: i32, %arg2: i32) -> (i32, i32, i32) {
    %c0_i32 = arith.constant 0 : i32
    return %arg0, %arg1, %arg2 : i32, i32, i32
  }
  func.func @transform_1(%arg0: i32, %arg1: i32, %arg2: i32) -> (i32, i32, i32) {
    %c0_i32 = arith.constant 0 : i32
    %c0_i32_0 = arith.constant 0 : i32
    return %arg0, %arg2, %c0_i32 : i32, i32, i32
  }
  func.func @transform_2(%arg0: i32, %arg1: i32, %arg2: i32) -> (i32, i32) {
    %c0_i32 = arith.constant 0 : i32
    %c0_i32_0 = arith.constant 0 : i32
    %c0_i32_1 = arith.constant 0 : i32
    return %c0_i32, %c0_i32_0 : i32, i32
  }
  func.func @transform_3(%arg0: i32, %arg1: i32, %arg2: i32) -> (i32, i32, i32) {
    %c0_i32 = arith.constant 0 : i32
    %c0_i32_0 = arith.constant 0 : i32
    return %arg0, %arg1, %c0_i32 : i32, i32, i32
  }
  func.func @transform_4(%arg0: i32, %arg1: i32, %arg2: i32) -> (i32, i32, i32, i32) {
    %c0_i32 = arith.constant 0 : i32
    %c0_i32_0 = arith.constant 0 : i32
    %c0_i32_1 = arith.constant 0 : i32
    return %arg0, %arg1, %c0_i32, %c0_i32_0 : i32, i32, i32, i32
  }
}

module attributes {stable_mosaic.version = 11 : i64} {
  func.func @_bn_apply_kernel(%arg0: i32, %arg1: memref<8x64xf32, #tpu.memory_space<vmem>>, %arg2: memref<1x64xf32, #tpu.memory_space<vmem>>, %arg3: memref<1x64xf32, #tpu.memory_space<vmem>>, %arg4: memref<8x64xf32, #tpu.memory_space<vmem>>) attributes {dimension_semantics = [#tpu.dimension_semantics<parallel>], iteration_bounds = array<i64: 1>, scalar_prefetch = 0 : i64, scratch_operands = 0 : i64, tpu.core_type = #tpu.core_type<tc>, window_params = [{transform_indices = @transform_0, window_bounds = array<i64: 8, 64>}, {pipeline_mode = #tpu.pipeline_mode<synchronous>, transform_indices = @transform_1, window_bounds = array<i64: 1, 64>}, {pipeline_mode = #tpu.pipeline_mode<synchronous>, transform_indices = @transform_2, window_bounds = array<i64: 1, 64>}, {transform_indices = @transform_3, window_bounds = array<i64: 8, 64>}]} {
    %c0 = arith.constant 0 : index
    %c0_0 = arith.constant 0 : index
    %0 = vector.load %arg1[%c0, %c0_0] : memref<8x64xf32, #tpu.memory_space<vmem>>, vector<8x64xf32>
    %c0_1 = arith.constant 0 : index
    %c0_2 = arith.constant 0 : index
    %1 = vector.load %arg2[%c0_1, %c0_2] : memref<1x64xf32, #tpu.memory_space<vmem>>, vector<1x64xf32>
    %2 = vector.broadcast %1 : vector<1x64xf32> to vector<8x64xf32>
    %3 = arith.subf %0, %2 : vector<8x64xf32>
    %c0_3 = arith.constant 0 : index
    %c0_4 = arith.constant 0 : index
    %4 = vector.load %arg3[%c0_3, %c0_4] : memref<1x64xf32, #tpu.memory_space<vmem>>, vector<1x64xf32>
    %5 = vector.broadcast %4 : vector<1x64xf32> to vector<8x64xf32>
    %6 = arith.mulf %3, %5 : vector<8x64xf32>
    %c0_5 = arith.constant 0 : index
    %c0_6 = arith.constant 0 : index
    %7 = vector.load %arg4[%c0_5, %c0_6] : memref<8x64xf32, #tpu.memory_space<vmem>>, vector<8x64xf32>
    tpu.vector_store %arg4[%c0_5, %c0_6], %6 {strides = array<i32>} : memref<8x64xf32, #tpu.memory_space<vmem>>, vector<8x64xf32>,
    return
  }
  func.func @transform_0(%arg0: i32) -> (i32, i32) {
    %c0_i32 = arith.constant 0 : i32
    %c0_i32_0 = arith.constant 0 : i32
    return %arg0, %c0_i32 : i32, i32
  }
  func.func @transform_1(%arg0: i32) -> (i32, i32) {
    %c0_i32 = arith.constant 0 : i32
    %c0_i32_0 = arith.constant 0 : i32
    %c0_i32_1 = arith.constant 0 : i32
    return %c0_i32, %c0_i32_0 : i32, i32
  }
  func.func @transform_2(%arg0: i32) -> (i32, i32) {
    %c0_i32 = arith.constant 0 : i32
    %c0_i32_0 = arith.constant 0 : i32
    %c0_i32_1 = arith.constant 0 : i32
    return %c0_i32, %c0_i32_0 : i32, i32
  }
  func.func @transform_3(%arg0: i32) -> (i32, i32) {
    %c0_i32 = arith.constant 0 : i32
    %c0_i32_0 = arith.constant 0 : i32
    return %arg0, %c0_i32 : i32, i32
  }
}

module attributes {stable_mosaic.version = 11 : i64} {
  func.func @_gemm_kernel(%arg0: i32, %arg1: i32, %arg2: i32, %arg3: memref<1x16x512xbf16, #tpu.memory_space<vmem>>, %arg4: memref<1x512x128xbf16, #tpu.memory_space<vmem>>, %arg5: memref<1x128xf32, #tpu.memory_space<vmem>>, %arg6: memref<1x16x128xf32, #tpu.memory_space<vmem>>, %arg7: memref<1x1x2x128xf32, #tpu.memory_space<vmem>>, %arg8: memref<16x128xf32, #tpu.memory_space<vmem>>) attributes {dimension_semantics = [#tpu.dimension_semantics<parallel>, #tpu.dimension_semantics<parallel>, #tpu.dimension_semantics<arbitrary>], iteration_bounds = array<i64: 1, 1, 1>, scalar_prefetch = 0 : i64, scratch_operands = 1 : i64, tpu.core_type = #tpu.core_type<tc>, window_params = [{transform_indices = @transform_0, window_bounds = array<i64: 1, 16, 512>}, {transform_indices = @transform_1, window_bounds = array<i64: 1, 512, 128>}, {pipeline_mode = #tpu.pipeline_mode<synchronous>, transform_indices = @transform_2, window_bounds = array<i64: 1, 128>}, {transform_indices = @transform_3, window_bounds = array<i64: 1, 16, 128>}, {transform_indices = @transform_4, window_bounds = array<i64: 1, 1, 2, 128>}]} {
    %c0_i32 = arith.constant 0 : i32
    %0 = arith.cmpi eq, %arg2, %c0_i32 : i32
    %1 = arith.extui %0 : i1 to i32
    %c0_i32_0 = arith.constant 0 : i32
    %2 = arith.cmpi ne, %1, %c0_i32_0 : i32
    scf.if %2 {
      %cst_14 = arith.constant 0.000000e+00 : f32
      %19 = vector.broadcast %cst_14 : f32 to vector<16x128xf32>
      %c0_15 = arith.constant 0 : index
      %c0_16 = arith.constant 0 : index
      %20 = vector.load %arg8[%c0_15, %c0_16] : memref<16x128xf32, #tpu.memory_space<vmem>>, vector<16x128xf32>
      tpu.vector_store %arg8[%c0_15, %c0_16], %19 {strides = array<i32>} : memref<16x128xf32, #tpu.memory_space<vmem>>, vector<16x128xf32>,
    } else {
    }
    %c0 = arith.constant 0 : index
    %c0_1 = arith.constant 0 : index
    %c0_2 = arith.constant 0 : index
    %3 = vector.load %arg3[%c0, %c0_1, %c0_2] : memref<1x16x512xbf16, #tpu.memory_space<vmem>>, vector<1x16x512xbf16>
    %4 = vector.shape_cast %3 : vector<1x16x512xbf16> to vector<16x512xbf16>
    %cst = arith.constant 0.000000e+00 : bf16
    %5 = vector.broadcast %cst : bf16 to vector<16x512xbf16>
    %6 = arith.cmpf ogt, %4, %5 : vector<16x512xbf16>
    %cst_3 = arith.constant 2.001950e-01 : bf16
    %7 = vector.broadcast %cst_3 : bf16 to vector<16x512xbf16>
    %8 = arith.mulf %7, %4 : vector<16x512xbf16>
    %9 = arith.select %6, %4, %8 : vector<16x512xi1>, vector<16x512xbf16>
    %c0_4 = arith.constant 0 : index
    %c0_5 = arith.constant 0 : index
    %10 = vector.load %arg8[%c0_4, %c0_5] : memref<16x128xf32, #tpu.memory_space<vmem>>, vector<16x128xf32>
    %c0_6 = arith.constant 0 : index
    %c0_7 = arith.constant 0 : index
    %c0_8 = arith.constant 0 : index
    %11 = vector.load %arg4[%c0_6, %c0_7, %c0_8] : memref<1x512x128xbf16, #tpu.memory_space<vmem>>, vector<1x512x128xbf16>
    %12 = vector.shape_cast %11 : vector<1x512x128xbf16> to vector<512x128xbf16>
    %cst_9 = arith.constant dense<0.000000e+00> : vector<16x128xf32>
    %13 = tpu.matmul %9, %12, %cst_9 {dimension_numbers = #tpu.dot_dimension_numbers<[1], [0], [0], [1], [0, 0, 1, 1], [], []>} : vector<16x512xbf16>, vector<512x128xbf16>, vector<16x128xf32> -> vector<16x128xf32>
    %14 = arith.addf %10, %13 : vector<16x128xf32>
    %c0_10 = arith.constant 0 : index
    %c0_11 = arith.constant 0 : index
    %15 = vector.load %arg8[%c0_10, %c0_11] : memref<16x128xf32, #tpu.memory_space<vmem>>, vector<16x128xf32>
    tpu.vector_store %arg8[%c0_10, %c0_11], %14 {strides = array<i32>} : memref<16x128xf32, #tpu.memory_space<vmem>>, vector<16x128xf32>,
    %c0_i32_12 = arith.constant 0 : i32
    %16 = arith.cmpi eq, %arg2, %c0_i32_12 : i32
    %17 = arith.extui %16 : i1 to i32
    %c0_i32_13 = arith.constant 0 : i32
    %18 = arith.cmpi ne, %17, %c0_i32_13 : i32
    scf.if %18 {
      %c0_14 = arith.constant 0 : index
      %c0_15 = arith.constant 0 : index
      %19 = vector.load %arg8[%c0_14, %c0_15] : memref<16x128xf32, #tpu.memory_space<vmem>>, vector<16x128xf32>
      %c0_16 = arith.constant 0 : index
      %c0_17 = arith.constant 0 : index
      %20 = vector.load %arg5[%c0_16, %c0_17] : memref<1x128xf32, #tpu.memory_space<vmem>>, vector<1x128xf32>
      %21 = vector.broadcast %20 : vector<1x128xf32> to vector<16x128xf32>
      %22 = arith.addf %19, %21 : vector<16x128xf32>
      %c0_18 = arith.constant 0 : index
      %c0_19 = arith.constant 0 : index
      %c0_20 = arith.constant 0 : index
      %23 = vector.load %arg6[%c0_18, %c0_19, %c0_20] : memref<1x16x128xf32, #tpu.memory_space<vmem>>, vector<1x16x128xf32>
      %24 = vector.shape_cast %23 : vector<1x16x128xf32> to vector<16x128xf32>
      %25 = vector.shape_cast %22 : vector<16x128xf32> to vector<1x16x128xf32>
      tpu.vector_store %arg6[%c0_18, %c0_19, %c0_20], %25 {strides = array<i32>} : memref<1x16x128xf32, #tpu.memory_space<vmem>>, vector<1x16x128xf32>,
      %cst_21 = arith.constant dense<0.000000e+00> : vector<128xf32>
      %26 = vector.multi_reduction <add>, %22, %cst_21 [0] : vector<16x128xf32> to vector<128xf32>
      %27 = vector.shape_cast %26 : vector<128xf32> to vector<1x128xf32>
      %28 = arith.mulf %22, %22 : vector<16x128xf32>
      %cst_22 = arith.constant dense<0.000000e+00> : vector<128xf32>
      %29 = vector.multi_reduction <add>, %28, %cst_22 [0] : vector<16x128xf32> to vector<128xf32>
      %30 = vector.shape_cast %29 : vector<128xf32> to vector<1x128xf32>
      %31 = tpu.concatenate %27, %30 in 0 : vector<1x128xf32>, vector<1x128xf32> -> vector<2x128xf32>
      %c0_23 = arith.constant 0 : index
      %c0_24 = arith.constant 0 : index
      %c0_25 = arith.constant 0 : index
      %c0_26 = arith.constant 0 : index
      %32 = vector.load %arg7[%c0_23, %c0_24, %c0_25, %c0_26] : memref<1x1x2x128xf32, #tpu.memory_space<vmem>>, vector<1x1x2x128xf32>
      %33 = vector.shape_cast %32 : vector<1x1x2x128xf32> to vector<2x128xf32>
      %34 = vector.shape_cast %31 : vector<2x128xf32> to vector<1x1x2x128xf32>
      tpu.vector_store %arg7[%c0_23, %c0_24, %c0_25, %c0_26], %34 {strides = array<i32>} : memref<1x1x2x128xf32, #tpu.memory_space<vmem>>, vector<1x1x2x128xf32>,
    } else {
    }
    return
  }
  func.func @transform_0(%arg0: i32, %arg1: i32, %arg2: i32) -> (i32, i32, i32) {
    %c0_i32 = arith.constant 0 : i32
    return %arg0, %arg1, %arg2 : i32, i32, i32
  }
  func.func @transform_1(%arg0: i32, %arg1: i32, %arg2: i32) -> (i32, i32, i32) {
    %c0_i32 = arith.constant 0 : i32
    %c0_i32_0 = arith.constant 0 : i32
    return %arg0, %arg2, %c0_i32 : i32, i32, i32
  }
  func.func @transform_2(%arg0: i32, %arg1: i32, %arg2: i32) -> (i32, i32) {
    %c0_i32 = arith.constant 0 : i32
    %c0_i32_0 = arith.constant 0 : i32
    %c0_i32_1 = arith.constant 0 : i32
    return %c0_i32, %c0_i32_0 : i32, i32
  }
  func.func @transform_3(%arg0: i32, %arg1: i32, %arg2: i32) -> (i32, i32, i32) {
    %c0_i32 = arith.constant 0 : i32
    %c0_i32_0 = arith.constant 0 : i32
    return %arg0, %arg1, %c0_i32 : i32, i32, i32
  }
  func.func @transform_4(%arg0: i32, %arg1: i32, %arg2: i32) -> (i32, i32, i32, i32) {
    %c0_i32 = arith.constant 0 : i32
    %c0_i32_0 = arith.constant 0 : i32
    %c0_i32_1 = arith.constant 0 : i32
    return %arg0, %arg1, %c0_i32, %c0_i32_0 : i32, i32, i32, i32
  }
}

module attributes {stable_mosaic.version = 11 : i64} {
  func.func @_gemm_kernel(%arg0: i32, %arg1: i32, %arg2: i32, %arg3: memref<1x16x256xbf16, #tpu.memory_space<vmem>>, %arg4: memref<1x256x128xbf16, #tpu.memory_space<vmem>>, %arg5: memref<1x128xf32, #tpu.memory_space<vmem>>, %arg6: memref<1x16x128xf32, #tpu.memory_space<vmem>>, %arg7: memref<1x1x2x128xf32, #tpu.memory_space<vmem>>, %arg8: memref<16x128xf32, #tpu.memory_space<vmem>>) attributes {dimension_semantics = [#tpu.dimension_semantics<parallel>, #tpu.dimension_semantics<parallel>, #tpu.dimension_semantics<arbitrary>], iteration_bounds = array<i64: 4, 1, 1>, scalar_prefetch = 0 : i64, scratch_operands = 1 : i64, tpu.core_type = #tpu.core_type<tc>, window_params = [{transform_indices = @transform_0, window_bounds = array<i64: 1, 16, 256>}, {transform_indices = @transform_1, window_bounds = array<i64: 1, 256, 128>}, {pipeline_mode = #tpu.pipeline_mode<synchronous>, transform_indices = @transform_2, window_bounds = array<i64: 1, 128>}, {transform_indices = @transform_3, window_bounds = array<i64: 1, 16, 128>}, {transform_indices = @transform_4, window_bounds = array<i64: 1, 1, 2, 128>}]} {
    %c0_i32 = arith.constant 0 : i32
    %0 = arith.cmpi eq, %arg2, %c0_i32 : i32
    %1 = arith.extui %0 : i1 to i32
    %c0_i32_0 = arith.constant 0 : i32
    %2 = arith.cmpi ne, %1, %c0_i32_0 : i32
    scf.if %2 {
      %cst_13 = arith.constant 0.000000e+00 : f32
      %16 = vector.broadcast %cst_13 : f32 to vector<16x128xf32>
      %c0_14 = arith.constant 0 : index
      %c0_15 = arith.constant 0 : index
      %17 = vector.load %arg8[%c0_14, %c0_15] : memref<16x128xf32, #tpu.memory_space<vmem>>, vector<16x128xf32>
      tpu.vector_store %arg8[%c0_14, %c0_15], %16 {strides = array<i32>} : memref<16x128xf32, #tpu.memory_space<vmem>>, vector<16x128xf32>,
    } else {
    }
    %c0 = arith.constant 0 : index
    %c0_1 = arith.constant 0 : index
    %c0_2 = arith.constant 0 : index
    %3 = vector.load %arg3[%c0, %c0_1, %c0_2] : memref<1x16x256xbf16, #tpu.memory_space<vmem>>, vector<1x16x256xbf16>
    %4 = vector.shape_cast %3 : vector<1x16x256xbf16> to vector<16x256xbf16>
    %cst = arith.constant 0.000000e+00 : bf16
    %5 = vector.broadcast %cst : bf16 to vector<16x256xbf16>
    %6 = arith.maximumf %4, %5 : vector<16x256xbf16>
    %c0_3 = arith.constant 0 : index
    %c0_4 = arith.constant 0 : index
    %7 = vector.load %arg8[%c0_3, %c0_4] : memref<16x128xf32, #tpu.memory_space<vmem>>, vector<16x128xf32>
    %c0_5 = arith.constant 0 : index
    %c0_6 = arith.constant 0 : index
    %c0_7 = arith.constant 0 : index
    %8 = vector.load %arg4[%c0_5, %c0_6, %c0_7] : memref<1x256x128xbf16, #tpu.memory_space<vmem>>, vector<1x256x128xbf16>
    %9 = vector.shape_cast %8 : vector<1x256x128xbf16> to vector<256x128xbf16>
    %cst_8 = arith.constant dense<0.000000e+00> : vector<16x128xf32>
    %10 = tpu.matmul %6, %9, %cst_8 {dimension_numbers = #tpu.dot_dimension_numbers<[1], [0], [0], [1], [0, 0, 1, 1], [], []>} : vector<16x256xbf16>, vector<256x128xbf16>, vector<16x128xf32> -> vector<16x128xf32>
    %11 = arith.addf %7, %10 : vector<16x128xf32>
    %c0_9 = arith.constant 0 : index
    %c0_10 = arith.constant 0 : index
    %12 = vector.load %arg8[%c0_9, %c0_10] : memref<16x128xf32, #tpu.memory_space<vmem>>, vector<16x128xf32>
    tpu.vector_store %arg8[%c0_9, %c0_10], %11 {strides = array<i32>} : memref<16x128xf32, #tpu.memory_space<vmem>>, vector<16x128xf32>,
    %c0_i32_11 = arith.constant 0 : i32
    %13 = arith.cmpi eq, %arg2, %c0_i32_11 : i32
    %14 = arith.extui %13 : i1 to i32
    %c0_i32_12 = arith.constant 0 : i32
    %15 = arith.cmpi ne, %14, %c0_i32_12 : i32
    scf.if %15 {
      %c0_13 = arith.constant 0 : index
      %c0_14 = arith.constant 0 : index
      %16 = vector.load %arg8[%c0_13, %c0_14] : memref<16x128xf32, #tpu.memory_space<vmem>>, vector<16x128xf32>
      %c0_15 = arith.constant 0 : index
      %c0_16 = arith.constant 0 : index
      %17 = vector.load %arg5[%c0_15, %c0_16] : memref<1x128xf32, #tpu.memory_space<vmem>>, vector<1x128xf32>
      %18 = vector.broadcast %17 : vector<1x128xf32> to vector<16x128xf32>
      %19 = arith.addf %16, %18 : vector<16x128xf32>
      %c0_17 = arith.constant 0 : index
      %c0_18 = arith.constant 0 : index
      %c0_19 = arith.constant 0 : index
      %20 = vector.load %arg6[%c0_17, %c0_18, %c0_19] : memref<1x16x128xf32, #tpu.memory_space<vmem>>, vector<1x16x128xf32>
      %21 = vector.shape_cast %20 : vector<1x16x128xf32> to vector<16x128xf32>
      %22 = vector.shape_cast %19 : vector<16x128xf32> to vector<1x16x128xf32>
      tpu.vector_store %arg6[%c0_17, %c0_18, %c0_19], %22 {strides = array<i32>} : memref<1x16x128xf32, #tpu.memory_space<vmem>>, vector<1x16x128xf32>,
      %cst_20 = arith.constant dense<0.000000e+00> : vector<128xf32>
      %23 = vector.multi_reduction <add>, %19, %cst_20 [0] : vector<16x128xf32> to vector<128xf32>
      %24 = vector.shape_cast %23 : vector<128xf32> to vector<1x128xf32>
      %25 = arith.mulf %19, %19 : vector<16x128xf32>
      %cst_21 = arith.constant dense<0.000000e+00> : vector<128xf32>
      %26 = vector.multi_reduction <add>, %25, %cst_21 [0] : vector<16x128xf32> to vector<128xf32>
      %27 = vector.shape_cast %26 : vector<128xf32> to vector<1x128xf32>
      %28 = tpu.concatenate %24, %27 in 0 : vector<1x128xf32>, vector<1x128xf32> -> vector<2x128xf32>
      %c0_22 = arith.constant 0 : index
      %c0_23 = arith.constant 0 : index
      %c0_24 = arith.constant 0 : index
      %c0_25 = arith.constant 0 : index
      %29 = vector.load %arg7[%c0_22, %c0_23, %c0_24, %c0_25] : memref<1x1x2x128xf32, #tpu.memory_space<vmem>>, vector<1x1x2x128xf32>
      %30 = vector.shape_cast %29 : vector<1x1x2x128xf32> to vector<2x128xf32>
      %31 = vector.shape_cast %28 : vector<2x128xf32> to vector<1x1x2x128xf32>
      tpu.vector_store %arg7[%c0_22, %c0_23, %c0_24, %c0_25], %31 {strides = array<i32>} : memref<1x1x2x128xf32, #tpu.memory_space<vmem>>, vector<1x1x2x128xf32>,
    } else {
    }
    return
  }
  func.func @transform_0(%arg0: i32, %arg1: i32, %arg2: i32) -> (i32, i32, i32) {
    %c0_i32 = arith.constant 0 : i32
    return %arg0, %arg1, %arg2 : i32, i32, i32
  }
  func.func @transform_1(%arg0: i32, %arg1: i32, %arg2: i32) -> (i32, i32, i32) {
    %c0_i32 = arith.constant 0 : i32
    %c0_i32_0 = arith.constant 0 : i32
    return %arg0, %arg2, %c0_i32 : i32, i32, i32
  }
  func.func @transform_2(%arg0: i32, %arg1: i32, %arg2: i32) -> (i32, i32) {
    %c0_i32 = arith.constant 0 : i32
    %c0_i32_0 = arith.constant 0 : i32
    %c0_i32_1 = arith.constant 0 : i32
    return %c0_i32, %c0_i32_0 : i32, i32
  }
  func.func @transform_3(%arg0: i32, %arg1: i32, %arg2: i32) -> (i32, i32, i32) {
    %c0_i32 = arith.constant 0 : i32
    %c0_i32_0 = arith.constant 0 : i32
    return %arg0, %arg1, %c0_i32 : i32, i32, i32
  }
  func.func @transform_4(%arg0: i32, %arg1: i32, %arg2: i32) -> (i32, i32, i32, i32) {
    %c0_i32 = arith.constant 0 : i32
    %c0_i32_0 = arith.constant 0 : i32
    %c0_i32_1 = arith.constant 0 : i32
    return %arg0, %arg1, %c0_i32, %c0_i32_0 : i32, i32, i32, i32
  }
}

module attributes {stable_mosaic.version = 11 : i64} {
  func.func @_gemm_kernel(%arg0: i32, %arg1: i32, %arg2: i32, %arg3: memref<1x16x512xbf16, #tpu.memory_space<vmem>>, %arg4: memref<1x512x128xbf16, #tpu.memory_space<vmem>>, %arg5: memref<1x128xf32, #tpu.memory_space<vmem>>, %arg6: memref<1x16x128xf32, #tpu.memory_space<vmem>>, %arg7: memref<16x128xf32, #tpu.memory_space<vmem>>) attributes {dimension_semantics = [#tpu.dimension_semantics<parallel>, #tpu.dimension_semantics<parallel>, #tpu.dimension_semantics<arbitrary>], iteration_bounds = array<i64: 1, 1, 2>, scalar_prefetch = 0 : i64, scratch_operands = 1 : i64, tpu.core_type = #tpu.core_type<tc>, window_params = [{transform_indices = @transform_0, window_bounds = array<i64: 1, 16, 512>}, {transform_indices = @transform_1, window_bounds = array<i64: 1, 512, 128>}, {pipeline_mode = #tpu.pipeline_mode<synchronous>, transform_indices = @transform_2, window_bounds = array<i64: 1, 128>}, {transform_indices = @transform_3, window_bounds = array<i64: 1, 16, 128>}]} {
    %c0_i32 = arith.constant 0 : i32
    %0 = arith.cmpi eq, %arg2, %c0_i32 : i32
    %1 = arith.extui %0 : i1 to i32
    %c0_i32_0 = arith.constant 0 : i32
    %2 = arith.cmpi ne, %1, %c0_i32_0 : i32
    scf.if %2 {
      %cst_13 = arith.constant 0.000000e+00 : f32
      %19 = vector.broadcast %cst_13 : f32 to vector<16x128xf32>
      %c0_14 = arith.constant 0 : index
      %c0_15 = arith.constant 0 : index
      %20 = vector.load %arg7[%c0_14, %c0_15] : memref<16x128xf32, #tpu.memory_space<vmem>>, vector<16x128xf32>
      tpu.vector_store %arg7[%c0_14, %c0_15], %19 {strides = array<i32>} : memref<16x128xf32, #tpu.memory_space<vmem>>, vector<16x128xf32>,
    } else {
    }
    %c0 = arith.constant 0 : index
    %c0_1 = arith.constant 0 : index
    %c0_2 = arith.constant 0 : index
    %3 = vector.load %arg3[%c0, %c0_1, %c0_2] : memref<1x16x512xbf16, #tpu.memory_space<vmem>>, vector<1x16x512xbf16>
    %4 = vector.shape_cast %3 : vector<1x16x512xbf16> to vector<16x512xbf16>
    %cst = arith.constant 0.000000e+00 : bf16
    %5 = vector.broadcast %cst : bf16 to vector<16x512xbf16>
    %6 = arith.cmpf ogt, %4, %5 : vector<16x512xbf16>
    %cst_3 = arith.constant 2.001950e-01 : bf16
    %7 = vector.broadcast %cst_3 : bf16 to vector<16x512xbf16>
    %8 = arith.mulf %7, %4 : vector<16x512xbf16>
    %9 = arith.select %6, %4, %8 : vector<16x512xi1>, vector<16x512xbf16>
    %c0_4 = arith.constant 0 : index
    %c0_5 = arith.constant 0 : index
    %10 = vector.load %arg7[%c0_4, %c0_5] : memref<16x128xf32, #tpu.memory_space<vmem>>, vector<16x128xf32>
    %c0_6 = arith.constant 0 : index
    %c0_7 = arith.constant 0 : index
    %c0_8 = arith.constant 0 : index
    %11 = vector.load %arg4[%c0_6, %c0_7, %c0_8] : memref<1x512x128xbf16, #tpu.memory_space<vmem>>, vector<1x512x128xbf16>
    %12 = vector.shape_cast %11 : vector<1x512x128xbf16> to vector<512x128xbf16>
    %cst_9 = arith.constant dense<0.000000e+00> : vector<16x128xf32>
    %13 = tpu.matmul %9, %12, %cst_9 {dimension_numbers = #tpu.dot_dimension_numbers<[1], [0], [0], [1], [0, 0, 1, 1], [], []>} : vector<16x512xbf16>, vector<512x128xbf16>, vector<16x128xf32> -> vector<16x128xf32>
    %14 = arith.addf %10, %13 : vector<16x128xf32>
    %c0_10 = arith.constant 0 : index
    %c0_11 = arith.constant 0 : index
    %15 = vector.load %arg7[%c0_10, %c0_11] : memref<16x128xf32, #tpu.memory_space<vmem>>, vector<16x128xf32>
    tpu.vector_store %arg7[%c0_10, %c0_11], %14 {strides = array<i32>} : memref<16x128xf32, #tpu.memory_space<vmem>>, vector<16x128xf32>,
    %c1_i32 = arith.constant 1 : i32
    %16 = arith.cmpi eq, %arg2, %c1_i32 : i32
    %17 = arith.extui %16 : i1 to i32
    %c0_i32_12 = arith.constant 0 : i32
    %18 = arith.cmpi ne, %17, %c0_i32_12 : i32
    scf.if %18 {
      %c0_13 = arith.constant 0 : index
      %c0_14 = arith.constant 0 : index
      %19 = vector.load %arg7[%c0_13, %c0_14] : memref<16x128xf32, #tpu.memory_space<vmem>>, vector<16x128xf32>
      %c0_15 = arith.constant 0 : index
      %c0_16 = arith.constant 0 : index
      %20 = vector.load %arg5[%c0_15, %c0_16] : memref<1x128xf32, #tpu.memory_space<vmem>>, vector<1x128xf32>
      %21 = vector.broadcast %20 : vector<1x128xf32> to vector<16x128xf32>
      %22 = arith.addf %19, %21 : vector<16x128xf32>
      %c0_17 = arith.constant 0 : index
      %c0_18 = arith.constant 0 : index
      %c0_19 = arith.constant 0 : index
      %23 = vector.load %arg6[%c0_17, %c0_18, %c0_19] : memref<1x16x128xf32, #tpu.memory_space<vmem>>, vector<1x16x128xf32>
      %24 = vector.shape_cast %23 : vector<1x16x128xf32> to vector<16x128xf32>
      %25 = vector.shape_cast %22 : vector<16x128xf32> to vector<1x16x128xf32>
      tpu.vector_store %arg6[%c0_17, %c0_18, %c0_19], %25 {strides = array<i32>} : memref<1x16x128xf32, #tpu.memory_space<vmem>>, vector<1x16x128xf32>,
    } else {
    }
    return
  }
  func.func @transform_0(%arg0: i32, %arg1: i32, %arg2: i32) -> (i32, i32, i32) {
    %c0_i32 = arith.constant 0 : i32
    return %arg0, %arg1, %arg2 : i32, i32, i32
  }
  func.func @transform_1(%arg0: i32, %arg1: i32, %arg2: i32) -> (i32, i32, i32) {
    %c0_i32 = arith.constant 0 : i32
    %c0_i32_0 = arith.constant 0 : i32
    return %arg0, %arg2, %c0_i32 : i32, i32, i32
  }
  func.func @transform_2(%arg0: i32, %arg1: i32, %arg2: i32) -> (i32, i32) {
    %c0_i32 = arith.constant 0 : i32
    %c0_i32_0 = arith.constant 0 : i32
    %c0_i32_1 = arith.constant 0 : i32
    return %c0_i32, %c0_i32_0 : i32, i32
  }
  func.func @transform_3(%arg0: i32, %arg1: i32, %arg2: i32) -> (i32, i32, i32) {
    %c0_i32 = arith.constant 0 : i32
    %c0_i32_0 = arith.constant 0 : i32
    return %arg0, %arg1, %c0_i32 : i32, i32, i32
  }
}

module attributes {stable_mosaic.version = 11 : i64} {
  func.func @_gemm_kernel(%arg0: i32, %arg1: i32, %arg2: i32, %arg3: memref<1x16x512xbf16, #tpu.memory_space<vmem>>, %arg4: memref<1x512x128xbf16, #tpu.memory_space<vmem>>, %arg5: memref<1x128xf32, #tpu.memory_space<vmem>>, %arg6: memref<1x16x128xf32, #tpu.memory_space<vmem>>, %arg7: memref<1x1x2x128xf32, #tpu.memory_space<vmem>>, %arg8: memref<16x128xf32, #tpu.memory_space<vmem>>) attributes {dimension_semantics = [#tpu.dimension_semantics<parallel>, #tpu.dimension_semantics<parallel>, #tpu.dimension_semantics<arbitrary>], iteration_bounds = array<i64: 4, 1, 1>, scalar_prefetch = 0 : i64, scratch_operands = 1 : i64, tpu.core_type = #tpu.core_type<tc>, window_params = [{transform_indices = @transform_0, window_bounds = array<i64: 1, 16, 512>}, {transform_indices = @transform_1, window_bounds = array<i64: 1, 512, 128>}, {pipeline_mode = #tpu.pipeline_mode<synchronous>, transform_indices = @transform_2, window_bounds = array<i64: 1, 128>}, {transform_indices = @transform_3, window_bounds = array<i64: 1, 16, 128>}, {transform_indices = @transform_4, window_bounds = array<i64: 1, 1, 2, 128>}]} {
    %c0_i32 = arith.constant 0 : i32
    %0 = arith.cmpi eq, %arg2, %c0_i32 : i32
    %1 = arith.extui %0 : i1 to i32
    %c0_i32_0 = arith.constant 0 : i32
    %2 = arith.cmpi ne, %1, %c0_i32_0 : i32
    scf.if %2 {
      %cst_13 = arith.constant 0.000000e+00 : f32
      %16 = vector.broadcast %cst_13 : f32 to vector<16x128xf32>
      %c0_14 = arith.constant 0 : index
      %c0_15 = arith.constant 0 : index
      %17 = vector.load %arg8[%c0_14, %c0_15] : memref<16x128xf32, #tpu.memory_space<vmem>>, vector<16x128xf32>
      tpu.vector_store %arg8[%c0_14, %c0_15], %16 {strides = array<i32>} : memref<16x128xf32, #tpu.memory_space<vmem>>, vector<16x128xf32>,
    } else {
    }
    %c0 = arith.constant 0 : index
    %c0_1 = arith.constant 0 : index
    %c0_2 = arith.constant 0 : index
    %3 = vector.load %arg3[%c0, %c0_1, %c0_2] : memref<1x16x512xbf16, #tpu.memory_space<vmem>>, vector<1x16x512xbf16>
    %4 = vector.shape_cast %3 : vector<1x16x512xbf16> to vector<16x512xbf16>
    %cst = arith.constant 0.000000e+00 : bf16
    %5 = vector.broadcast %cst : bf16 to vector<16x512xbf16>
    %6 = arith.maximumf %4, %5 : vector<16x512xbf16>
    %c0_3 = arith.constant 0 : index
    %c0_4 = arith.constant 0 : index
    %7 = vector.load %arg8[%c0_3, %c0_4] : memref<16x128xf32, #tpu.memory_space<vmem>>, vector<16x128xf32>
    %c0_5 = arith.constant 0 : index
    %c0_6 = arith.constant 0 : index
    %c0_7 = arith.constant 0 : index
    %8 = vector.load %arg4[%c0_5, %c0_6, %c0_7] : memref<1x512x128xbf16, #tpu.memory_space<vmem>>, vector<1x512x128xbf16>
    %9 = vector.shape_cast %8 : vector<1x512x128xbf16> to vector<512x128xbf16>
    %cst_8 = arith.constant dense<0.000000e+00> : vector<16x128xf32>
    %10 = tpu.matmul %6, %9, %cst_8 {dimension_numbers = #tpu.dot_dimension_numbers<[1], [0], [0], [1], [0, 0, 1, 1], [], []>} : vector<16x512xbf16>, vector<512x128xbf16>, vector<16x128xf32> -> vector<16x128xf32>
    %11 = arith.addf %7, %10 : vector<16x128xf32>
    %c0_9 = arith.constant 0 : index
    %c0_10 = arith.constant 0 : index
    %12 = vector.load %arg8[%c0_9, %c0_10] : memref<16x128xf32, #tpu.memory_space<vmem>>, vector<16x128xf32>
    tpu.vector_store %arg8[%c0_9, %c0_10], %11 {strides = array<i32>} : memref<16x128xf32, #tpu.memory_space<vmem>>, vector<16x128xf32>,
    %c0_i32_11 = arith.constant 0 : i32
    %13 = arith.cmpi eq, %arg2, %c0_i32_11 : i32
    %14 = arith.extui %13 : i1 to i32
    %c0_i32_12 = arith.constant 0 : i32
    %15 = arith.cmpi ne, %14, %c0_i32_12 : i32
    scf.if %15 {
      %c0_13 = arith.constant 0 : index
      %c0_14 = arith.constant 0 : index
      %16 = vector.load %arg8[%c0_13, %c0_14] : memref<16x128xf32, #tpu.memory_space<vmem>>, vector<16x128xf32>
      %c0_15 = arith.constant 0 : index
      %c0_16 = arith.constant 0 : index
      %17 = vector.load %arg5[%c0_15, %c0_16] : memref<1x128xf32, #tpu.memory_space<vmem>>, vector<1x128xf32>
      %18 = vector.broadcast %17 : vector<1x128xf32> to vector<16x128xf32>
      %19 = arith.addf %16, %18 : vector<16x128xf32>
      %c0_17 = arith.constant 0 : index
      %c0_18 = arith.constant 0 : index
      %c0_19 = arith.constant 0 : index
      %20 = vector.load %arg6[%c0_17, %c0_18, %c0_19] : memref<1x16x128xf32, #tpu.memory_space<vmem>>, vector<1x16x128xf32>
      %21 = vector.shape_cast %20 : vector<1x16x128xf32> to vector<16x128xf32>
      %22 = vector.shape_cast %19 : vector<16x128xf32> to vector<1x16x128xf32>
      tpu.vector_store %arg6[%c0_17, %c0_18, %c0_19], %22 {strides = array<i32>} : memref<1x16x128xf32, #tpu.memory_space<vmem>>, vector<1x16x128xf32>,
      %cst_20 = arith.constant dense<0.000000e+00> : vector<128xf32>
      %23 = vector.multi_reduction <add>, %19, %cst_20 [0] : vector<16x128xf32> to vector<128xf32>
      %24 = vector.shape_cast %23 : vector<128xf32> to vector<1x128xf32>
      %25 = arith.mulf %19, %19 : vector<16x128xf32>
      %cst_21 = arith.constant dense<0.000000e+00> : vector<128xf32>
      %26 = vector.multi_reduction <add>, %25, %cst_21 [0] : vector<16x128xf32> to vector<128xf32>
      %27 = vector.shape_cast %26 : vector<128xf32> to vector<1x128xf32>
      %28 = tpu.concatenate %24, %27 in 0 : vector<1x128xf32>, vector<1x128xf32> -> vector<2x128xf32>
      %c0_22 = arith.constant 0 : index
      %c0_23 = arith.constant 0 : index
      %c0_24 = arith.constant 0 : index
      %c0_25 = arith.constant 0 : index
      %29 = vector.load %arg7[%c0_22, %c0_23, %c0_24, %c0_25] : memref<1x1x2x128xf32, #tpu.memory_space<vmem>>, vector<1x1x2x128xf32>
      %30 = vector.shape_cast %29 : vector<1x1x2x128xf32> to vector<2x128xf32>
      %31 = vector.shape_cast %28 : vector<2x128xf32> to vector<1x1x2x128xf32>
      tpu.vector_store %arg7[%c0_22, %c0_23, %c0_24, %c0_25], %31 {strides = array<i32>} : memref<1x1x2x128xf32, #tpu.memory_space<vmem>>, vector<1x1x2x128xf32>,
    } else {
    }
    return
  }
  func.func @transform_0(%arg0: i32, %arg1: i32, %arg2: i32) -> (i32, i32, i32) {
    %c0_i32 = arith.constant 0 : i32
    return %arg0, %arg1, %arg2 : i32, i32, i32
  }
  func.func @transform_1(%arg0: i32, %arg1: i32, %arg2: i32) -> (i32, i32, i32) {
    %c0_i32 = arith.constant 0 : i32
    %c0_i32_0 = arith.constant 0 : i32
    return %arg0, %arg2, %c0_i32 : i32, i32, i32
  }
  func.func @transform_2(%arg0: i32, %arg1: i32, %arg2: i32) -> (i32, i32) {
    %c0_i32 = arith.constant 0 : i32
    %c0_i32_0 = arith.constant 0 : i32
    %c0_i32_1 = arith.constant 0 : i32
    return %c0_i32, %c0_i32_0 : i32, i32
  }
  func.func @transform_3(%arg0: i32, %arg1: i32, %arg2: i32) -> (i32, i32, i32) {
    %c0_i32 = arith.constant 0 : i32
    %c0_i32_0 = arith.constant 0 : i32
    return %arg0, %arg1, %c0_i32 : i32, i32, i32
  }
  func.func @transform_4(%arg0: i32, %arg1: i32, %arg2: i32) -> (i32, i32, i32, i32) {
    %c0_i32 = arith.constant 0 : i32
    %c0_i32_0 = arith.constant 0 : i32
    %c0_i32_1 = arith.constant 0 : i32
    return %arg0, %arg1, %c0_i32, %c0_i32_0 : i32, i32, i32, i32
  }
}

module attributes {stable_mosaic.version = 11 : i64} {
  func.func @_gemm_kernel(%arg0: i32, %arg1: i32, %arg2: i32, %arg3: memref<1x32x256xbf16, #tpu.memory_space<vmem>>, %arg4: memref<1x256x128xbf16, #tpu.memory_space<vmem>>, %arg5: memref<1x128xf32, #tpu.memory_space<vmem>>, %arg6: memref<1x32x128xf32, #tpu.memory_space<vmem>>, %arg7: memref<1x1x2x128xf32, #tpu.memory_space<vmem>>, %arg8: memref<32x128xf32, #tpu.memory_space<vmem>>) attributes {dimension_semantics = [#tpu.dimension_semantics<parallel>, #tpu.dimension_semantics<parallel>, #tpu.dimension_semantics<arbitrary>], iteration_bounds = array<i64: 4, 1, 1>, scalar_prefetch = 0 : i64, scratch_operands = 1 : i64, tpu.core_type = #tpu.core_type<tc>, window_params = [{transform_indices = @transform_0, window_bounds = array<i64: 1, 32, 256>}, {transform_indices = @transform_1, window_bounds = array<i64: 1, 256, 128>}, {pipeline_mode = #tpu.pipeline_mode<synchronous>, transform_indices = @transform_2, window_bounds = array<i64: 1, 128>}, {transform_indices = @transform_3, window_bounds = array<i64: 1, 32, 128>}, {transform_indices = @transform_4, window_bounds = array<i64: 1, 1, 2, 128>}]} {
    %c0_i32 = arith.constant 0 : i32
    %0 = arith.cmpi eq, %arg2, %c0_i32 : i32
    %1 = arith.extui %0 : i1 to i32
    %c0_i32_0 = arith.constant 0 : i32
    %2 = arith.cmpi ne, %1, %c0_i32_0 : i32
    scf.if %2 {
      %cst_13 = arith.constant 0.000000e+00 : f32
      %16 = vector.broadcast %cst_13 : f32 to vector<32x128xf32>
      %c0_14 = arith.constant 0 : index
      %c0_15 = arith.constant 0 : index
      %17 = vector.load %arg8[%c0_14, %c0_15] : memref<32x128xf32, #tpu.memory_space<vmem>>, vector<32x128xf32>
      tpu.vector_store %arg8[%c0_14, %c0_15], %16 {strides = array<i32>} : memref<32x128xf32, #tpu.memory_space<vmem>>, vector<32x128xf32>,
    } else {
    }
    %c0 = arith.constant 0 : index
    %c0_1 = arith.constant 0 : index
    %c0_2 = arith.constant 0 : index
    %3 = vector.load %arg3[%c0, %c0_1, %c0_2] : memref<1x32x256xbf16, #tpu.memory_space<vmem>>, vector<1x32x256xbf16>
    %4 = vector.shape_cast %3 : vector<1x32x256xbf16> to vector<32x256xbf16>
    %cst = arith.constant 0.000000e+00 : bf16
    %5 = vector.broadcast %cst : bf16 to vector<32x256xbf16>
    %6 = arith.maximumf %4, %5 : vector<32x256xbf16>
    %c0_3 = arith.constant 0 : index
    %c0_4 = arith.constant 0 : index
    %7 = vector.load %arg8[%c0_3, %c0_4] : memref<32x128xf32, #tpu.memory_space<vmem>>, vector<32x128xf32>
    %c0_5 = arith.constant 0 : index
    %c0_6 = arith.constant 0 : index
    %c0_7 = arith.constant 0 : index
    %8 = vector.load %arg4[%c0_5, %c0_6, %c0_7] : memref<1x256x128xbf16, #tpu.memory_space<vmem>>, vector<1x256x128xbf16>
    %9 = vector.shape_cast %8 : vector<1x256x128xbf16> to vector<256x128xbf16>
    %cst_8 = arith.constant dense<0.000000e+00> : vector<32x128xf32>
    %10 = tpu.matmul %6, %9, %cst_8 {dimension_numbers = #tpu.dot_dimension_numbers<[1], [0], [0], [1], [0, 0, 1, 1], [], []>} : vector<32x256xbf16>, vector<256x128xbf16>, vector<32x128xf32> -> vector<32x128xf32>
    %11 = arith.addf %7, %10 : vector<32x128xf32>
    %c0_9 = arith.constant 0 : index
    %c0_10 = arith.constant 0 : index
    %12 = vector.load %arg8[%c0_9, %c0_10] : memref<32x128xf32, #tpu.memory_space<vmem>>, vector<32x128xf32>
    tpu.vector_store %arg8[%c0_9, %c0_10], %11 {strides = array<i32>} : memref<32x128xf32, #tpu.memory_space<vmem>>, vector<32x128xf32>,
    %c0_i32_11 = arith.constant 0 : i32
    %13 = arith.cmpi eq, %arg2, %c0_i32_11 : i32
    %14 = arith.extui %13 : i1 to i32
    %c0_i32_12 = arith.constant 0 : i32
    %15 = arith.cmpi ne, %14, %c0_i32_12 : i32
    scf.if %15 {
      %c0_13 = arith.constant 0 : index
      %c0_14 = arith.constant 0 : index
      %16 = vector.load %arg8[%c0_13, %c0_14] : memref<32x128xf32, #tpu.memory_space<vmem>>, vector<32x128xf32>
      %c0_15 = arith.constant 0 : index
      %c0_16 = arith.constant 0 : index
      %17 = vector.load %arg5[%c0_15, %c0_16] : memref<1x128xf32, #tpu.memory_space<vmem>>, vector<1x128xf32>
      %18 = vector.broadcast %17 : vector<1x128xf32> to vector<32x128xf32>
      %19 = arith.addf %16, %18 : vector<32x128xf32>
      %c0_17 = arith.constant 0 : index
      %c0_18 = arith.constant 0 : index
      %c0_19 = arith.constant 0 : index
      %20 = vector.load %arg6[%c0_17, %c0_18, %c0_19] : memref<1x32x128xf32, #tpu.memory_space<vmem>>, vector<1x32x128xf32>
      %21 = vector.shape_cast %20 : vector<1x32x128xf32> to vector<32x128xf32>
      %22 = vector.shape_cast %19 : vector<32x128xf32> to vector<1x32x128xf32>
      tpu.vector_store %arg6[%c0_17, %c0_18, %c0_19], %22 {strides = array<i32>} : memref<1x32x128xf32, #tpu.memory_space<vmem>>, vector<1x32x128xf32>,
      %cst_20 = arith.constant dense<0.000000e+00> : vector<128xf32>
      %23 = vector.multi_reduction <add>, %19, %cst_20 [0] : vector<32x128xf32> to vector<128xf32>
      %24 = vector.shape_cast %23 : vector<128xf32> to vector<1x128xf32>
      %25 = arith.mulf %19, %19 : vector<32x128xf32>
      %cst_21 = arith.constant dense<0.000000e+00> : vector<128xf32>
      %26 = vector.multi_reduction <add>, %25, %cst_21 [0] : vector<32x128xf32> to vector<128xf32>
      %27 = vector.shape_cast %26 : vector<128xf32> to vector<1x128xf32>
      %28 = tpu.concatenate %24, %27 in 0 : vector<1x128xf32>, vector<1x128xf32> -> vector<2x128xf32>
      %c0_22 = arith.constant 0 : index
      %c0_23 = arith.constant 0 : index
      %c0_24 = arith.constant 0 : index
      %c0_25 = arith.constant 0 : index
      %29 = vector.load %arg7[%c0_22, %c0_23, %c0_24, %c0_25] : memref<1x1x2x128xf32, #tpu.memory_space<vmem>>, vector<1x1x2x128xf32>
      %30 = vector.shape_cast %29 : vector<1x1x2x128xf32> to vector<2x128xf32>
      %31 = vector.shape_cast %28 : vector<2x128xf32> to vector<1x1x2x128xf32>
      tpu.vector_store %arg7[%c0_22, %c0_23, %c0_24, %c0_25], %31 {strides = array<i32>} : memref<1x1x2x128xf32, #tpu.memory_space<vmem>>, vector<1x1x2x128xf32>,
    } else {
    }
    return
  }
  func.func @transform_0(%arg0: i32, %arg1: i32, %arg2: i32) -> (i32, i32, i32) {
    %c0_i32 = arith.constant 0 : i32
    return %arg0, %arg1, %arg2 : i32, i32, i32
  }
  func.func @transform_1(%arg0: i32, %arg1: i32, %arg2: i32) -> (i32, i32, i32) {
    %c0_i32 = arith.constant 0 : i32
    %c0_i32_0 = arith.constant 0 : i32
    return %arg0, %arg2, %c0_i32 : i32, i32, i32
  }
  func.func @transform_2(%arg0: i32, %arg1: i32, %arg2: i32) -> (i32, i32) {
    %c0_i32 = arith.constant 0 : i32
    %c0_i32_0 = arith.constant 0 : i32
    %c0_i32_1 = arith.constant 0 : i32
    return %c0_i32, %c0_i32_0 : i32, i32
  }
  func.func @transform_3(%arg0: i32, %arg1: i32, %arg2: i32) -> (i32, i32, i32) {
    %c0_i32 = arith.constant 0 : i32
    %c0_i32_0 = arith.constant 0 : i32
    return %arg0, %arg1, %c0_i32 : i32, i32, i32
  }
  func.func @transform_4(%arg0: i32, %arg1: i32, %arg2: i32) -> (i32, i32, i32, i32) {
    %c0_i32 = arith.constant 0 : i32
    %c0_i32_0 = arith.constant 0 : i32
    %c0_i32_1 = arith.constant 0 : i32
    return %arg0, %arg1, %c0_i32, %c0_i32_0 : i32, i32, i32, i32
  }
}

module attributes {stable_mosaic.version = 11 : i64} {
  func.func @_gemm_kernel(%arg0: i32, %arg1: i32, %arg2: i32, %arg3: memref<1x128x128xbf16, #tpu.memory_space<vmem>>, %arg4: memref<1x128x128xbf16, #tpu.memory_space<vmem>>, %arg5: memref<1x128xf32, #tpu.memory_space<vmem>>, %arg6: memref<1x128x128xf32, #tpu.memory_space<vmem>>, %arg7: memref<1x1x2x128xf32, #tpu.memory_space<vmem>>, %arg8: memref<128x128xf32, #tpu.memory_space<vmem>>) attributes {dimension_semantics = [#tpu.dimension_semantics<parallel>, #tpu.dimension_semantics<parallel>, #tpu.dimension_semantics<arbitrary>], iteration_bounds = array<i64: 4, 1, 1>, scalar_prefetch = 0 : i64, scratch_operands = 1 : i64, tpu.core_type = #tpu.core_type<tc>, window_params = [{transform_indices = @transform_0, window_bounds = array<i64: 1, 128, 128>}, {transform_indices = @transform_1, window_bounds = array<i64: 1, 128, 128>}, {pipeline_mode = #tpu.pipeline_mode<synchronous>, transform_indices = @transform_2, window_bounds = array<i64: 1, 128>}, {transform_indices = @transform_3, window_bounds = array<i64: 1, 128, 128>}, {transform_indices = @transform_4, window_bounds = array<i64: 1, 1, 2, 128>}]} {
    %c0_i32 = arith.constant 0 : i32
    %0 = arith.cmpi eq, %arg2, %c0_i32 : i32
    %1 = arith.extui %0 : i1 to i32
    %c0_i32_0 = arith.constant 0 : i32
    %2 = arith.cmpi ne, %1, %c0_i32_0 : i32
    scf.if %2 {
      %cst_13 = arith.constant 0.000000e+00 : f32
      %16 = vector.broadcast %cst_13 : f32 to vector<128x128xf32>
      %c0_14 = arith.constant 0 : index
      %c0_15 = arith.constant 0 : index
      %17 = vector.load %arg8[%c0_14, %c0_15] : memref<128x128xf32, #tpu.memory_space<vmem>>, vector<128x128xf32>
      tpu.vector_store %arg8[%c0_14, %c0_15], %16 {strides = array<i32>} : memref<128x128xf32, #tpu.memory_space<vmem>>, vector<128x128xf32>,
    } else {
    }
    %c0 = arith.constant 0 : index
    %c0_1 = arith.constant 0 : index
    %c0_2 = arith.constant 0 : index
    %3 = vector.load %arg3[%c0, %c0_1, %c0_2] : memref<1x128x128xbf16, #tpu.memory_space<vmem>>, vector<1x128x128xbf16>
    %4 = vector.shape_cast %3 : vector<1x128x128xbf16> to vector<128x128xbf16>
    %cst = arith.constant 0.000000e+00 : bf16
    %5 = vector.broadcast %cst : bf16 to vector<128x128xbf16>
    %6 = arith.maximumf %4, %5 : vector<128x128xbf16>
    %c0_3 = arith.constant 0 : index
    %c0_4 = arith.constant 0 : index
    %7 = vector.load %arg8[%c0_3, %c0_4] : memref<128x128xf32, #tpu.memory_space<vmem>>, vector<128x128xf32>
    %c0_5 = arith.constant 0 : index
    %c0_6 = arith.constant 0 : index
    %c0_7 = arith.constant 0 : index
    %8 = vector.load %arg4[%c0_5, %c0_6, %c0_7] : memref<1x128x128xbf16, #tpu.memory_space<vmem>>, vector<1x128x128xbf16>
    %9 = vector.shape_cast %8 : vector<1x128x128xbf16> to vector<128x128xbf16>
    %cst_8 = arith.constant dense<0.000000e+00> : vector<128x128xf32>
    %10 = tpu.matmul %6, %9, %cst_8 {dimension_numbers = #tpu.dot_dimension_numbers<[1], [0], [0], [1], [0, 0, 1, 1], [], []>} : vector<128x128xbf16>, vector<128x128xbf16>, vector<128x128xf32> -> vector<128x128xf32>
    %11 = arith.addf %7, %10 : vector<128x128xf32>
    %c0_9 = arith.constant 0 : index
    %c0_10 = arith.constant 0 : index
    %12 = vector.load %arg8[%c0_9, %c0_10] : memref<128x128xf32, #tpu.memory_space<vmem>>, vector<128x128xf32>
    tpu.vector_store %arg8[%c0_9, %c0_10], %11 {strides = array<i32>} : memref<128x128xf32, #tpu.memory_space<vmem>>, vector<128x128xf32>,
    %c0_i32_11 = arith.constant 0 : i32
    %13 = arith.cmpi eq, %arg2, %c0_i32_11 : i32
    %14 = arith.extui %13 : i1 to i32
    %c0_i32_12 = arith.constant 0 : i32
    %15 = arith.cmpi ne, %14, %c0_i32_12 : i32
    scf.if %15 {
      %c0_13 = arith.constant 0 : index
      %c0_14 = arith.constant 0 : index
      %16 = vector.load %arg8[%c0_13, %c0_14] : memref<128x128xf32, #tpu.memory_space<vmem>>, vector<128x128xf32>
      %c0_15 = arith.constant 0 : index
      %c0_16 = arith.constant 0 : index
      %17 = vector.load %arg5[%c0_15, %c0_16] : memref<1x128xf32, #tpu.memory_space<vmem>>, vector<1x128xf32>
      %18 = vector.broadcast %17 : vector<1x128xf32> to vector<128x128xf32>
      %19 = arith.addf %16, %18 : vector<128x128xf32>
      %c0_17 = arith.constant 0 : index
      %c0_18 = arith.constant 0 : index
      %c0_19 = arith.constant 0 : index
      %20 = vector.load %arg6[%c0_17, %c0_18, %c0_19] : memref<1x128x128xf32, #tpu.memory_space<vmem>>, vector<1x128x128xf32>
      %21 = vector.shape_cast %20 : vector<1x128x128xf32> to vector<128x128xf32>
      %22 = vector.shape_cast %19 : vector<128x128xf32> to vector<1x128x128xf32>
      tpu.vector_store %arg6[%c0_17, %c0_18, %c0_19], %22 {strides = array<i32>} : memref<1x128x128xf32, #tpu.memory_space<vmem>>, vector<1x128x128xf32>,
      %cst_20 = arith.constant dense<0.000000e+00> : vector<128xf32>
      %23 = vector.multi_reduction <add>, %19, %cst_20 [0] : vector<128x128xf32> to vector<128xf32>
      %24 = vector.shape_cast %23 : vector<128xf32> to vector<1x128xf32>
      %25 = arith.mulf %19, %19 : vector<128x128xf32>
      %cst_21 = arith.constant dense<0.000000e+00> : vector<128xf32>
      %26 = vector.multi_reduction <add>, %25, %cst_21 [0] : vector<128x128xf32> to vector<128xf32>
      %27 = vector.shape_cast %26 : vector<128xf32> to vector<1x128xf32>
      %28 = tpu.concatenate %24, %27 in 0 : vector<1x128xf32>, vector<1x128xf32> -> vector<2x128xf32>
      %c0_22 = arith.constant 0 : index
      %c0_23 = arith.constant 0 : index
      %c0_24 = arith.constant 0 : index
      %c0_25 = arith.constant 0 : index
      %29 = vector.load %arg7[%c0_22, %c0_23, %c0_24, %c0_25] : memref<1x1x2x128xf32, #tpu.memory_space<vmem>>, vector<1x1x2x128xf32>
      %30 = vector.shape_cast %29 : vector<1x1x2x128xf32> to vector<2x128xf32>
      %31 = vector.shape_cast %28 : vector<2x128xf32> to vector<1x1x2x128xf32>
      tpu.vector_store %arg7[%c0_22, %c0_23, %c0_24, %c0_25], %31 {strides = array<i32>} : memref<1x1x2x128xf32, #tpu.memory_space<vmem>>, vector<1x1x2x128xf32>,
    } else {
    }
    return
  }
  func.func @transform_0(%arg0: i32, %arg1: i32, %arg2: i32) -> (i32, i32, i32) {
    %c0_i32 = arith.constant 0 : i32
    return %arg0, %arg1, %arg2 : i32, i32, i32
  }
  func.func @transform_1(%arg0: i32, %arg1: i32, %arg2: i32) -> (i32, i32, i32) {
    %c0_i32 = arith.constant 0 : i32
    %c0_i32_0 = arith.constant 0 : i32
    return %arg0, %arg2, %c0_i32 : i32, i32, i32
  }
  func.func @transform_2(%arg0: i32, %arg1: i32, %arg2: i32) -> (i32, i32) {
    %c0_i32 = arith.constant 0 : i32
    %c0_i32_0 = arith.constant 0 : i32
    %c0_i32_1 = arith.constant 0 : i32
    return %c0_i32, %c0_i32_0 : i32, i32
  }
  func.func @transform_3(%arg0: i32, %arg1: i32, %arg2: i32) -> (i32, i32, i32) {
    %c0_i32 = arith.constant 0 : i32
    %c0_i32_0 = arith.constant 0 : i32
    return %arg0, %arg1, %c0_i32 : i32, i32, i32
  }
  func.func @transform_4(%arg0: i32, %arg1: i32, %arg2: i32) -> (i32, i32, i32, i32) {
    %c0_i32 = arith.constant 0 : i32
    %c0_i32_0 = arith.constant 0 : i32
    %c0_i32_1 = arith.constant 0 : i32
    return %arg0, %arg1, %c0_i32, %c0_i32_0 : i32, i32, i32, i32
  }
}

module attributes {stable_mosaic.version = 11 : i64} {
  func.func @_bn_apply_kernel(%arg0: i32, %arg1: memref<512x8xf32, #tpu.memory_space<vmem>>, %arg2: memref<1x8xf32, #tpu.memory_space<vmem>>, %arg3: memref<1x8xf32, #tpu.memory_space<vmem>>, %arg4: memref<512x8xf32, #tpu.memory_space<vmem>>) attributes {dimension_semantics = [#tpu.dimension_semantics<parallel>], iteration_bounds = array<i64: 1>, scalar_prefetch = 0 : i64, scratch_operands = 0 : i64, tpu.core_type = #tpu.core_type<tc>, window_params = [{transform_indices = @transform_0, window_bounds = array<i64: 512, 8>}, {pipeline_mode = #tpu.pipeline_mode<synchronous>, transform_indices = @transform_1, window_bounds = array<i64: 1, 8>}, {pipeline_mode = #tpu.pipeline_mode<synchronous>, transform_indices = @transform_2, window_bounds = array<i64: 1, 8>}, {transform_indices = @transform_3, window_bounds = array<i64: 512, 8>}]} {
    %c0 = arith.constant 0 : index
    %c0_0 = arith.constant 0 : index
    %0 = vector.load %arg1[%c0, %c0_0] : memref<512x8xf32, #tpu.memory_space<vmem>>, vector<512x8xf32>
    %c0_1 = arith.constant 0 : index
    %c0_2 = arith.constant 0 : index
    %1 = vector.load %arg2[%c0_1, %c0_2] : memref<1x8xf32, #tpu.memory_space<vmem>>, vector<1x8xf32>
    %2 = vector.broadcast %1 : vector<1x8xf32> to vector<512x8xf32>
    %3 = arith.subf %0, %2 : vector<512x8xf32>
    %c0_3 = arith.constant 0 : index
    %c0_4 = arith.constant 0 : index
    %4 = vector.load %arg3[%c0_3, %c0_4] : memref<1x8xf32, #tpu.memory_space<vmem>>, vector<1x8xf32>
    %5 = vector.broadcast %4 : vector<1x8xf32> to vector<512x8xf32>
    %6 = arith.mulf %3, %5 : vector<512x8xf32>
    %c0_5 = arith.constant 0 : index
    %c0_6 = arith.constant 0 : index
    %7 = vector.load %arg4[%c0_5, %c0_6] : memref<512x8xf32, #tpu.memory_space<vmem>>, vector<512x8xf32>
    tpu.vector_store %arg4[%c0_5, %c0_6], %6 {strides = array<i32>} : memref<512x8xf32, #tpu.memory_space<vmem>>, vector<512x8xf32>,
    return
  }
  func.func @transform_0(%arg0: i32) -> (i32, i32) {
    %c0_i32 = arith.constant 0 : i32
    %c0_i32_0 = arith.constant 0 : i32
    return %arg0, %c0_i32 : i32, i32
  }
  func.func @transform_1(%arg0: i32) -> (i32, i32) {
    %c0_i32 = arith.constant 0 : i32
    %c0_i32_0 = arith.constant 0 : i32
    %c0_i32_1 = arith.constant 0 : i32
    return %c0_i32, %c0_i32_0 : i32, i32
  }
  func.func @transform_2(%arg0: i32) -> (i32, i32) {
    %c0_i32 = arith.constant 0 : i32
    %c0_i32_0 = arith.constant 0 : i32
    %c0_i32_1 = arith.constant 0 : i32
    return %c0_i32, %c0_i32_0 : i32, i32
  }
  func.func @transform_3(%arg0: i32) -> (i32, i32) {
    %c0_i32 = arith.constant 0 : i32
    %c0_i32_0 = arith.constant 0 : i32
    return %arg0, %c0_i32 : i32, i32
  }
}

module attributes {stable_mosaic.version = 11 : i64} {
  func.func @_gemm_kernel(%arg0: i32, %arg1: i32, %arg2: i32, %arg3: memref<1x256x128xbf16, #tpu.memory_space<vmem>>, %arg4: memref<1x128x128xbf16, #tpu.memory_space<vmem>>, %arg5: memref<1x128xf32, #tpu.memory_space<vmem>>, %arg6: memref<1x256x128xf32, #tpu.memory_space<vmem>>, %arg7: memref<256x128xf32, #tpu.memory_space<vmem>>) attributes {dimension_semantics = [#tpu.dimension_semantics<parallel>, #tpu.dimension_semantics<parallel>, #tpu.dimension_semantics<arbitrary>], iteration_bounds = array<i64: 4, 2, 1>, scalar_prefetch = 0 : i64, scratch_operands = 1 : i64, tpu.core_type = #tpu.core_type<tc>, window_params = [{transform_indices = @transform_0, window_bounds = array<i64: 1, 256, 128>}, {transform_indices = @transform_1, window_bounds = array<i64: 1, 128, 128>}, {pipeline_mode = #tpu.pipeline_mode<synchronous>, transform_indices = @transform_2, window_bounds = array<i64: 1, 128>}, {transform_indices = @transform_3, window_bounds = array<i64: 1, 256, 128>}]} {
    %c0_i32 = arith.constant 0 : i32
    %0 = arith.cmpi eq, %arg2, %c0_i32 : i32
    %1 = arith.extui %0 : i1 to i32
    %c0_i32_0 = arith.constant 0 : i32
    %2 = arith.cmpi ne, %1, %c0_i32_0 : i32
    scf.if %2 {
      %cst_13 = arith.constant 0.000000e+00 : f32
      %16 = vector.broadcast %cst_13 : f32 to vector<256x128xf32>
      %c0_14 = arith.constant 0 : index
      %c0_15 = arith.constant 0 : index
      %17 = vector.load %arg7[%c0_14, %c0_15] : memref<256x128xf32, #tpu.memory_space<vmem>>, vector<256x128xf32>
      tpu.vector_store %arg7[%c0_14, %c0_15], %16 {strides = array<i32>} : memref<256x128xf32, #tpu.memory_space<vmem>>, vector<256x128xf32>,
    } else {
    }
    %c0 = arith.constant 0 : index
    %c0_1 = arith.constant 0 : index
    %c0_2 = arith.constant 0 : index
    %3 = vector.load %arg3[%c0, %c0_1, %c0_2] : memref<1x256x128xbf16, #tpu.memory_space<vmem>>, vector<1x256x128xbf16>
    %4 = vector.shape_cast %3 : vector<1x256x128xbf16> to vector<256x128xbf16>
    %cst = arith.constant 0.000000e+00 : bf16
    %5 = vector.broadcast %cst : bf16 to vector<256x128xbf16>
    %6 = arith.maximumf %4, %5 : vector<256x128xbf16>
    %c0_3 = arith.constant 0 : index
    %c0_4 = arith.constant 0 : index
    %7 = vector.load %arg7[%c0_3, %c0_4] : memref<256x128xf32, #tpu.memory_space<vmem>>, vector<256x128xf32>
    %c0_5 = arith.constant 0 : index
    %c0_6 = arith.constant 0 : index
    %c0_7 = arith.constant 0 : index
    %8 = vector.load %arg4[%c0_5, %c0_6, %c0_7] : memref<1x128x128xbf16, #tpu.memory_space<vmem>>, vector<1x128x128xbf16>
    %9 = vector.shape_cast %8 : vector<1x128x128xbf16> to vector<128x128xbf16>
    %cst_8 = arith.constant dense<0.000000e+00> : vector<256x128xf32>
    %10 = tpu.matmul %6, %9, %cst_8 {dimension_numbers = #tpu.dot_dimension_numbers<[1], [0], [0], [1], [0, 0, 1, 1], [], []>} : vector<256x128xbf16>, vector<128x128xbf16>, vector<256x128xf32> -> vector<256x128xf32>
    %11 = arith.addf %7, %10 : vector<256x128xf32>
    %c0_9 = arith.constant 0 : index
    %c0_10 = arith.constant 0 : index
    %12 = vector.load %arg7[%c0_9, %c0_10] : memref<256x128xf32, #tpu.memory_space<vmem>>, vector<256x128xf32>
    tpu.vector_store %arg7[%c0_9, %c0_10], %11 {strides = array<i32>} : memref<256x128xf32, #tpu.memory_space<vmem>>, vector<256x128xf32>,
    %c0_i32_11 = arith.constant 0 : i32
    %13 = arith.cmpi eq, %arg2, %c0_i32_11 : i32
    %14 = arith.extui %13 : i1 to i32
    %c0_i32_12 = arith.constant 0 : i32
    %15 = arith.cmpi ne, %14, %c0_i32_12 : i32
    scf.if %15 {
      %c0_13 = arith.constant 0 : index
      %c0_14 = arith.constant 0 : index
      %16 = vector.load %arg7[%c0_13, %c0_14] : memref<256x128xf32, #tpu.memory_space<vmem>>, vector<256x128xf32>
      %c0_15 = arith.constant 0 : index
      %c0_16 = arith.constant 0 : index
      %17 = vector.load %arg5[%c0_15, %c0_16] : memref<1x128xf32, #tpu.memory_space<vmem>>, vector<1x128xf32>
      %18 = vector.broadcast %17 : vector<1x128xf32> to vector<256x128xf32>
      %19 = arith.addf %16, %18 : vector<256x128xf32>
      %20 = math.tanh %19 : vector<256x128xf32>
      %c0_17 = arith.constant 0 : index
      %c0_18 = arith.constant 0 : index
      %c0_19 = arith.constant 0 : index
      %21 = vector.load %arg6[%c0_17, %c0_18, %c0_19] : memref<1x256x128xf32, #tpu.memory_space<vmem>>, vector<1x256x128xf32>
      %22 = vector.shape_cast %21 : vector<1x256x128xf32> to vector<256x128xf32>
      %23 = vector.shape_cast %20 : vector<256x128xf32> to vector<1x256x128xf32>
      tpu.vector_store %arg6[%c0_17, %c0_18, %c0_19], %23 {strides = array<i32>} : memref<1x256x128xf32, #tpu.memory_space<vmem>>, vector<1x256x128xf32>,
    } else {
    }
    return
  }
  func.func @transform_0(%arg0: i32, %arg1: i32, %arg2: i32) -> (i32, i32, i32) {
    %c0_i32 = arith.constant 0 : i32
    return %arg0, %arg1, %arg2 : i32, i32, i32
  }
  func.func @transform_1(%arg0: i32, %arg1: i32, %arg2: i32) -> (i32, i32, i32) {
    %c0_i32 = arith.constant 0 : i32
    %c0_i32_0 = arith.constant 0 : i32
    return %arg0, %arg2, %c0_i32 : i32, i32, i32
  }
  func.func @transform_2(%arg0: i32, %arg1: i32, %arg2: i32) -> (i32, i32) {
    %c0_i32 = arith.constant 0 : i32
    %c0_i32_0 = arith.constant 0 : i32
    %c0_i32_1 = arith.constant 0 : i32
    return %c0_i32, %c0_i32_0 : i32, i32
  }
  func.func @transform_3(%arg0: i32, %arg1: i32, %arg2: i32) -> (i32, i32, i32) {
    %c0_i32 = arith.constant 0 : i32
    %c0_i32_0 = arith.constant 0 : i32
    return %arg0, %arg1, %c0_i32 : i32, i32, i32
  }
}

</mosaic_0001>

<bundles_post_ra>
// kernel: _lambda_.17
= control target key start
LH: loop header
LB: loop body
LE: loop exit
PB: predicated region body
PF: predicated region fallthrough
CT: control target
= control target key end

     0   :  { %s1119_s12 = smov 0   ;;  %s1121_s13 = smov 0   ;;  %s1272_s0 = inlined_call_operand.vmem [shape: bf16[1,512,128], index: 0, kind: input, shape index: {}]   ;;  %s1273_s1 = inlined_call_operand.vmem [shape: bf16[1,128,128], index: 1, kind: input, shape index: {}]   ;;  %s1274_s2 = inlined_call_operand.vmem [shape: f32[1,128], index: 2, kind: input, shape index: {}]   ;;  %s1275_s3 = inlined_call_operand.vmem [shape: f32[1,512,128], index: 3, kind: output, shape index: {}]  }
   0x1   :  { %s1123_s14 = smov 0  }
   0x2 LB: > { %s28_s15 = sadd.s32 1, %s1093_s13  ;;  %p899_p0 = scmp.ge.s32.totalorder %s1097_s14, 1  ;;  %s1097_s14 = sphi %s1123_s14, %s13_s14   ;;  %s1093_s13 = sphi %s1121_s13, %s1277_s13   ;;  %s1089_s12 = sphi %s1119_s12, %s1276_s12  }
   0x3   : > { %p30_p1 = scmp.ge.s32.totalorder %s28_s15, 2  ;;  %p187_p2 = scmp.lt.s32.totalorder %s1097_s14, 3 }
   0x5   : > { %s1279_s15 = smov (%p30_p1, %s28_s15), 0  ;;  %p188_p3 = pnand %p899_p0, %p187_p2 }
   0x6   : > { %s900_s24 = sshll.u32 (!%p188_p3), %s1089_s12, 5 }
   0x7   : > { %191 = sbr.rel (%p188_p3) target bundleno = 237 (0xed), region = 32  ;;  %p234_p4 = scmp.lt.s32.totalorder (!%p188_p3), %s900_s24, 63 }
   0xc   : > { %v1025_v0 = vld [vmem:[%s1273_s1 + $0x38] sm:$0xff]  ;;  %v1024_v1 = vld [vmem:[%s1273_s1 + $0x30] sm:$0xff]  ;;  %v1023_v2 = vld [vmem:[%s1273_s1 + $0x28] sm:$0xff]  ;;  %s1281_s24 = smov (!%p234_p4, %s900_s24), 63 }
   0xd   : > { %524 = vmatpush.bf16.msra.mxu0 %v1025_v0  ;;  %1026 = vmatpush.bf16.msra.mxu1 %v1025_v0  ;;  %v1022_v3 = vld [vmem:[%s1273_s1 + $0x20] sm:$0xff]  ;;  %v1021_v4 = vld [vmem:[%s1273_s1 + $0x18] sm:$0xff]  ;;  %v1020_v5 = vld [vmem:[%s1273_s1 + $0x10] sm:$0xff]  ;;  %s901_s4 = sshll.u32 %s1281_s24, 2  ;;  %s903_s10 = sshll.u32 %s1281_s24, 3 }
   0xe   : > { %1027 = vmatpush.bf16.msra.mxu2 %v1025_v0  ;;  %1028 = vmatpush.bf16.msra.mxu3 %v1025_v0  ;;  %v1019_v6 = vld [vmem:[%s1273_s1 + $0x8] sm:$0xff]  ;;  %v1018_v7 = vld [vmem:[%s1273_s1] sm:$0xff]  ;;  %s1170_s9 = scalar_lea.vmem %s1272_s0, %s901_s4  ;;  %s1197_s18 = scalar_lea.vmem %s1275_s3, %s903_s10 }
   0xf   : > { %v1002_v8 = vld [vmem:[%s1170_s9] sm:$0xff]  ;;  %v1003_v12 = vld [vmem:[%s1170_s9 + $0x8] sm:$0xff]  ;;  %v1004_v16 = vld [vmem:[%s1170_s9 + $0x10] sm:$0xff] }
  0x10   : > { %v1006_v9 = vld [vmem:[%s1170_s9 + $0x20] sm:$0xff]  ;;  %v1007_v13 = vld [vmem:[%s1170_s9 + $0x28] sm:$0xff]  ;;  %v1008_v17 = vld [vmem:[%s1170_s9 + $0x30] sm:$0xff] }
  0x11   : > { %525 = vmatpush.bf16.msra.mxu0 %v1024_v1  ;;  %1029 = vmatpush.bf16.msra.mxu1 %v1024_v1  ;;  %v1010_v10 = vld [vmem:[%s1170_s9 + $0x40] sm:$0xff]  ;;  %v1011_v14 = vld [vmem:[%s1170_s9 + $0x48] sm:$0xff]  ;;  %v1012_v18 = vld [vmem:[%s1170_s9 + $0x50] sm:$0xff] }
  0x12   : > { %1030 = vmatpush.bf16.msra.mxu2 %v1024_v1  ;;  %1031 = vmatpush.bf16.msra.mxu3 %v1024_v1  ;;  %v1014_v11 = vld [vmem:[%s1170_s9 + $0x60] sm:$0xff]  ;;  %v1015_v15 = vld [vmem:[%s1170_s9 + $0x68] sm:$0xff]  ;;  %v1016_v19 = vld [vmem:[%s1170_s9 + $0x70] sm:$0xff] }
  0x13   : > { %v1005_v20 = vld [vmem:[%s1170_s9 + $0x18] sm:$0xff]  ;;  %v1192_v24 = vld [vmem:[%s1274_s2] ss:$0 sm:$0xff] }
  0x14   : > { %v1009_v21 = vld [vmem:[%s1170_s9 + $0x38] sm:$0xff] }
  0x15   : > { %526 = vmatpush.bf16.msra.mxu0 %v1023_v2  ;;  %1032 = vmatpush.bf16.msra.mxu1 %v1023_v2  ;;  %v1013_v22 = vld [vmem:[%s1170_s9 + $0x58] sm:$0xff] }
  0x16   : > { %1033 = vmatpush.bf16.msra.mxu2 %v1023_v2  ;;  %1034 = vmatpush.bf16.msra.mxu3 %v1023_v2  ;;  %v1017_v23 = vld [vmem:[%s1170_s9 + $0x78] sm:$0xff] }
  0x19   : > { %527 = vmatpush.bf16.msra.mxu0 %v1022_v3  ;;  %1035 = vmatpush.bf16.msra.mxu1 %v1022_v3 }
  0x1a   : > { %1036 = vmatpush.bf16.msra.mxu2 %v1022_v3  ;;  %1037 = vmatpush.bf16.msra.mxu3 %v1022_v3 }
  0x1d   : > { %528 = vmatpush.bf16.msra.mxu0 %v1021_v4  ;;  %1038 = vmatpush.bf16.msra.mxu1 %v1021_v4 }
  0x1e   : > { %1039 = vmatpush.bf16.msra.mxu2 %v1021_v4  ;;  %1040 = vmatpush.bf16.msra.mxu3 %v1021_v4 }
  0x21   : > { %529 = vmatpush.bf16.msra.mxu0 %v1020_v5  ;;  %1041 = vmatpush.bf16.msra.mxu1 %v1020_v5 }
  0x22   : > { %1042 = vmatpush.bf16.msra.mxu2 %v1020_v5  ;;  %1043 = vmatpush.bf16.msra.mxu3 %v1020_v5 }
  0x25   : > { %530 = vmatpush.bf16.msra.mxu0 %v1019_v6  ;;  %1044 = vmatpush.bf16.msra.mxu1 %v1019_v6 }
  0x26   : > { %1045 = vmatpush.bf16.msra.mxu2 %v1019_v6  ;;  %1046 = vmatpush.bf16.msra.mxu3 %v1019_v6 }
  0x29   : > { %531 = vmatpush.bf16.msra.mxu0 %v1018_v7  ;;  %1047 = vmatpush.bf16.msra.mxu1 %v1018_v7 }
  0x2a   : > { %1048 = vmatpush.bf16.msra.mxu2 %v1018_v7  ;;  %1049 = vmatpush.bf16.msra.mxu3 %v1018_v7 }
  0x2c   : > { %532 = vmatmul.bf16.vlgmr.msra.gmra.mxu0 %v1002_v8  ;;  %552 = vmatmul.bf16.vlgmr.msra.gmra.mxu1 %v1006_v9 }
  0x2d   : > { %572 = vmatmul.bf16.vlgmr.msra.gmra.mxu2 %v1010_v10  ;;  %592 = vmatmul.bf16.vlgmr.msra.gmra.mxu3 %v1014_v11 }
  0x3c   : > { %537 = vmatmul.bf16.gmra.mxu0 %v1003_v12  ;;  %557 = vmatmul.bf16.gmra.mxu1 %v1007_v13 }
  0x3d   : > { %577 = vmatmul.bf16.gmra.mxu2 %v1011_v14  ;;  %597 = vmatmul.bf16.gmra.mxu3 %v1015_v15 }
  0x4c   : > { %542 = vmatmul.bf16.gmra.mxu0 %v1004_v16  ;;  %562 = vmatmul.bf16.gmra.mxu1 %v1008_v17 }
  0x4d   : > { %582 = vmatmul.bf16.gmra.mxu2 %v1012_v18  ;;  %602 = vmatmul.bf16.gmra.mxu3 %v1016_v19 }
  0x5c   : > { %547 = vmatmul.bf16.gmra.mxu0 %v1005_v20  ;;  %567 = vmatmul.bf16.gmra.mxu1 %v1009_v21 }
  0x5d   : > { %587 = vmatmul.bf16.gmra.mxu2 %v1013_v22  ;;  %607 = vmatmul.bf16.gmra.mxu3 %v1017_v23 }
  0xa9   : > { %v533_v25 = vpop.f32.mrf.mxu0  ;;  %v553_v26 = vpop.f32.mrf.mxu1 }
  0xaa   : > { %v716_v27 = vadd.f32 %v1192_v24, %v533_v25  ;;  %v724_v28 = vadd.f32 %v1192_v24, %v553_v26 }
  0xac   : > { %748 = vst [vmem:[%s1197_s18] sm:$0xff] %v716_v27 }
  0xad   : > { %756 = vst [vmem:[%s1197_s18 + $0x40] sm:$0xff] %v724_v28 }
  0xb0   : > { %v573_v29 = vpop.f32.mrf.mxu2  ;;  %v593_v30 = vpop.f32.mrf.mxu3 }
  0xb1   : > { %v732_v31 = vadd.f32 %v1192_v24, %v573_v29  ;;  %v740_v32 = vadd.f32 %v1192_v24, %v593_v30  ;;  %v535_v33 = vpop.f32.mrf.mxu0  ;;  %v555_v34 = vpop.f32.mrf.mxu1 }
  0xb2   : > { %v717_v35 = vadd.f32 %v1192_v24, %v535_v33  ;;  %v725_v36 = vadd.f32 %v1192_v24, %v555_v34 }
  0xb3   : > { %764 = vst [vmem:[%s1197_s18 + $0x80] sm:$0xff] %v732_v31 }
  0xb4   : > { %772 = vst [vmem:[%s1197_s18 + $0xc0] sm:$0xff] %v740_v32 }
  0xb5   : > { %749 = vst [vmem:[%s1197_s18 + $0x8] sm:$0xff] %v717_v35 }
  0xb6   : > { %757 = vst [vmem:[%s1197_s18 + $0x48] sm:$0xff] %v725_v36 }
  0xb8   : > { %v575_v37 = vpop.f32.mrf.mxu2  ;;  %v595_v38 = vpop.f32.mrf.mxu3 }
  0xb9   : > { %v733_v39 = vadd.f32 %v1192_v24, %v575_v37  ;;  %v741_v40 = vadd.f32 %v1192_v24, %v595_v38  ;;  %v538_v41 = vpop.f32.mrf.mxu0  ;;  %v558_v42 = vpop.f32.mrf.mxu1 }
  0xba   : > { %v718_v43 = vadd.f32 %v1192_v24, %v538_v41  ;;  %v726_v44 = vadd.f32 %v1192_v24, %v558_v42 }
  0xbb   : > { %765 = vst [vmem:[%s1197_s18 + $0x88] sm:$0xff] %v733_v39 }
  0xbc   : > { %773 = vst [vmem:[%s1197_s18 + $0xc8] sm:$0xff] %v741_v40 }
  0xbd   : > { %750 = vst [vmem:[%s1197_s18 + $0x10] sm:$0xff] %v718_v43 }
  0xbe   : > { %758 = vst [vmem:[%s1197_s18 + $0x50] sm:$0xff] %v726_v44 }
  0xc0   : > { %v578_v45 = vpop.f32.mrf.mxu2  ;;  %v598_v46 = vpop.f32.mrf.mxu3 }
  0xc1   : > { %v734_v47 = vadd.f32 %v1192_v24, %v578_v45  ;;  %v742_v48 = vadd.f32 %v1192_v24, %v598_v46  ;;  %v540_v49 = vpop.f32.mrf.mxu0  ;;  %v560_v50 = vpop.f32.mrf.mxu1 }
  0xc2   : > { %v719_v51 = vadd.f32 %v1192_v24, %v540_v49  ;;  %v727_v52 = vadd.f32 %v1192_v24, %v560_v50 }
  0xc3   : > { %766 = vst [vmem:[%s1197_s18 + $0x90] sm:$0xff] %v734_v47 }
  0xc4   : > { %774 = vst [vmem:[%s1197_s18 + $0xd0] sm:$0xff] %v742_v48 }
  0xc5   : > { %751 = vst [vmem:[%s1197_s18 + $0x18] sm:$0xff] %v719_v51 }
  0xc6   : > { %759 = vst [vmem:[%s1197_s18 + $0x58] sm:$0xff] %v727_v52 }
  0xc8   : > { %v580_v53 = vpop.f32.mrf.mxu2  ;;  %v600_v54 = vpop.f32.mrf.mxu3 }
  0xc9   : > { %v735_v55 = vadd.f32 %v1192_v24, %v580_v53  ;;  %v743_v56 = vadd.f32 %v1192_v24, %v600_v54  ;;  %v543_v57 = vpop.f32.mrf.mxu0  ;;  %v563_v58 = vpop.f32.mrf.mxu1 }
  0xca   : > { %v720_v59 = vadd.f32 %v1192_v24, %v543_v57  ;;  %v728_v60 = vadd.f32 %v1192_v24, %v563_v58 }
  0xcb   : > { %767 = vst [vmem:[%s1197_s18 + $0x98] sm:$0xff] %v735_v55 }
  0xcc   : > { %775 = vst [vmem:[%s1197_s18 + $0xd8] sm:$0xff] %v743_v56 }
  0xcd   : > { %752 = vst [vmem:[%s1197_s18 + $0x20] sm:$0xff] %v720_v59 }
  0xce   : > { %760 = vst [vmem:[%s1197_s18 + $0x60] sm:$0xff] %v728_v60 }
  0xd0   : > { %v583_v61 = vpop.f32.mrf.mxu2  ;;  %v603_v62 = vpop.f32.mrf.mxu3 }
  0xd1   : > { %v736_v63 = vadd.f32 %v1192_v24, %v583_v61  ;;  %v744_v0 = vadd.f32 %v1192_v24, %v603_v62  ;;  %v545_v1 = vpop.f32.mrf.mxu0  ;;  %v565_v2 = vpop.f32.mrf.mxu1 }
  0xd2   : > { %v721_v3 = vadd.f32 %v1192_v24, %v545_v1  ;;  %v729_v4 = vadd.f32 %v1192_v24, %v565_v2 }
  0xd3   : > { %768 = vst [vmem:[%s1197_s18 + $0xa0] sm:$0xff] %v736_v63 }
  0xd4   : > { %776 = vst [vmem:[%s1197_s18 + $0xe0] sm:$0xff] %v744_v0 }
  0xd5   : > { %753 = vst [vmem:[%s1197_s18 + $0x28] sm:$0xff] %v721_v3 }
  0xd6   : > { %761 = vst [vmem:[%s1197_s18 + $0x68] sm:$0xff] %v729_v4 }
  0xd8   : > { %v585_v5 = vpop.f32.mrf.mxu2  ;;  %v605_v6 = vpop.f32.mrf.mxu3 }
  0xd9   : > { %v737_v7 = vadd.f32 %v1192_v24, %v585_v5  ;;  %v745_v8 = vadd.f32 %v1192_v24, %v605_v6  ;;  %v548_v9 = vpop.f32.mrf.mxu0  ;;  %v568_v10 = vpop.f32.mrf.mxu1 }
  0xda   : > { %v722_v11 = vadd.f32 %v1192_v24, %v548_v9  ;;  %v730_v12 = vadd.f32 %v1192_v24, %v568_v10 }
  0xdb   : > { %769 = vst [vmem:[%s1197_s18 + $0xa8] sm:$0xff] %v737_v7 }
  0xdc   : > { %777 = vst [vmem:[%s1197_s18 + $0xe8] sm:$0xff] %v745_v8 }
  0xdd   : > { %754 = vst [vmem:[%s1197_s18 + $0x30] sm:$0xff] %v722_v11 }
  0xde   : > { %762 = vst [vmem:[%s1197_s18 + $0x70] sm:$0xff] %v730_v12 }
  0xe0   : > { %v588_v13 = vpop.f32.mrf.mxu2  ;;  %v608_v14 = vpop.f32.mrf.mxu3 }
  0xe1   : > { %v738_v15 = vadd.f32 %v1192_v24, %v588_v13  ;;  %v746_v16 = vadd.f32 %v1192_v24, %v608_v14  ;;  %v550_v17 = vpop.f32.mrf.mxu0  ;;  %v570_v18 = vpop.f32.mrf.mxu1 }
  0xe2   : > { %v723_v19 = vadd.f32 %v1192_v24, %v550_v17  ;;  %v731_v20 = vadd.f32 %v1192_v24, %v570_v18 }
  0xe3   : > { %770 = vst [vmem:[%s1197_s18 + $0xb0] sm:$0xff] %v738_v15 }
  0xe4   : > { %778 = vst [vmem:[%s1197_s18 + $0xf0] sm:$0xff] %v746_v16 }
  0xe5   : > { %755 = vst [vmem:[%s1197_s18 + $0x38] sm:$0xff] %v723_v19 }
  0xe6   : > { %763 = vst [vmem:[%s1197_s18 + $0x78] sm:$0xff] %v731_v20 }
  0xe8   : > { %v590_v21 = vpop.f32.mrf.mxu2  ;;  %v610_v22 = vpop.f32.mrf.mxu3 }
  0xe9   : > { %v739_v23 = vadd.f32 %v1192_v24, %v590_v21  ;;  %v747_v25 = vadd.f32 %v1192_v24, %v610_v22 }
  0xeb   : > { %771 = vst [vmem:[%s1197_s18 + $0xb8] sm:$0xff] %v739_v23 }
  0xec   : > { %779 = vst [vmem:[%s1197_s18 + $0xf8] sm:$0xff] %v747_v25 }
  0xed PF: > { %s13_s14 = sadd.s32 1, %s1097_s14   ;;  %s1276_s12 = smov %s1093_s13 }
  0xee   : > { %p10_p5 = scmp.ge.s32.totalorder %s13_s14, 4   ;;  %s1277_s13 = smov %s1279_s15 }
  0xf0   :  { %12 = sbr.rel (!%p10_p5) target bundleno = 2 (0x2), region = 73 }

// kernel: _lambda_.18
= control target key start
LH: loop header
LB: loop body
LE: loop exit
PB: predicated region body
PF: predicated region fallthrough
CT: control target
= control target key end

     0   :  { %s939_s1 = inlined_call_operand.vmem [shape: bf16[1,128,128], index: 1, kind: input, shape index: {}]   ;;  %s940_s0 = inlined_call_operand.vmem [shape: bf16[1,128,128], index: 0, kind: input, shape index: {}]   ;;  %s941_s2 = inlined_call_operand.vmem [shape: f32[1,128], index: 2, kind: input, shape index: {}]   ;;  %s942_s3 = inlined_call_operand.vmem [shape: f32[1,128,128], index: 3, kind: output, shape index: {0}]   ;;  %s943_s4 = inlined_call_operand.vmem [shape: f32[1,1,2,128], index: 4, kind: output, shape index: {1}]  }
   0x1   :  { %v520_v0 = vld [vmem:[%s939_s1 + $0x38] sm:$0xff]  ;;  %v519_v1 = vld [vmem:[%s939_s1 + $0x30] sm:$0xff]  ;;  %v580_v2 = vld [vmem:[%s940_s0] sm:$0xf] }
   0x2   :  { %276 = vmatpush.bf16.msra.mxu0 %v520_v0  ;;  %521 = vmatpush.bf16.msra.mxu1 %v520_v0  ;;  %v518_v3 = vld [vmem:[%s939_s1 + $0x28] sm:$0xff]  ;;  %v588_v4 = vld [vmem:[%s940_s0 + $0x4] sm:$0xf]  ;;  %v593_v5 = vld [vmem:[%s940_s0 + $0x10] sm:$0xf]  ;;  %v52_v9 = vunpack.c.l.bf16 %v580_v2 }
   0x3   :  { %522 = vmatpush.bf16.msra.mxu2 %v520_v0  ;;  %523 = vmatpush.bf16.msra.mxu3 %v520_v0  ;;  %v598_v6 = vld [vmem:[%s940_s0 + $0x14] sm:$0xf]  ;;  %v603_v7 = vld [vmem:[%s940_s0 + $0x20] sm:$0xf]  ;;  %v608_v8 = vld [vmem:[%s940_s0 + $0x24] sm:$0xf]  ;;  %v53_v10 = vunpack.c.l.bf16 %v588_v4  ;;  %v56_v11 = vunpack.c.l.bf16 %v593_v5 }
   0x4   :  { %v616_v12 = vld [vmem:[%s940_s0 + $0x30] sm:$0xf]  ;;  %v621_v13 = vld [vmem:[%s940_s0 + $0x34] sm:$0xf]  ;;  %v57_v14 = vunpack.c.l.bf16 %v598_v6  ;;  %v60_v15 = vunpack.c.l.bf16 %v603_v7  ;;  %v61_v16 = vunpack.c.l.bf16 %v608_v8  ;;  %v517_v17 = vld [vmem:[%s939_s1 + $0x20] sm:$0xff]  ;;  %vm629_vm0 = vcmp.gt.f32.partialorder %v52_v9, 0.0 }
   0x5   :  { %vm633_vm1 = vcmp.gt.f32.partialorder %v53_v10, 0.0  ;;  %v84_v20 = vmul.f32 0.20019531, %v52_v9  ;;  %v64_v21 = vunpack.c.l.bf16 %v616_v12  ;;  %v65_v22 = vunpack.c.l.bf16 %v621_v13  ;;  %vm116_vm3 = vmpackc.low %vm629_vm0, %vm629_vm0  ;;  %v516_v30 = vld [vmem:[%s939_s1 + $0x18] sm:$0xff]  ;;  %v515_v43 = vld [vmem:[%s939_s1 + $0x10] sm:$0xff] }
   0x6   :  { %277 = vmatpush.bf16.msra.mxu0 %v519_v1  ;;  %524 = vmatpush.bf16.msra.mxu1 %v519_v1  ;;  %v85_v23 = vmul.f32 0.20019531, %v53_v10  ;;  %vm639_vm2 = vcmp.gt.f32.partialorder %v56_v11, 0.0  ;;  %v88_v25 = vmul.f32 0.20019531, %v56_v11  ;;  %vm646_vm4 = vcmp.gt.f32.partialorder %v57_v14, 0.0  ;;  %vm117_vm5 = vmpackc.low %vm633_vm1, %vm633_vm1  ;;  %v514_v49 = vld [vmem:[%s939_s1 + $0x8] sm:$0xff]  ;;  %v513_v9 = vld [vmem:[%s939_s1] sm:$0xff] }
   0x7   :  { %525 = vmatpush.bf16.msra.mxu2 %v519_v1  ;;  %526 = vmatpush.bf16.msra.mxu3 %v519_v1  ;;  %v89_v27 = vmul.f32 0.20019531, %v57_v14  ;;  %v92_v28 = vmul.f32 0.20019531, %v60_v15  ;;  %v93_v29 = vmul.f32 0.20019531, %v61_v16  ;;  %vm656_vm6 = vcmp.gt.f32.partialorder %v60_v15, 0.0  ;;  %vm120_vm7 = vmpackc.low %vm639_vm2, %vm639_vm2  ;;  %v730_v53 = vld [vmem:[%s940_s0 + $0x8] sm:$0xf] }
   0x8   :  { %v100_v32 = vpack.c.bf16 %v84_v20, %v84_v20  ;;  %vm663_vm8 = vcmp.gt.f32.partialorder %v61_v16, 0.0  ;;  %v96_v34 = vmul.f32 0.20019531, %v64_v21  ;;  %v97_v35 = vmul.f32 0.20019531, %v65_v22  ;;  %vm121_vm9 = vmpackc.low %vm646_vm4, %vm646_vm4  ;;  %v735_v55 = vld [vmem:[%s940_s0 + $0xc] sm:$0xf] }
   0x9   :  { %v101_v36 = vpack.c.bf16 %v85_v23, %v85_v23  ;;  %v104_v37 = vpack.c.bf16 %v88_v25, %v88_v25  ;;  %vm670_vm10 = vcmp.gt.f32.partialorder %v64_v21, 0.0  ;;  %v105_v39 = vpack.c.bf16 %v89_v27, %v89_v27  ;;  %vm124_vm11 = vmpackc.low %vm656_vm6, %vm656_vm6  ;;  %v740_v56 = vld [vmem:[%s940_s0 + $0x18] sm:$0xf]  ;;  %v745_v57 = vld [vmem:[%s940_s0 + $0x1c] sm:$0xf] }
   0xa   :  { %278 = vmatpush.bf16.msra.mxu0 %v518_v3  ;;  %527 = vmatpush.bf16.msra.mxu1 %v518_v3  ;;  %v108_v40 = vpack.c.bf16 %v92_v28, %v92_v28  ;;  %v109_v41 = vpack.c.bf16 %v93_v29, %v93_v29  ;;  %vm677_vm12 = vcmp.gt.f32.partialorder %v65_v22, 0.0  ;;  %vm125_vm13 = vmpackc.low %vm663_vm8, %vm663_vm8  ;;  %v132_v44 = vsel %vm116_vm3, %v580_v2, %v100_v32  ;;  %v762_v62 = vld [vmem:[%s940_s0 + $0x28] sm:$0xf] }
   0xb   :  { %528 = vmatpush.bf16.msra.mxu2 %v518_v3  ;;  %529 = vmatpush.bf16.msra.mxu3 %v518_v3  ;;  %v112_v45 = vpack.c.bf16 %v96_v34, %v96_v34  ;;  %v113_v46 = vpack.c.bf16 %v97_v35, %v97_v35  ;;  %vm128_vm14 = vmpackc.low %vm670_vm10, %vm670_vm10  ;;  %v133_v47 = vsel %vm117_vm5, %v588_v4, %v101_v36  ;;  %v196_v54 = vunpack.c.l.b16 %v132_v44  ;;  %v768_v3 = vld [vmem:[%s940_s0 + $0x2c] sm:$0xf]  ;;  %v773_v4 = vld [vmem:[%s940_s0 + $0x38] sm:$0xf] }
   0xc   :  { %v136_v48 = vsel %vm120_vm7, %v593_v5, %v104_v37  ;;  %vm129_vm15 = vmpackc.low %vm677_vm12, %vm677_vm12  ;;  %v137_v50 = vsel %vm121_vm9, %v598_v6, %v105_v39  ;;  %v140_v51 = vsel %vm124_vm11, %v603_v7, %v108_v40  ;;  %v141_v52 = vsel %vm125_vm13, %v608_v8, %v109_v41  ;;  %v778_v5 = vld [vmem:[%s940_s0 + $0x3c] sm:$0xf] }
   0xd   :  { %v197_v58 = vunpack.c.l.b16 %v133_v47  ;;  %v200_v59 = vunpack.c.l.b16 %v136_v48  ;;  %v144_v60 = vsel %vm128_vm14, %v616_v12, %v112_v45  ;;  %v145_v61 = vsel %vm129_vm15, %v621_v13, %v113_v46 }
   0xe   :  { %279 = vmatpush.bf16.msra.mxu0 %v517_v17  ;;  %530 = vmatpush.bf16.msra.mxu1 %v517_v17  ;;  %v201_v63 = vunpack.c.l.b16 %v137_v50  ;;  %v204_v0 = vunpack.c.l.b16 %v140_v51  ;;  %v205_v1 = vunpack.c.l.b16 %v141_v52  ;;  %v54_v2 = vunpack.c.l.bf16 %v730_v53 }
   0xf   :  { %531 = vmatpush.bf16.msra.mxu2 %v517_v17  ;;  %532 = vmatpush.bf16.msra.mxu3 %v517_v17  ;;  %v55_v6 = vunpack.c.l.bf16 %v735_v55  ;;  %v58_v7 = vunpack.c.l.bf16 %v740_v56  ;;  %v59_v8 = vunpack.c.l.bf16 %v745_v57  ;;  %v208_v10 = vunpack.c.l.b16 %v144_v60 }
  0x10   :  { %v209_v11 = vunpack.c.l.b16 %v145_v61  ;;  %vm786_vm0 = vcmp.gt.f32.partialorder %v54_v2, 0.0  ;;  %v62_v13 = vunpack.c.l.bf16 %v762_v62  ;;  %v63_v15 = vunpack.c.l.bf16 %v768_v3 }
  0x11   :  { %vm791_vm1 = vcmp.gt.f32.partialorder %v55_v6, 0.0  ;;  %v66_v16 = vunpack.c.l.bf16 %v773_v4  ;;  %v67_v17 = vunpack.c.l.bf16 %v778_v5  ;;  %v212_v18 = vpack.c.b16 %v197_v58, %v196_v54  ;;  %vm118_vm3 = vmpackc.low %vm786_vm0, %vm786_vm0 }
  0x12   :  { %280 = vmatpush.bf16.msra.mxu0 %v516_v30  ;;  %533 = vmatpush.bf16.msra.mxu1 %v516_v30  ;;  %v214_v19 = vpack.c.b16 %v201_v63, %v200_v59  ;;  %v216_v20 = vpack.c.b16 %v205_v1, %v204_v0  ;;  %vm798_vm2 = vcmp.gt.f32.partialorder %v58_v7, 0.0  ;;  %v86_v22 = vmul.f32 0.20019531, %v54_v2  ;;  %vm119_vm5 = vmpackc.low %vm791_vm1, %vm791_vm1 }
  0x13   :  { %534 = vmatpush.bf16.msra.mxu2 %v516_v30  ;;  %535 = vmatpush.bf16.msra.mxu3 %v516_v30  ;;  %v87_v23 = vmul.f32 0.20019531, %v55_v6  ;;  %vm805_vm4 = vcmp.gt.f32.partialorder %v59_v8, 0.0  ;;  %v90_v25 = vmul.f32 0.20019531, %v58_v7  ;;  %v218_v26 = vpack.c.b16 %v209_v11, %v208_v10  ;;  %vm122_vm7 = vmpackc.low %vm798_vm2, %vm798_vm2 }
  0x14   :  { %v91_v27 = vmul.f32 0.20019531, %v59_v8  ;;  %vm812_vm6 = vcmp.gt.f32.partialorder %v62_v13, 0.0  ;;  %v94_v29 = vmul.f32 0.20019531, %v62_v13  ;;  %vm819_vm8 = vcmp.gt.f32.partialorder %v63_v15, 0.0  ;;  %vm123_vm9 = vmpackc.low %vm805_vm4, %vm805_vm4 }
  0x15   :  { %v95_v31 = vmul.f32 0.20019531, %v63_v15  ;;  %v98_v32 = vmul.f32 0.20019531, %v66_v16  ;;  %v99_v33 = vmul.f32 0.20019531, %v67_v17  ;;  %vm826_vm10 = vcmp.gt.f32.partialorder %v66_v16, 0.0  ;;  %vm126_vm11 = vmpackc.low %vm812_vm6, %vm812_vm6 }
  0x16   :  { %281 = vmatpush.bf16.msra.mxu0 %v515_v43  ;;  %536 = vmatpush.bf16.msra.mxu1 %v515_v43  ;;  %v102_v35 = vpack.c.bf16 %v86_v22, %v86_v22  ;;  %vm833_vm12 = vcmp.gt.f32.partialorder %v67_v17, 0.0  ;;  %v103_v37 = vpack.c.bf16 %v87_v23, %v87_v23  ;;  %v106_v38 = vpack.c.bf16 %v90_v25, %v90_v25  ;;  %vm127_vm13 = vmpackc.low %vm819_vm8, %vm819_vm8 }
  0x17   :  { %537 = vmatpush.bf16.msra.mxu2 %v515_v43  ;;  %538 = vmatpush.bf16.msra.mxu3 %v515_v43  ;;  %v107_v39 = vpack.c.bf16 %v91_v27, %v91_v27  ;;  %v110_v40 = vpack.c.bf16 %v94_v29, %v94_v29  ;;  %v111_v41 = vpack.c.bf16 %v95_v31, %v95_v31  ;;  %vm130_vm14 = vmpackc.low %vm826_vm10, %vm826_vm10  ;;  %vm470_vm0 = vcmask 1040384  }
  0x18   :  { %v114_v42 = vpack.c.bf16 %v98_v32, %v98_v32  ;;  %v115_v43 = vpack.c.bf16 %v99_v33, %v99_v33  ;;  %vm131_vm15 = vmpackc.low %vm833_vm12, %vm833_vm12  ;;  %v134_v44 = vsel %vm118_vm3, %v730_v53, %v102_v35  ;;  %v135_v45 = vsel %vm119_vm5, %v735_v55, %v103_v37 }
  0x19   :  { %v138_v46 = vsel %vm122_vm7, %v740_v56, %v106_v38  ;;  %v139_v47 = vsel %vm123_vm9, %v745_v57, %v107_v39  ;;  %v142_v48 = vsel %vm126_vm11, %v762_v62, %v110_v40  ;;  %v198_v52 = vunpack.c.l.b16 %v134_v44  ;;  %v545_v62 = vld [vmem:[%s941_s2] ss:$0 sm:$0xff] }
  0x1a   :  { %282 = vmatpush.bf16.msra.mxu0 %v514_v49  ;;  %539 = vmatpush.bf16.msra.mxu1 %v514_v49  ;;  %v146_v50 = vsel %vm130_vm14, %v773_v4, %v114_v42  ;;  %v147_v51 = vsel %vm131_vm15, %v778_v5, %v115_v43  ;;  %v199_v53 = vunpack.c.l.b16 %v135_v45  ;;  %v202_v54 = vunpack.c.l.b16 %v138_v46 }
  0x1b   :  { %540 = vmatpush.bf16.msra.mxu2 %v514_v49  ;;  %541 = vmatpush.bf16.msra.mxu3 %v514_v49  ;;  %v143_v49 = vsel %vm127_vm13, %v768_v3, %v111_v41  ;;  %v203_v55 = vunpack.c.l.b16 %v139_v47  ;;  %v206_v56 = vunpack.c.l.b16 %v142_v48  ;;  %v210_v57 = vunpack.c.l.b16 %v146_v50 }
  0x1c   :  { %v207_v58 = vunpack.c.l.b16 %v143_v49  ;;  %v211_v59 = vunpack.c.l.b16 %v147_v51  ;;  %v213_v60 = vpack.c.b16 %v199_v53, %v198_v52 }
  0x1d   :  { %v215_v61 = vpack.c.b16 %v203_v55, %v202_v54 }
  0x1e   :  { %283 = vmatpush.bf16.msra.mxu0 %v513_v9  ;;  %542 = vmatpush.bf16.msra.mxu1 %v513_v9  ;;  %v217_v63 = vpack.c.b16 %v207_v58, %v206_v56  ;;  %v219_v0 = vpack.c.b16 %v211_v59, %v210_v57 }
  0x1f   :  { %543 = vmatpush.bf16.msra.mxu2 %v513_v9  ;;  %544 = vmatpush.bf16.msra.mxu3 %v513_v9 }
  0x21   :  { %284 = vmatmul.bf16.vlgmr.msra.gmra.mxu0 %v212_v18  ;;  %294 = vmatmul.bf16.vlgmr.msra.gmra.mxu1 %v214_v19 }
  0x22   :  { %304 = vmatmul.bf16.vlgmr.msra.gmra.mxu2 %v216_v20  ;;  %314 = vmatmul.bf16.vlgmr.msra.gmra.mxu3 %v218_v26 }
  0x31   :  { %289 = vmatmul.bf16.gmra.mxu0 %v213_v60  ;;  %299 = vmatmul.bf16.gmra.mxu1 %v215_v61 }
  0x32   :  { %309 = vmatmul.bf16.gmra.mxu2 %v217_v63  ;;  %319 = vmatmul.bf16.gmra.mxu3 %v219_v0 }
  0x9e   :  { %v285_v1 = vpop.f32.mrf.mxu0  ;;  %v295_v2 = vpop.f32.mrf.mxu1 }
  0x9f   :  { %v380_v3 = vadd.f32 %v545_v62, %v285_v1  ;;  %v384_v4 = vadd.f32 %v545_v62, %v295_v2 }
  0xa1   :  { %396 = vst [vmem:[%s942_s3] sm:$0xff] %v380_v3  ;;  %v433_v22 = vmul.f32 %v380_v3, %v380_v3  ;;  %v437_v38 = vmul.f32 %v384_v4, %v384_v4 }
  0xa2   :  { %400 = vst [vmem:[%s942_s3 + $0x20] sm:$0xff] %v384_v4 }
  0xa5   :  { %v305_v5 = vpop.f32.mrf.mxu2  ;;  %v315_v6 = vpop.f32.mrf.mxu3 }
  0xa6   :  { %v287_v7 = vpop.f32.mrf.mxu0  ;;  %v297_v8 = vpop.f32.mrf.mxu1  ;;  %v388_v9 = vadd.f32 %v545_v62, %v305_v5  ;;  %v888_v12 = vadd.f32 %v545_v62, %v315_v6 }
  0xa7   :  { %v381_v10 = vadd.f32 %v545_v62, %v287_v7  ;;  %v385_v11 = vadd.f32 %v545_v62, %v297_v8 }
  0xa8   :  { %404 = vst [vmem:[%s942_s3 + $0x40] sm:$0xff] %v388_v9  ;;  %v441_v54 = vmul.f32 %v388_v9, %v388_v9  ;;  %v445_v2 = vmul.f32 %v888_v12, %v888_v12 }
  0xa9   :  { %397 = vst [vmem:[%s942_s3 + $0x8] sm:$0xff] %v381_v10  ;;  %v434_v21 = vmul.f32 %v381_v10, %v381_v10  ;;  %v412_v23 = vadd.f32 %v381_v10, %v380_v3  ;;  %v438_v41 = vmul.f32 %v385_v11, %v385_v11 }
  0xaa   :  { %401 = vst [vmem:[%s942_s3 + $0x28] sm:$0xff] %v385_v11 }
  0xab   :  { %408 = vst [vmem:[%s942_s3 + $0x60] sm:$0xff] %v888_v12  ;;  %v449_v27 = vadd.f32 %v434_v21, %v433_v22 }
  0xad   :  { %v307_v13 = vpop.f32.mrf.mxu2  ;;  %v317_v14 = vpop.f32.mrf.mxu3 }
  0xae   :  { %v290_v15 = vpop.f32.mrf.mxu0  ;;  %v300_v16 = vpop.f32.mrf.mxu1  ;;  %v389_v17 = vadd.f32 %v545_v62, %v307_v13  ;;  %v393_v20 = vadd.f32 %v545_v62, %v317_v14 }
  0xaf   :  { %v382_v18 = vadd.f32 %v545_v62, %v290_v15  ;;  %v386_v19 = vadd.f32 %v545_v62, %v300_v16 }
  0xb0   :  { %405 = vst [vmem:[%s942_s3 + $0x48] sm:$0xff] %v389_v17  ;;  %v442_v58 = vmul.f32 %v389_v17, %v389_v17  ;;  %v446_v5 = vmul.f32 %v393_v20, %v393_v20 }
  0xb1   :  { %398 = vst [vmem:[%s942_s3 + $0x10] sm:$0xff] %v382_v18  ;;  %v435_v24 = vmul.f32 %v382_v18, %v382_v18  ;;  %v413_v31 = vadd.f32 %v412_v23, %v382_v18  ;;  %v439_v48 = vmul.f32 %v386_v19, %v386_v19 }
  0xb2   :  { %402 = vst [vmem:[%s942_s3 + $0x30] sm:$0xff] %v386_v19 }
  0xb3   :  { %409 = vst [vmem:[%s942_s3 + $0x68] sm:$0xff] %v393_v20  ;;  %v450_v35 = vadd.f32 %v449_v27, %v435_v24 }
  0xb5   :  { %v310_v25 = vpop.f32.mrf.mxu2  ;;  %v320_v26 = vpop.f32.mrf.mxu3 }
  0xb6   :  { %v292_v28 = vpop.f32.mrf.mxu0  ;;  %v302_v29 = vpop.f32.mrf.mxu1  ;;  %v390_v30 = vadd.f32 %v545_v62, %v310_v25  ;;  %v394_v34 = vadd.f32 %v545_v62, %v320_v26 }
  0xb7   :  { %v383_v32 = vadd.f32 %v545_v62, %v292_v28  ;;  %v387_v33 = vadd.f32 %v545_v62, %v302_v29 }
  0xb8   :  { %406 = vst [vmem:[%s942_s3 + $0x50] sm:$0xff] %v390_v30  ;;  %v443_v61 = vmul.f32 %v390_v30, %v390_v30 }
  0xb9   :  { %399 = vst [vmem:[%s942_s3 + $0x18] sm:$0xff] %v383_v32  ;;  %v414_v36 = vadd.f32 %v413_v31, %v383_v32  ;;  %v436_v37 = vmul.f32 %v383_v32, %v383_v32  ;;  %v440_v52 = vmul.f32 %v387_v33, %v387_v33 }
  0xba   :  { %403 = vst [vmem:[%s942_s3 + $0x38] sm:$0xff] %v387_v33 }
  0xbb   :  { %v415_v39 = vadd.f32 %v414_v36, %v384_v4  ;;  %v451_v40 = vadd.f32 %v450_v35, %v436_v37  ;;  %410 = vst [vmem:[%s942_s3 + $0x70] sm:$0xff] %v394_v34 }
  0xbd   :  { %v452_v42 = vadd.f32 %v451_v40, %v437_v38  ;;  %v416_v43 = vadd.f32 %v415_v39, %v385_v11  ;;  %v312_v44 = vpop.f32.mrf.mxu2  ;;  %v322_v45 = vpop.f32.mrf.mxu3 }
  0xbe   :  { %v391_v46 = vadd.f32 %v545_v62, %v312_v44  ;;  %v395_v47 = vadd.f32 %v545_v62, %v322_v45 }
  0xbf   :  { %v417_v49 = vadd.f32 %v416_v43, %v386_v19  ;;  %v453_v50 = vadd.f32 %v452_v42, %v438_v41 }
  0xc0   :  { %407 = vst [vmem:[%s942_s3 + $0x58] sm:$0xff] %v391_v46  ;;  %v444_v1 = vmul.f32 %v391_v46, %v391_v46  ;;  %v448_v14 = vmul.f32 %v395_v47, %v395_v47 }
  0xc1   :  { %v418_v51 = vadd.f32 %v417_v49, %v387_v33  ;;  %v454_v53 = vadd.f32 %v453_v50, %v439_v48  ;;  %411 = vst [vmem:[%s942_s3 + $0x78] sm:$0xff] %v395_v47 }
  0xc3   :  { %v419_v55 = vadd.f32 %v418_v51, %v388_v9  ;;  %v455_v56 = vadd.f32 %v454_v53, %v440_v52  ;;  %v447_v9 = vmul.f32 %v394_v34, %v394_v34 }
  0xc5   :  { %v456_v57 = vadd.f32 %v455_v56, %v441_v54  ;;  %v420_v59 = vadd.f32 %v419_v55, %v389_v17 }
  0xc7   :  { %v421_v60 = vadd.f32 %v420_v59, %v390_v30  ;;  %v457_v63 = vadd.f32 %v456_v57, %v442_v58 }
  0xc9   :  { %v458_v0 = vadd.f32 %v457_v63, %v443_v61  ;;  %v422_v62 = vadd.f32 %v421_v60, %v391_v46 }
  0xcb   :  { %v423_v3 = vadd.f32 %v422_v62, %v888_v12  ;;  %v459_v4 = vadd.f32 %v458_v0, %v444_v1 }
  0xcd   :  { %v460_v6 = vadd.f32 %v459_v4, %v445_v2  ;;  %v424_v7 = vadd.f32 %v423_v3, %v393_v20 }
  0xcf   :  { %v425_v8 = vadd.f32 %v424_v7, %v394_v34  ;;  %v461_v10 = vadd.f32 %v460_v6, %v446_v5 }
  0xd1   :  { %v462_v11 = vadd.f32 %v461_v10, %v447_v9  ;;  %v426_v13 = vadd.f32 %v425_v8, %v395_v47 }
  0xd3   :  { %v427_v15 = vrot.slane %v426_v13, 4  ;;  %v463_v16 = vadd.f32 %v462_v11, %v448_v14 }
  0xd5   :  { %v428_v17 = vadd.f32 %v427_v15, %v426_v13  ;;  %v464_v18 = vrot.slane %v463_v16, 4 }
  0xd7   :  { %v429_v19 = vrot.slane %v428_v17, 2  ;;  %v465_v21 = vadd.f32 %v464_v18, %v463_v16 }
  0xd9   :  { %v430_v22 = vadd.f32 %v429_v19, %v428_v17  ;;  %v466_v23 = vrot.slane %v465_v21, 2 }
  0xdb   :  { %v431_v24 = vrot.slane %v430_v22, 1  ;;  %v467_v12 = vadd.f32 %v466_v23, %v465_v21 }
  0xdd   :  { %v468_v25 = vrot.slane %v467_v12, 1  ;;  %v432_v26 = vadd.f32 %v431_v24, %v430_v22 }
  0xdf   :  { %v469_v20 = vadd.f32 %v468_v25, %v467_v12 }
  0xe1   :  { %v471_v27 = vsel %vm470_vm0, %v432_v26, %v469_v20 }
  0xe2   :  { %472 = vst [vmem:[%s943_s4] sm:$0x3] %v471_v27 }

// kernel: _lambda_.19
= control target key start
LH: loop header
LB: loop body
LE: loop exit
PB: predicated region body
PF: predicated region fallthrough
CT: control target
= control target key end

     0   :  { %vm70_vm0 = vcmask 130048   ;;  %s249_s0 = inlined_call_operand.vmem [shape: f32[128,16], index: 0, kind: input, shape index: {}]   ;;  %s250_s1 = inlined_call_operand.vmem [shape: f32[1,16], index: 1, kind: input, shape index: {}]   ;;  %s251_s2 = inlined_call_operand.vmem [shape: f32[1,16], index: 2, kind: input, shape index: {}]   ;;  %s252_s3 = inlined_call_operand.vmem [shape: f32[128,16], index: 3, kind: output, shape index: {}]  }
   0x1   :  { %v14_v0 = vld [vmem:[%s249_s0] sm:$0xff]  ;;  %v15_v3 = vld [vmem:[%s249_s0 + $0x8] sm:$0xff]  ;;  %v16_v6 = vld [vmem:[%s249_s0 + $0x10] sm:$0xff] }
   0x2   :  { %v119_v1 = vld [vmem:[%s250_s1] ss:$0 sm:$0xff]  ;;  %v17_v7 = vld [vmem:[%s249_s0 + $0x18] sm:$0xff]  ;;  %v19_v12 = vld [vmem:[%s249_s0 + $0x28] sm:$0xff] }
   0x3   :  { %v92_v2 = vld [vmem:[%s251_s2] ss:$0 sm:$0xff]  ;;  %v34_v4 = vsub.f32 %v14_v0, %v119_v1  ;;  %v35_v5 = vsub.f32 %v15_v3, %v119_v1  ;;  %v36_v9 = vsub.f32 %v16_v6, %v119_v1  ;;  %v37_v10 = vsub.f32 %v17_v7, %v119_v1  ;;  %v20_v13 = vld [vmem:[%s249_s0 + $0x30] sm:$0xff]  ;;  %v21_v14 = vld [vmem:[%s249_s0 + $0x38] sm:$0xff] }
   0x4   :  { %v18_v8 = vld [vmem:[%s249_s0 + $0x20] sm:$0xff]  ;;  %v39_v17 = vsub.f32 %v19_v12, %v119_v1  ;;  %v40_v18 = vsub.f32 %v20_v13, %v119_v1  ;;  %v23_v20 = vld [vmem:[%s249_s0 + $0x48] sm:$0xff]  ;;  %v41_v23 = vsub.f32 %v21_v14, %v119_v1  ;;  %v24_v24 = vld [vmem:[%s249_s0 + $0x50] sm:$0xff] }
   0x5   :  { %v38_v11 = vsub.f32 %v18_v8, %v119_v1  ;;  %v54_v15 = vmul.f32 %v92_v2, %v34_v4  ;;  %v55_v16 = vmul.f32 %v92_v2, %v35_v5  ;;  %v22_v19 = vld [vmem:[%s249_s0 + $0x40] sm:$0xff]  ;;  %v56_v21 = vmul.f32 %v92_v2, %v36_v9  ;;  %v25_v27 = vld [vmem:[%s249_s0 + $0x58] sm:$0xff]  ;;  %v27_v33 = vld [vmem:[%s249_s0 + $0x68] sm:$0xff] }
   0x6   :  { %v57_v22 = vmul.f32 %v92_v2, %v37_v10  ;;  %v42_v26 = vsub.f32 %v22_v19, %v119_v1  ;;  %v59_v28 = vmul.f32 %v92_v2, %v39_v17  ;;  %v43_v29 = vsub.f32 %v23_v20, %v119_v1  ;;  %v26_v30 = vld [vmem:[%s249_s0 + $0x60] sm:$0xff]  ;;  %v28_v36 = vld [vmem:[%s249_s0 + $0x70] sm:$0xff]  ;;  %v29_v39 = vld [vmem:[%s249_s0 + $0x78] sm:$0xff] }
   0x7   :  { %71 = vst.msk [vmem:[%s252_s3] sm:$0xff] %vm70_vm0, %v54_v15  ;;  %v58_v25 = vmul.f32 %v92_v2, %v38_v11  ;;  %v60_v31 = vmul.f32 %v92_v2, %v40_v18  ;;  %v44_v32 = vsub.f32 %v24_v24, %v119_v1  ;;  %v61_v34 = vmul.f32 %v92_v2, %v41_v23 }
   0x8   :  { %72 = vst.msk [vmem:[%s252_s3 + $0x8] sm:$0xff] %vm70_vm0, %v55_v16  ;;  %v45_v35 = vsub.f32 %v25_v27, %v119_v1  ;;  %v62_v37 = vmul.f32 %v92_v2, %v42_v26  ;;  %v46_v38 = vsub.f32 %v26_v30, %v119_v1  ;;  %v63_v40 = vmul.f32 %v92_v2, %v43_v29 }
   0x9   :  { %73 = vst.msk [vmem:[%s252_s3 + $0x10] sm:$0xff] %vm70_vm0, %v56_v21  ;;  %v47_v41 = vsub.f32 %v27_v33, %v119_v1  ;;  %v64_v42 = vmul.f32 %v92_v2, %v44_v32  ;;  %v48_v43 = vsub.f32 %v28_v36, %v119_v1  ;;  %v49_v45 = vsub.f32 %v29_v39, %v119_v1 }
   0xa   :  { %74 = vst.msk [vmem:[%s252_s3 + $0x18] sm:$0xff] %vm70_vm0, %v57_v22  ;;  %v65_v44 = vmul.f32 %v92_v2, %v45_v35  ;;  %v66_v46 = vmul.f32 %v92_v2, %v46_v38 }
   0xb   :  { %75 = vst.msk [vmem:[%s252_s3 + $0x20] sm:$0xff] %vm70_vm0, %v58_v25  ;;  %v67_v47 = vmul.f32 %v92_v2, %v47_v41  ;;  %v68_v48 = vmul.f32 %v92_v2, %v48_v43  ;;  %v69_v49 = vmul.f32 %v92_v2, %v49_v45 }
   0xc   :  { %76 = vst.msk [vmem:[%s252_s3 + $0x28] sm:$0xff] %vm70_vm0, %v59_v28 }
   0xd   :  { %77 = vst.msk [vmem:[%s252_s3 + $0x30] sm:$0xff] %vm70_vm0, %v60_v31 }
   0xe   :  { %78 = vst.msk [vmem:[%s252_s3 + $0x38] sm:$0xff] %vm70_vm0, %v61_v34 }
   0xf   :  { %79 = vst.msk [vmem:[%s252_s3 + $0x40] sm:$0xff] %vm70_vm0, %v62_v37 }
  0x10   :  { %80 = vst.msk [vmem:[%s252_s3 + $0x48] sm:$0xff] %vm70_vm0, %v63_v40 }
  0x11   :  { %81 = vst.msk [vmem:[%s252_s3 + $0x50] sm:$0xff] %vm70_vm0, %v64_v42 }
  0x12   :  { %82 = vst.msk [vmem:[%s252_s3 + $0x58] sm:$0xff] %vm70_vm0, %v65_v44 }
  0x13   :  { %83 = vst.msk [vmem:[%s252_s3 + $0x60] sm:$0xff] %vm70_vm0, %v66_v46 }
  0x14   :  { %84 = vst.msk [vmem:[%s252_s3 + $0x68] sm:$0xff] %vm70_vm0, %v67_v47 }
  0x15   :  { %85 = vst.msk [vmem:[%s252_s3 + $0x70] sm:$0xff] %vm70_vm0, %v68_v48 }
  0x16   :  { %86 = vst.msk [vmem:[%s252_s3 + $0x78] sm:$0xff] %vm70_vm0, %v69_v49 }

// kernel: _lambda_.21
= control target key start
LH: loop header
LB: loop body
LE: loop exit
PB: predicated region body
PF: predicated region fallthrough
CT: control target
= control target key end

     0   :  { %vm34_vm0 = vcmask 261120   ;;  %s95_s0 = inlined_call_operand.vmem [shape: f32[32,32], index: 0, kind: input, shape index: {}]   ;;  %s96_s1 = inlined_call_operand.vmem [shape: f32[1,32], index: 1, kind: input, shape index: {}]   ;;  %s97_s2 = inlined_call_operand.vmem [shape: f32[1,32], index: 2, kind: input, shape index: {}]   ;;  %s98_s3 = inlined_call_operand.vmem [shape: f32[32,32], index: 3, kind: output, shape index: {}]  }
   0x1   :  { %v14_v0 = vld [vmem:[%s95_s0] sm:$0xff]  ;;  %v15_v3 = vld [vmem:[%s95_s0 + $0x8] sm:$0xff]  ;;  %v16_v6 = vld [vmem:[%s95_s0 + $0x10] sm:$0xff] }
   0x2   :  { %v43_v1 = vld [vmem:[%s96_s1] ss:$0 sm:$0xff]  ;;  %v17_v7 = vld [vmem:[%s95_s0 + $0x18] sm:$0xff] }
   0x3   :  { %v44_v2 = vld [vmem:[%s97_s2] ss:$0 sm:$0xff]  ;;  %v22_v4 = vsub.f32 %v14_v0, %v43_v1  ;;  %v23_v5 = vsub.f32 %v15_v3, %v43_v1  ;;  %v24_v8 = vsub.f32 %v16_v6, %v43_v1  ;;  %v25_v9 = vsub.f32 %v17_v7, %v43_v1 }
   0x5   :  { %v30_v10 = vmul.f32 %v44_v2, %v22_v4  ;;  %v31_v11 = vmul.f32 %v44_v2, %v23_v5  ;;  %v32_v12 = vmul.f32 %v44_v2, %v24_v8  ;;  %v33_v13 = vmul.f32 %v44_v2, %v25_v9 }
   0x7   :  { %35 = vst.msk [vmem:[%s98_s3] sm:$0xff] %vm34_vm0, %v30_v10 }
   0x8   :  { %36 = vst.msk [vmem:[%s98_s3 + $0x8] sm:$0xff] %vm34_vm0, %v31_v11 }
   0x9   :  { %37 = vst.msk [vmem:[%s98_s3 + $0x10] sm:$0xff] %vm34_vm0, %v32_v12 }
   0xa   :  { %38 = vst.msk [vmem:[%s98_s3 + $0x18] sm:$0xff] %vm34_vm0, %v33_v13 }

// kernel: _lambda_.20
= control target key start
LH: loop header
LB: loop body
LE: loop exit
PB: predicated region body
PF: predicated region fallthrough
CT: control target
= control target key end

     0   :  { %vm303_vm12 = vcmask 1040384   ;;  %s572_s1 = inlined_call_operand.vmem [shape: bf16[1,256,128], index: 1, kind: input, shape index: {}]   ;;  %s573_s0 = inlined_call_operand.vmem [shape: bf16[1,32,256], index: 0, kind: input, shape index: {}]   ;;  %s574_s2 = inlined_call_operand.vmem [shape: f32[1,128], index: 2, kind: input, shape index: {}]   ;;  %s575_s3 = inlined_call_operand.vmem [shape: f32[1,32,128], index: 3, kind: output, shape index: {0}]   ;;  %s576_s4 = inlined_call_operand.vmem [shape: f32[1,1,2,128], index: 4, kind: output, shape index: {1}]  }
   0x1   :  { %v385_v0 = vld [vmem:[%s572_s1 + $0x38] sm:$0xff]  ;;  %v384_v2 = vld [vmem:[%s572_s1 + $0x30] sm:$0xff]  ;;  %v383_v4 = vld [vmem:[%s572_s1 + $0x28] sm:$0xff] }
   0x2   :  { %v393_v1 = vld [vmem:[%s572_s1 + $0x78] sm:$0xff]  ;;  %216 = vmatpush.bf16.msra.mxu0 %v385_v0  ;;  %394 = vmatpush.bf16.msra.mxu2 %v385_v0  ;;  %v392_v3 = vld [vmem:[%s572_s1 + $0x70] sm:$0xff]  ;;  %v24_v5 = vld [vmem:[%s573_s0] sm:$0xff] }
   0x3   :  { %235 = vmatpush.bf16.msra.mxu1 %v393_v1  ;;  %402 = vmatpush.bf16.msra.mxu3 %v393_v1  ;;  %v25_v6 = vld [vmem:[%s573_s0 + $0x8] sm:$0xff]  ;;  %v26_v8 = vld [vmem:[%s573_s0 + $0x10] sm:$0xff]  ;;  %v27_v9 = vld [vmem:[%s573_s0 + $0x18] sm:$0xff]  ;;  %v28_v10 = vunpack.c.l.bf16 %v24_v5  ;;  %v29_v11 = vunpack.c.h.bf16 %v24_v5 }
   0x4   :  { %v391_v7 = vld [vmem:[%s572_s1 + $0x68] sm:$0xff]  ;;  %v30_v12 = vunpack.c.l.bf16 %v25_v6  ;;  %v31_v13 = vunpack.c.h.bf16 %v25_v6  ;;  %v382_v14 = vld [vmem:[%s572_s1 + $0x20] sm:$0xff]  ;;  %v32_v15 = vunpack.c.l.bf16 %v26_v8  ;;  %v33_v16 = vunpack.c.h.bf16 %v26_v8  ;;  %v381_v28 = vld [vmem:[%s572_s1 + $0x18] sm:$0xff] }
   0x5   :  { %v34_v17 = vunpack.c.l.bf16 %v27_v9  ;;  %v35_v18 = vunpack.c.h.bf16 %v27_v9  ;;  %v390_v19 = vld [vmem:[%s572_s1 + $0x60] sm:$0xff]  ;;  %vm472_vm0 = vcmp.gt.f32.partialorder %v28_v10, 0.0  ;;  %vm476_vm1 = vcmp.gt.f32.partialorder %v29_v11, 0.0  ;;  %v389_v33 = vld [vmem:[%s572_s1 + $0x58] sm:$0xff]  ;;  %v380_v39 = vld [vmem:[%s572_s1 + $0x10] sm:$0xff] }
   0x6   :  { %217 = vmatpush.bf16.msra.mxu0 %v384_v2  ;;  %395 = vmatpush.bf16.msra.mxu2 %v384_v2  ;;  %vm480_vm2 = vcmp.gt.f32.partialorder %v30_v12, 0.0  ;;  %vm484_vm3 = vcmp.gt.f32.partialorder %v31_v13, 0.0  ;;  %v44_v24 = vmul.f32 0.20019531, %v28_v10  ;;  %v45_v25 = vmul.f32 0.20019531, %v29_v11  ;;  %vm56_vm6 = vmpackc.low %vm476_vm1, %vm472_vm0  ;;  %v388_v43 = vld [vmem:[%s572_s1 + $0x50] sm:$0xff]  ;;  %v379_v45 = vld [vmem:[%s572_s1 + $0x8] sm:$0xff] }
   0x7   :  { %236 = vmatpush.bf16.msra.mxu1 %v392_v3  ;;  %403 = vmatpush.bf16.msra.mxu3 %v392_v3  ;;  %v46_v26 = vmul.f32 0.20019531, %v30_v12  ;;  %v47_v27 = vmul.f32 0.20019531, %v31_v13  ;;  %v48_v29 = vmul.f32 0.20019531, %v32_v15  ;;  %v49_v30 = vmul.f32 0.20019531, %v33_v16  ;;  %vm57_vm9 = vmpackc.low %vm484_vm3, %vm480_vm2  ;;  %v387_v49 = vld [vmem:[%s572_s1 + $0x48] sm:$0xff]  ;;  %v378_v54 = vld [vmem:[%s572_s1] sm:$0xff] }
   0x8   :  { %v50_v31 = vmul.f32 0.20019531, %v34_v17  ;;  %v51_v32 = vmul.f32 0.20019531, %v35_v18  ;;  %vm494_vm4 = vcmp.gt.f32.partialorder %v32_v15, 0.0  ;;  %vm498_vm5 = vcmp.gt.f32.partialorder %v33_v16, 0.0  ;;  %v386_v59 = vld [vmem:[%s572_s1 + $0x40] sm:$0xff] }
   0x9   :  { %vm506_vm7 = vcmp.gt.f32.partialorder %v34_v17, 0.0  ;;  %vm510_vm8 = vcmp.gt.f32.partialorder %v35_v18, 0.0  ;;  %v52_v38 = vpack.c.bf16 %v45_v25, %v44_v24  ;;  %v53_v40 = vpack.c.bf16 %v47_v27, %v46_v26  ;;  %vm58_vm10 = vmpackc.low %vm498_vm5, %vm494_vm4  ;;  %v410_v1 = vld [vmem:[%s574_s2] ss:$0 sm:$0xff] }
   0xa   :  { %218 = vmatpush.bf16.msra.mxu0 %v383_v4  ;;  %396 = vmatpush.bf16.msra.mxu2 %v383_v4  ;;  %v54_v41 = vpack.c.bf16 %v49_v30, %v48_v29  ;;  %v55_v42 = vpack.c.bf16 %v51_v32, %v50_v31  ;;  %vm59_vm11 = vmpackc.low %vm510_vm8, %vm506_vm7 }
   0xb   :  { %237 = vmatpush.bf16.msra.mxu1 %v391_v7  ;;  %404 = vmatpush.bf16.msra.mxu3 %v391_v7  ;;  %v60_v44 = vsel %vm56_vm6, %v24_v5, %v52_v38  ;;  %v61_v46 = vsel %vm57_vm9, %v25_v6, %v53_v40 }
   0xc   :  { %v62_v47 = vsel %vm58_vm10, %v26_v8, %v54_v41  ;;  %v63_v48 = vsel %vm59_vm11, %v27_v9, %v55_v42  ;;  %v104_v50 = vunpack.c.l.b16 %v60_v44  ;;  %v106_v51 = vunpack.c.l.b16 %v61_v46 }
   0xd   :  { %v108_v52 = vunpack.c.l.b16 %v62_v47  ;;  %v110_v53 = vunpack.c.l.b16 %v63_v48  ;;  %v105_v55 = vunpack.c.h.b16 %v60_v44  ;;  %v107_v56 = vunpack.c.h.b16 %v61_v46 }
   0xe   :  { %219 = vmatpush.bf16.msra.mxu0 %v382_v14  ;;  %397 = vmatpush.bf16.msra.mxu2 %v382_v14  ;;  %v109_v57 = vunpack.c.h.b16 %v62_v47  ;;  %v111_v58 = vunpack.c.h.b16 %v63_v48  ;;  %v112_v60 = vpack.c.b16 %v106_v51, %v104_v50 }
   0xf   :  { %238 = vmatpush.bf16.msra.mxu1 %v390_v19  ;;  %405 = vmatpush.bf16.msra.mxu3 %v390_v19  ;;  %v114_v61 = vpack.c.b16 %v110_v53, %v108_v52  ;;  %v113_v62 = vpack.c.b16 %v107_v56, %v105_v55 }
  0x10   :  { %v115_v63 = vpack.c.b16 %v111_v58, %v109_v57 }
  0x12   :  { %220 = vmatpush.bf16.msra.mxu0 %v381_v28  ;;  %398 = vmatpush.bf16.msra.mxu2 %v381_v28 }
  0x13   :  { %239 = vmatpush.bf16.msra.mxu1 %v389_v33  ;;  %406 = vmatpush.bf16.msra.mxu3 %v389_v33 }
  0x16   :  { %221 = vmatpush.bf16.msra.mxu0 %v380_v39  ;;  %399 = vmatpush.bf16.msra.mxu2 %v380_v39 }
  0x17   :  { %240 = vmatpush.bf16.msra.mxu1 %v388_v43  ;;  %407 = vmatpush.bf16.msra.mxu3 %v388_v43 }
  0x1a   :  { %222 = vmatpush.bf16.msra.mxu0 %v379_v45  ;;  %400 = vmatpush.bf16.msra.mxu2 %v379_v45 }
  0x1b   :  { %241 = vmatpush.bf16.msra.mxu1 %v387_v49  ;;  %408 = vmatpush.bf16.msra.mxu3 %v387_v49 }
  0x1e   :  { %223 = vmatpush.bf16.msra.mxu0 %v378_v54  ;;  %401 = vmatpush.bf16.msra.mxu2 %v378_v54 }
  0x1f   :  { %242 = vmatpush.bf16.msra.mxu1 %v386_v59  ;;  %409 = vmatpush.bf16.msra.mxu3 %v386_v59 }
  0x21   :  { %224 = vmatmul.bf16.vlgmr.msra.gmra.mxu0 %v112_v60  ;;  %229 = vmatmul.bf16.vlgmr.msra.gmra.mxu2 %v114_v61 }
  0x22   :  { %243 = vmatmul.bf16.vlgmr.msra.gmra.mxu1 %v113_v62  ;;  %248 = vmatmul.bf16.vlgmr.msra.gmra.mxu3 %v115_v63 }
  0x9e   :  { %v225_v0 = vpop.f32.mrf.mxu0 }
  0x9f   :  { %v244_v2 = vpop.f32.mrf.mxu1 }
  0xa0   :  { %v245_v3 = vadd.f32 %v244_v2, %v225_v0 }
  0xa2   :  { %v273_v4 = vadd.f32 %v410_v1, %v245_v3 }
  0xa4   :  { %277 = vst [vmem:[%s575_s3] sm:$0xff] %v273_v4  ;;  %v230_v5 = vpop.f32.mrf.mxu2  ;;  %v290_v13 = vmul.f32 %v273_v4, %v273_v4 }
  0xa5   :  { %v249_v6 = vpop.f32.mrf.mxu3 }
  0xa6   :  { %v250_v7 = vadd.f32 %v249_v6, %v230_v5  ;;  %v227_v8 = vpop.f32.mrf.mxu0 }
  0xa7   :  { %v246_v9 = vpop.f32.mrf.mxu1 }
  0xa8   :  { %v275_v10 = vadd.f32 %v410_v1, %v250_v7  ;;  %v247_v11 = vadd.f32 %v246_v9, %v227_v8 }
  0xaa   :  { %279 = vst [vmem:[%s575_s3 + $0x10] sm:$0xff] %v275_v10  ;;  %v274_v12 = vadd.f32 %v410_v1, %v247_v11  ;;  %v292_v20 = vmul.f32 %v275_v10, %v275_v10 }
  0xac   :  { %278 = vst [vmem:[%s575_s3 + $0x8] sm:$0xff] %v274_v12  ;;  %v281_v14 = vadd.f32 %v274_v12, %v273_v4  ;;  %v291_v15 = vmul.f32 %v274_v12, %v274_v12  ;;  %v232_v16 = vpop.f32.mrf.mxu2 }
  0xad   :  { %v251_v17 = vpop.f32.mrf.mxu3 }
  0xae   :  { %v294_v18 = vadd.f32 %v291_v15, %v290_v13  ;;  %v252_v19 = vadd.f32 %v251_v17, %v232_v16  ;;  %v282_v22 = vadd.f32 %v281_v14, %v275_v10 }
  0xb0   :  { %v276_v21 = vadd.f32 %v410_v1, %v252_v19  ;;  %v295_v25 = vadd.f32 %v294_v18, %v292_v20 }
  0xb2   :  { %280 = vst [vmem:[%s575_s3 + $0x18] sm:$0xff] %v276_v21  ;;  %v283_v23 = vadd.f32 %v282_v22, %v276_v21  ;;  %v293_v24 = vmul.f32 %v276_v21, %v276_v21 }
  0xb4   :  { %v284_v26 = vrot.slane %v283_v23, 4  ;;  %v296_v27 = vadd.f32 %v295_v25, %v293_v24 }
  0xb6   :  { %v285_v28 = vadd.f32 %v284_v26, %v283_v23  ;;  %v297_v29 = vrot.slane %v296_v27, 4 }
  0xb8   :  { %v286_v30 = vrot.slane %v285_v28, 2  ;;  %v298_v31 = vadd.f32 %v297_v29, %v296_v27 }
  0xba   :  { %v287_v32 = vadd.f32 %v286_v30, %v285_v28  ;;  %v299_v33 = vrot.slane %v298_v31, 2 }
  0xbc   :  { %v288_v34 = vrot.slane %v287_v32, 1  ;;  %v300_v35 = vadd.f32 %v299_v33, %v298_v31 }
  0xbe   :  { %v301_v36 = vrot.slane %v300_v35, 1  ;;  %v289_v37 = vadd.f32 %v288_v34, %v287_v32 }
  0xc0   :  { %v302_v38 = vadd.f32 %v301_v36, %v300_v35 }
  0xc2   :  { %v304_v39 = vsel %vm303_vm12, %v289_v37, %v302_v38 }
  0xc3   :  { %305 = vst [vmem:[%s576_s4] sm:$0x3] %v304_v39 }

// kernel: _lambda_.23
= control target key start
LH: loop header
LB: loop body
LE: loop exit
PB: predicated region body
PF: predicated region fallthrough
CT: control target
= control target key end

     0   :  { %vm25_vm0 = vcmask 523264   ;;  %s65_s0 = inlined_call_operand.vmem [shape: f32[8,64], index: 0, kind: input, shape index: {}]   ;;  %s66_s1 = inlined_call_operand.vmem [shape: f32[1,64], index: 1, kind: input, shape index: {}]   ;;  %s67_s2 = inlined_call_operand.vmem [shape: f32[1,64], index: 2, kind: input, shape index: {}]   ;;  %s68_s3 = inlined_call_operand.vmem [shape: f32[8,64], index: 3, kind: output, shape index: {}]  }
   0x1   :  { %v14_v0 = vld [vmem:[%s65_s0] sm:$0xff] }
   0x2   :  { %v31_v1 = vld [vmem:[%s66_s1] ss:$0 sm:$0xff] }
   0x3   :  { %v32_v2 = vld [vmem:[%s67_s2] ss:$0 sm:$0xff]  ;;  %v19_v3 = vsub.f32 %v14_v0, %v31_v1 }
   0x5   :  { %v24_v4 = vmul.f32 %v32_v2, %v19_v3 }
   0x7   :  { %26 = vst.msk [vmem:[%s68_s3] sm:$0xff] %vm25_vm0, %v24_v4 }

// kernel: _lambda_.22
= control target key start
LH: loop header
LB: loop body
LE: loop exit
PB: predicated region body
PF: predicated region fallthrough
CT: control target
= control target key end

     0   :  { %vm429_vm12 = vcmask 1040384   ;;  %s799_s1 = inlined_call_operand.vmem [shape: bf16[1,512,128], index: 1, kind: input, shape index: {}]   ;;  %s800_s0 = inlined_call_operand.vmem [shape: bf16[1,16,512], index: 0, kind: input, shape index: {}]   ;;  %s801_s2 = inlined_call_operand.vmem [shape: f32[1,128], index: 2, kind: input, shape index: {}]   ;;  %s802_s3 = inlined_call_operand.vmem [shape: f32[1,16,128], index: 3, kind: output, shape index: {0}]   ;;  %s803_s4 = inlined_call_operand.vmem [shape: f32[1,1,2,128], index: 4, kind: output, shape index: {1}]  }
   0x1   :  { %v575_v0 = vld [vmem:[%s799_s1 + $0x38] sm:$0xff]  ;;  %v574_v4 = vld [vmem:[%s799_s1 + $0x30] sm:$0xff]  ;;  %v573_v8 = vld [vmem:[%s799_s1 + $0x28] sm:$0xff] }
   0x2   :  { %v583_v1 = vld [vmem:[%s799_s1 + $0x78] sm:$0xff]  ;;  %340 = vmatpush.bf16.msra.mxu0 %v575_v0  ;;  %v582_v5 = vld [vmem:[%s799_s1 + $0x70] sm:$0xff]  ;;  %v581_v9 = vld [vmem:[%s799_s1 + $0x68] sm:$0xff] }
   0x3   :  { %v591_v2 = vld [vmem:[%s799_s1 + $0xb8] sm:$0xff]  ;;  %354 = vmatpush.bf16.msra.mxu1 %v583_v1  ;;  %v590_v6 = vld [vmem:[%s799_s1 + $0xb0] sm:$0xff]  ;;  %v589_v10 = vld [vmem:[%s799_s1 + $0xa8] sm:$0xff] }
   0x4   :  { %v599_v3 = vld [vmem:[%s799_s1 + $0xf8] sm:$0xff]  ;;  %368 = vmatpush.bf16.msra.mxu2 %v591_v2  ;;  %v598_v7 = vld [vmem:[%s799_s1 + $0xf0] sm:$0xff]  ;;  %v597_v11 = vld [vmem:[%s799_s1 + $0xe8] sm:$0xff] }
   0x5   :  { %382 = vmatpush.bf16.msra.mxu3 %v599_v3  ;;  %v572_v12 = vld [vmem:[%s799_s1 + $0x20] sm:$0xff]  ;;  %v24_v17 = vld [vmem:[%s800_s0 + $0x10] sm:$0xff]  ;;  %v23_v20 = vld [vmem:[%s800_s0 + $0x8] sm:$0xff] }
   0x6   :  { %341 = vmatpush.bf16.msra.mxu0 %v574_v4  ;;  %v580_v13 = vld [vmem:[%s799_s1 + $0x60] sm:$0xff]  ;;  %v30_v21 = vunpack.c.l.bf16 %v24_v17  ;;  %v31_v22 = vunpack.c.h.bf16 %v24_v17  ;;  %v25_v23 = vld [vmem:[%s800_s0 + $0x18] sm:$0xff]  ;;  %v28_v24 = vunpack.c.l.bf16 %v23_v20  ;;  %v29_v25 = vunpack.c.h.bf16 %v23_v20  ;;  %v570_v47 = vld [vmem:[%s799_s1 + $0x10] sm:$0xff] }
   0x7   :  { %355 = vmatpush.bf16.msra.mxu1 %v582_v5  ;;  %v588_v14 = vld [vmem:[%s799_s1 + $0xa0] sm:$0xff]  ;;  %v571_v28 = vld [vmem:[%s799_s1 + $0x18] sm:$0xff]  ;;  %v32_v38 = vunpack.c.l.bf16 %v25_v23  ;;  %v33_v39 = vunpack.c.h.bf16 %v25_v23  ;;  %v578_v48 = vld [vmem:[%s799_s1 + $0x50] sm:$0xff] }
   0x8   :  { %369 = vmatpush.bf16.msra.mxu2 %v590_v6  ;;  %v22_v15 = vld [vmem:[%s800_s0] sm:$0xff]  ;;  %v579_v29 = vld [vmem:[%s799_s1 + $0x58] sm:$0xff]  ;;  %v46_v32 = vmul.f32 0.20019531, %v30_v21  ;;  %v47_v33 = vmul.f32 0.20019531, %v31_v22  ;;  %vm706_vm2 = vcmp.gt.f32.partialorder %v30_v21, 0.0  ;;  %vm710_vm3 = vcmp.gt.f32.partialorder %v31_v22, 0.0 }
   0x9   :  { %383 = vmatpush.bf16.msra.mxu3 %v598_v7  ;;  %v596_v16 = vld [vmem:[%s799_s1 + $0xe0] sm:$0xff]  ;;  %v26_v18 = vunpack.c.l.bf16 %v22_v15  ;;  %v27_v19 = vunpack.c.h.bf16 %v22_v15  ;;  %v587_v34 = vld [vmem:[%s799_s1 + $0x98] sm:$0xff]  ;;  %vm714_vm4 = vcmp.gt.f32.partialorder %v28_v24, 0.0  ;;  %vm718_vm5 = vcmp.gt.f32.partialorder %v29_v25, 0.0  ;;  %vm56_vm9 = vmpackc.low %vm710_vm3, %vm706_vm2 }
   0xa   :  { %342 = vmatpush.bf16.msra.mxu0 %v573_v8  ;;  %v595_v35 = vld [vmem:[%s799_s1 + $0xd8] sm:$0xff]  ;;  %v44_v42 = vmul.f32 0.20019531, %v28_v24  ;;  %v45_v43 = vmul.f32 0.20019531, %v29_v25  ;;  %vm726_vm7 = vcmp.gt.f32.partialorder %v32_v38, 0.0  ;;  %vm730_vm8 = vcmp.gt.f32.partialorder %v33_v39, 0.0  ;;  %v586_v52 = vld [vmem:[%s799_s1 + $0x90] sm:$0xff]  ;;  %vm55_vm10 = vmpackc.low %vm718_vm5, %vm714_vm4 }
   0xb   :  { %356 = vmatpush.bf16.msra.mxu1 %v581_v9  ;;  %vm686_vm0 = vcmp.gt.f32.partialorder %v26_v18, 0.0  ;;  %vm690_vm1 = vcmp.gt.f32.partialorder %v27_v19, 0.0  ;;  %v42_v30 = vmul.f32 0.20019531, %v26_v18  ;;  %v43_v31 = vmul.f32 0.20019531, %v27_v19  ;;  %v594_v53 = vld [vmem:[%s799_s1 + $0xd0] sm:$0xff]  ;;  %vm57_vm11 = vmpackc.low %vm730_vm8, %vm726_vm7  ;;  %v569_v56 = vld [vmem:[%s799_s1 + $0x8] sm:$0xff] }
   0xc   :  { %370 = vmatpush.bf16.msra.mxu2 %v589_v10  ;;  %vm54_vm6 = vmpackc.low %vm690_vm1, %vm686_vm0  ;;  %v48_v46 = vmul.f32 0.20019531, %v32_v38  ;;  %v52_v50 = vpack.c.bf16 %v47_v33, %v46_v32  ;;  %v49_v51 = vmul.f32 0.20019531, %v33_v39  ;;  %v51_v54 = vpack.c.bf16 %v45_v43, %v44_v42  ;;  %v577_v57 = vld [vmem:[%s799_s1 + $0x48] sm:$0xff]  ;;  %v568_v4 = vld [vmem:[%s799_s1] sm:$0xff] }
   0xd   :  { %384 = vmatpush.bf16.msra.mxu3 %v597_v11  ;;  %v50_v49 = vpack.c.bf16 %v43_v31, %v42_v30  ;;  %v585_v60 = vld [vmem:[%s799_s1 + $0x88] sm:$0xff]  ;;  %v576_v5 = vld [vmem:[%s799_s1 + $0x40] sm:$0xff] }
   0xe   :  { %343 = vmatpush.bf16.msra.mxu0 %v572_v12  ;;  %v53_v55 = vpack.c.bf16 %v49_v51, %v48_v46  ;;  %v60_v59 = vsel %vm56_vm9, %v24_v17, %v52_v50  ;;  %v593_v61 = vld [vmem:[%s799_s1 + $0xc8] sm:$0xff]  ;;  %v59_v62 = vsel %vm55_vm10, %v23_v20, %v51_v54  ;;  %v584_v10 = vld [vmem:[%s799_s1 + $0x80] sm:$0xff] }
   0xf   :  { %357 = vmatpush.bf16.msra.mxu1 %v580_v13  ;;  %v58_v58 = vsel %vm54_vm6, %v22_v15, %v50_v49  ;;  %v136_v1 = vunpack.c.l.b16 %v60_v59  ;;  %v137_v3 = vunpack.c.h.b16 %v60_v59  ;;  %v134_v6 = vunpack.c.l.b16 %v59_v62  ;;  %v592_v11 = vld [vmem:[%s799_s1 + $0xc0] sm:$0xff] }
  0x10   :  { %371 = vmatpush.bf16.msra.mxu2 %v588_v14  ;;  %v61_v63 = vsel %vm57_vm11, %v25_v23, %v53_v55  ;;  %v132_v0 = vunpack.c.l.b16 %v58_v58  ;;  %v133_v2 = vunpack.c.h.b16 %v58_v58  ;;  %v135_v8 = vunpack.c.h.b16 %v59_v62  ;;  %v600_v22 = vld [vmem:[%s801_s2] ss:$0 sm:$0xff] }
  0x11   :  { %385 = vmatpush.bf16.msra.mxu3 %v596_v16  ;;  %v138_v7 = vunpack.c.l.b16 %v61_v63  ;;  %v139_v9 = vunpack.c.h.b16 %v61_v63 }
  0x12   :  { %344 = vmatpush.bf16.msra.mxu0 %v571_v28  ;;  %v140_v12 = vpack.c.b16 %v136_v1, %v132_v0  ;;  %v141_v13 = vpack.c.b16 %v137_v3, %v133_v2 }
  0x13   :  { %358 = vmatpush.bf16.msra.mxu1 %v579_v29  ;;  %v142_v14 = vpack.c.b16 %v138_v7, %v134_v6  ;;  %v143_v15 = vpack.c.b16 %v139_v9, %v135_v8 }
  0x14   :  { %372 = vmatpush.bf16.msra.mxu2 %v587_v34 }
  0x15   :  { %386 = vmatpush.bf16.msra.mxu3 %v595_v35 }
  0x16   :  { %345 = vmatpush.bf16.msra.mxu0 %v570_v47 }
  0x17   :  { %359 = vmatpush.bf16.msra.mxu1 %v578_v48 }
  0x18   :  { %373 = vmatpush.bf16.msra.mxu2 %v586_v52 }
  0x19   :  { %387 = vmatpush.bf16.msra.mxu3 %v594_v53 }
  0x1a   :  { %346 = vmatpush.bf16.msra.mxu0 %v569_v56 }
  0x1b   :  { %360 = vmatpush.bf16.msra.mxu1 %v577_v57 }
  0x1c   :  { %374 = vmatpush.bf16.msra.mxu2 %v585_v60 }
  0x1d   :  { %388 = vmatpush.bf16.msra.mxu3 %v593_v61 }
  0x1e   :  { %347 = vmatpush.bf16.msra.mxu0 %v568_v4 }
  0x1f   :  { %361 = vmatpush.bf16.msra.mxu1 %v576_v5 }
  0x20   :  { %375 = vmatpush.bf16.msra.mxu2 %v584_v10 }
  0x21   :  { %389 = vmatpush.bf16.msra.mxu3 %v592_v11  ;;  %348 = vmatmul.bf16.vlgmr.msra.gmra.mxu0 %v140_v12 }
  0x22   :  { %362 = vmatmul.bf16.vlgmr.msra.gmra.mxu1 %v141_v13 }
  0x23   :  { %376 = vmatmul.bf16.vlgmr.msra.gmra.mxu2 %v142_v14 }
  0x24   :  { %390 = vmatmul.bf16.vlgmr.msra.gmra.mxu3 %v143_v15 }
  0x9e   :  { %v349_v16 = vpop.f32.mrf.mxu0 }
  0x9f   :  { %v363_v17 = vpop.f32.mrf.mxu1 }
  0xa0   :  { %v364_v18 = vadd.f32 %v363_v17, %v349_v16 }
  0xa6   :  { %v377_v19 = vpop.f32.mrf.mxu2  ;;  %v351_v24 = vpop.f32.mrf.mxu0 }
  0xa7   :  { %v391_v20 = vpop.f32.mrf.mxu3  ;;  %v378_v21 = vadd.f32 %v377_v19, %v364_v18  ;;  %v365_v25 = vpop.f32.mrf.mxu1 }
  0xa8   :  { %v366_v27 = vadd.f32 %v365_v25, %v351_v24 }
  0xa9   :  { %v392_v23 = vadd.f32 %v391_v20, %v378_v21 }
  0xab   :  { %v409_v26 = vadd.f32 %v600_v22, %v392_v23 }
  0xad   :  { %411 = vst [vmem:[%s802_s3] sm:$0xff] %v409_v26  ;;  %v420_v33 = vmul.f32 %v409_v26, %v409_v26 }
  0xae   :  { %v379_v28 = vpop.f32.mrf.mxu2 }
  0xaf   :  { %v380_v29 = vadd.f32 %v379_v28, %v366_v27  ;;  %v393_v30 = vpop.f32.mrf.mxu3 }
  0xb1   :  { %v394_v31 = vadd.f32 %v393_v30, %v380_v29 }
  0xb3   :  { %v410_v32 = vadd.f32 %v600_v22, %v394_v31 }
  0xb5   :  { %412 = vst [vmem:[%s802_s3 + $0x8] sm:$0xff] %v410_v32  ;;  %v413_v34 = vadd.f32 %v410_v32, %v409_v26  ;;  %v421_v35 = vmul.f32 %v410_v32, %v410_v32 }
  0xb7   :  { %v414_v36 = vrot.slane %v413_v34, 4  ;;  %v422_v37 = vadd.f32 %v421_v35, %v420_v33 }
  0xb9   :  { %v415_v38 = vadd.f32 %v414_v36, %v413_v34  ;;  %v423_v39 = vrot.slane %v422_v37, 4 }
  0xbb   :  { %v416_v40 = vrot.slane %v415_v38, 2  ;;  %v424_v41 = vadd.f32 %v423_v39, %v422_v37 }
  0xbd   :  { %v417_v42 = vadd.f32 %v416_v40, %v415_v38  ;;  %v425_v43 = vrot.slane %v424_v41, 2 }
  0xbf   :  { %v418_v44 = vrot.slane %v417_v42, 1  ;;  %v426_v45 = vadd.f32 %v425_v43, %v424_v41 }
  0xc1   :  { %v427_v46 = vrot.slane %v426_v45, 1  ;;  %v419_v47 = vadd.f32 %v418_v44, %v417_v42 }
  0xc3   :  { %v428_v48 = vadd.f32 %v427_v46, %v426_v45 }
  0xc5   :  { %v430_v49 = vsel %vm429_vm12, %v419_v47, %v428_v48 }
  0xc6   :  { %431 = vst [vmem:[%s803_s4] sm:$0x3] %v430_v49 }

// kernel: _lambda_.25
= control target key start
LH: loop header
LB: loop body
LE: loop exit
PB: predicated region body
PF: predicated region fallthrough
CT: control target
= control target key end

     0   :  { %s856_s15 = smov 0   ;;  %s858_s16 = smov 0   ;;  %s925_s0 = inlined_call_operand.vmem [shape: bf16[4,16,256], index: 0, kind: input, shape index: {}]   ;;  %s926_s1 = inlined_call_operand.vmem [shape: bf16[4,256,128], index: 1, kind: input, shape index: {}]   ;;  %s927_s2 = inlined_call_operand.vmem [shape: f32[1,128], index: 2, kind: input, shape index: {}]   ;;  %s928_s3 = inlined_call_operand.vmem [shape: f32[4,16,128], index: 3, kind: output, shape index: {0}]   ;;  %s929_s4 = inlined_call_operand.vmem [shape: f32[4,1,2,128], index: 4, kind: output, shape index: {1}]  }
   0x1   :  { %s860_s17 = smov 0  }
   0x2 LB: > { %s34_s18 = sadd.s32 1, %s825_s16  ;;  %p689_p0 = scmp.ge.s32.totalorder %s829_s17, 1  ;;  %s829_s17 = sphi %s860_s17, %s15_s17   ;;  %s825_s16 = sphi %s858_s16, %s931_s16   ;;  %s821_s15 = sphi %s856_s15, %s930_s15  }
   0x3   : > { %p36_p1 = scmp.ge.s32.totalorder %s34_s18, 4  ;;  %p220_p2 = scmp.lt.s32.totalorder %s829_s17, 5 }
   0x5   : > { %s933_s18 = smov (%p36_p1, %s34_s18), 0  ;;  %p221_p3 = pnand %p689_p0, %p220_p2 }
   0x6   : > { %p277_p4 = scmp.lt.s32.totalorder (!%p221_p3), %s821_s15, 3 }
   0x7   : > { %224 = sbr.rel (%p221_p3) target bundleno = 204 (0xcc), region = 32 }
   0xc   : > { %s935_s15 = smov (!%p277_p4, %s821_s15), 3  ;;  %v806_v28 = vld [vmem:[%s927_s2] ss:$0 sm:$0xff]  ;;  %vm527_vm0 = vcmask 1040384  }
   0xd   : > { %s764_s19 = sshll.u32 %s935_s15, 7  ;;  %s763_s23 = sshll.u32 %s935_s15, 4 }
   0xe   : > { %s880_s22 = scalar_lea.vmem %s926_s1, %s764_s19  ;;  %s288_s26 = scalar_lea.vmem %s925_s0, %s763_s23 }
   0xf   : > { %v773_v0 = vld [vmem:[%s880_s22 + $0x38] sm:$0xff]  ;;  %v772_v2 = vld [vmem:[%s880_s22 + $0x30] sm:$0xff]  ;;  %v771_v4 = vld [vmem:[%s880_s22 + $0x28] sm:$0xff]  ;;  %s309_s5 = scalar_lea.vmem %s928_s3, %s763_s23  ;;  %s696_s6 = sshll.u32 %s935_s15, 1 }
  0x10   : > { %v781_v1 = vld [vmem:[%s880_s22 + $0x78] sm:$0xff]  ;;  %466 = vmatpush.bf16.msra.mxu0 %v773_v0  ;;  %v780_v3 = vld [vmem:[%s880_s22 + $0x70] sm:$0xff]  ;;  %v779_v5 = vld [vmem:[%s880_s22 + $0x68] sm:$0xff]  ;;  %s317_s9 = scalar_lea.vmem %s929_s4, %s696_s6 }
  0x11   : > { %480 = vmatpush.bf16.msra.mxu1 %v781_v1  ;;  %v770_v6 = vld [vmem:[%s880_s22 + $0x20] sm:$0xff]  ;;  %v769_v8 = vld [vmem:[%s880_s22 + $0x18] sm:$0xff]  ;;  %v768_v10 = vld [vmem:[%s880_s22 + $0x10] sm:$0xff] }
  0x12   : > { %v778_v7 = vld [vmem:[%s880_s22 + $0x60] sm:$0xff]  ;;  %v777_v9 = vld [vmem:[%s880_s22 + $0x58] sm:$0xff]  ;;  %v776_v11 = vld [vmem:[%s880_s22 + $0x50] sm:$0xff] }
  0x13   : > { %v324_v12 = vld [vmem:[%s288_s26] sm:$0xff]  ;;  %v325_v13 = vld [vmem:[%s288_s26 + $0x8] sm:$0xff] }
  0x14   : > { %467 = vmatpush.bf16.msra.mxu0 %v772_v2  ;;  %v326_v14 = vunpack.c.l.bf16 %v324_v12  ;;  %v328_v15 = vunpack.c.l.bf16 %v325_v13  ;;  %v327_v16 = vunpack.c.h.bf16 %v324_v12  ;;  %v329_v17 = vunpack.c.h.bf16 %v325_v13  ;;  %v767_v18 = vld [vmem:[%s880_s22 + $0x8] sm:$0xff]  ;;  %v766_v24 = vld [vmem:[%s880_s22] sm:$0xff] }
  0x15   : > { %481 = vmatpush.bf16.msra.mxu1 %v780_v3  ;;  %v775_v19 = vld [vmem:[%s880_s22 + $0x48] sm:$0xff]  ;;  %v774_v25 = vld [vmem:[%s880_s22 + $0x40] sm:$0xff] }
  0x16   : > { %v330_v20 = vmax.f32 %v326_v14, 0.0  ;;  %v332_v21 = vmax.f32 %v328_v15, 0.0  ;;  %v331_v22 = vmax.f32 %v327_v16, 0.0  ;;  %v333_v23 = vmax.f32 %v329_v17, 0.0 }
  0x18   : > { %468 = vmatpush.bf16.msra.mxu0 %v771_v4  ;;  %v334_v26 = vpack.c.bf16 %v332_v21, %v330_v20  ;;  %v335_v27 = vpack.c.bf16 %v333_v23, %v331_v22 }
  0x19   : > { %482 = vmatpush.bf16.msra.mxu1 %v779_v5 }
  0x1c   : > { %469 = vmatpush.bf16.msra.mxu0 %v770_v6 }
  0x1d   : > { %483 = vmatpush.bf16.msra.mxu1 %v778_v7 }
  0x20   : > { %470 = vmatpush.bf16.msra.mxu0 %v769_v8 }
  0x21   : > { %484 = vmatpush.bf16.msra.mxu1 %v777_v9 }
  0x24   : > { %471 = vmatpush.bf16.msra.mxu0 %v768_v10 }
  0x25   : > { %485 = vmatpush.bf16.msra.mxu1 %v776_v11 }
  0x28   : > { %472 = vmatpush.bf16.msra.mxu0 %v767_v18 }
  0x29   : > { %486 = vmatpush.bf16.msra.mxu1 %v775_v19 }
  0x2c   : > { %473 = vmatpush.bf16.msra.mxu0 %v766_v24 }
  0x2d   : > { %487 = vmatpush.bf16.msra.mxu1 %v774_v25 }
  0x2f   : > { %474 = vmatmul.bf16.vlgmr.msra.gmra.mxu0 %v334_v26 }
  0x30   : > { %488 = vmatmul.bf16.vlgmr.msra.gmra.mxu1 %v335_v27 }
  0xac   : > { %v475_v29 = vpop.f32.mrf.mxu0 }
  0xad   : > { %v489_v30 = vpop.f32.mrf.mxu1 }
  0xae   : > { %v490_v31 = vadd.f32 %v489_v30, %v475_v29 }
  0xb0   : > { %v507_v32 = vadd.f32 %v806_v28, %v490_v31 }
  0xb2   : > { %509 = vst [vmem:[%s309_s5] sm:$0xff] %v507_v32  ;;  %v518_v37 = vmul.f32 %v507_v32, %v507_v32 }
  0xb4   : > { %v477_v33 = vpop.f32.mrf.mxu0 }
  0xb5   : > { %v491_v34 = vpop.f32.mrf.mxu1 }
  0xb6   : > { %v492_v35 = vadd.f32 %v491_v34, %v477_v33 }
  0xb8   : > { %v508_v36 = vadd.f32 %v806_v28, %v492_v35 }
  0xba   : > { %510 = vst [vmem:[%s309_s5 + $0x8] sm:$0xff] %v508_v36  ;;  %v511_v38 = vadd.f32 %v508_v36, %v507_v32  ;;  %v519_v39 = vmul.f32 %v508_v36, %v508_v36 }
  0xbc   : > { %v512_v40 = vrot.slane %v511_v38, 4  ;;  %v520_v41 = vadd.f32 %v519_v39, %v518_v37 }
  0xbe   : > { %v513_v42 = vadd.f32 %v512_v40, %v511_v38  ;;  %v521_v43 = vrot.slane %v520_v41, 4 }
  0xc0   : > { %v514_v44 = vrot.slane %v513_v42, 2  ;;  %v522_v45 = vadd.f32 %v521_v43, %v520_v41 }
  0xc2   : > { %v515_v46 = vadd.f32 %v514_v44, %v513_v42  ;;  %v523_v47 = vrot.slane %v522_v45, 2 }
  0xc4   : > { %v516_v48 = vrot.slane %v515_v46, 1  ;;  %v524_v49 = vadd.f32 %v523_v47, %v522_v45 }
  0xc6   : > { %v525_v50 = vrot.slane %v524_v49, 1  ;;  %v517_v51 = vadd.f32 %v516_v48, %v515_v46 }
  0xc8   : > { %v526_v52 = vadd.f32 %v525_v50, %v524_v49 }
  0xca   : > { %v528_v53 = vsel %vm527_vm0, %v517_v51, %v526_v52 }
  0xcb   : > { %529 = vst [vmem:[%s317_s9] sm:$0x3] %v528_v53 }
  0xcc PF: > { %s15_s17 = sadd.s32 1, %s829_s17   ;;  %s930_s15 = smov %s825_s16 }
  0xcd   : > { %p12_p5 = scmp.ge.s32.totalorder %s15_s17, 6   ;;  %s931_s16 = smov %s933_s18 }
  0xcf   :  { %14 = sbr.rel (!%p12_p5) target bundleno = 2 (0x2), region = 85 }

// kernel: _lambda_.24
= control target key start
LH: loop header
LB: loop body
LE: loop exit
PB: predicated region body
PF: predicated region fallthrough
CT: control target
= control target key end

     0   :  { %s1062_s12 = smov 0   ;;  %s1064_s13 = smov 0   ;;  %s1231_s0 = inlined_call_operand.vmem [shape: bf16[1,16,1024], index: 0, kind: input, shape index: {}]   ;;  %s1232_s1 = inlined_call_operand.vmem [shape: bf16[1,1024,128], index: 1, kind: input, shape index: {}]   ;;  %s1233_s2 = inlined_call_operand.vmem [shape: f32[1,128], index: 2, kind: input, shape index: {}]   ;;  %s1234_s3 = inlined_call_operand.vmem [shape: f32[1,16,128], index: 3, kind: output, shape index: {}]  }
   0x1   :  { %s1066_s14 = smov 0   ;;  %s1068_s15 = smov 0  }
   0x2   :  { %s1070_s16 = smov 0  }
   0x3 LB: > { %s25_s17 = sadd.s32 1, %s1035_s15  ;;  %p50_p1 = scmp.ne.s32.totalorder %s1027_s13, %s1023_s12  ;;  %s1039_s16 = sphi %s1070_s16, %s13_s16   ;;  %s1035_s15 = sphi %s1068_s15, %s1254_s15   ;;  %s1031_s14 = sphi %s1066_s14, %s1253_s14   ;;  %s1027_s13 = sphi %s1064_s13, %s1252_s13   ;;  %s1023_s12 = sphi %s1062_s12, %s1251_s12  }
   0x4   : > { %p26_p0 = scmp.ge.s32.totalorder %s25_s17, 2  ;;  %p51_p2 = scmp.eq.s32.totalorder %s1039_s16, 0 }
   0x5   : > { %s43_s19 = sadd.s32 1, %s1027_s13  ;;  %p784_p5 = scmp.ge.s32.totalorder %s1039_s16, 2 }
   0x6   : > { %s1256_s17 = smov (%p26_p0, %s25_s17), 0  ;;  %p52_p3 = por %p51_p2, %p50_p1 }
   0x7   : > { %s39_s18 = ssub.s32 %s1035_s15, %s1256_s17  ;;  %156 = sbr.rel (%p784_p5) target bundleno = 20 (0x14), region = 20 }
   0x8   : > { %p41_p4 = scmp.eq.s32.totalorder %s39_s18, 0 }
   0xa   : > { %s1097_s20 = scalar_select %p41_p4, %s1027_s13, %s43_s19  }
   0xc   : > { %159 = sbr.rel (!%p52_p3) target bundleno = 20 (0x14), region = 24  ;;  %s161_s21 = sand.u32 (%p52_p3), 1, %s1027_s13  }
   0xd   : > { %s926_s22 = sshll.u32 (%p52_p3), %s1035_s15, 4  ;;  %s785_s23 = sshll.u32 (%p52_p3), %s161_s21, 5 }
   0xe   : > { %s171_s26 = scalar_lea.vmem (%p52_p3), %s1231_s0, %s926_s22  ;;  %s163_s27 = scalar_lea.vmem (%p52_p3), [#allocation3], %s785_s23 }
   0xf   : > { %v184_v0 = vld [vmem:[%s171_s26] sm:$0xff] (%p52_p3)  ;;  %v186_v1 = vld [vmem:[%s171_s26 + $0x8] sm:$0xff] (%p52_p3) }
  0x10   : > { %v188_v2 = vld [vmem:[%s171_s26 + $0x20] sm:$0xff] (%p52_p3)  ;;  %185 = vst [vmem:[%s163_s27] sm:$0xff] (%p52_p3), %v184_v0  ;;  %v190_v3 = vld [vmem:[%s171_s26 + $0x28] sm:$0xff] (%p52_p3) }
  0x11   : > { %187 = vst [vmem:[%s163_s27 + $0x8] sm:$0xff] %v186_v1 }
  0x12   : > { %189 = vst [vmem:[%s163_s27 + $0x10] sm:$0xff] %v188_v2 }
  0x13   : > { %191 = vst [vmem:[%s163_s27 + $0x18] sm:$0xff] %v190_v3 }
  0x14 PF: > { %p788_p6 = scmp.ge.s32.totalorder %s1039_s16, 1  ;;  %p209_p7 = scmp.lt.s32.totalorder %s1039_s16, 3 }
  0x16   : > { %p210_p8 = pnand %p788_p6, %p209_p7 }
  0x17   : > { %s216_s28 = sand.u32 (!%p210_p8), 1, %s1023_s12   ;;  %s790_s29 = sshll.u32 (!%p210_p8), %s1031_s14, 6 }
  0x18   : > { %213 = sbr.rel (%p210_p8) target bundleno = 228 (0xe4), region = 51  ;;  %s789_s30 = sshll.u32 (!%p210_p8), %s216_s28, 5 }
  0x19   : > { %p257_p9 = scmp.lt.s32.totalorder (!%p210_p8), %s790_s29, 127  ;;  %s1114_s8 = scalar_lea.vmem (!%p210_p8), [#allocation3], %s789_s30 }
  0x1a   : > { %p792_p10 = scmp.ne.s32.totalorder (!%p210_p8), %s1031_s14, 0 }
  0x1d   : > { %s1258_s29 = smov (!%p257_p9, %s790_s29), 127  ;;  %277 = sbr.rel (%p792_p10) target bundleno = 37 (0x25), region = 59 }
  0x1e   : > { %s791_s4 = sshll.u32 %s1258_s29, 2 }
  0x1f   : > { %s1112_s7 = scalar_lea.vmem %s1232_s1, %s791_s4 }
  0x22   : > { %v1041_v4 = vmov 0.0  }
  0x23   : > { %278 = vst [vmem:[#allocation2] sm:$0xff] %v1041_v4 }
  0x24   : > { %279 = vst [vmem:[#allocation2 + $0x8] sm:$0xff] %v1041_v4 }
  0x25 PF: > { %v934_v5 = vld [vmem:[%s1112_s7 + $0x38] sm:$0xff]  ;;  %v933_v9 = vld [vmem:[%s1112_s7 + $0x30] sm:$0xff]  ;;  %v932_v13 = vld [vmem:[%s1112_s7 + $0x28] sm:$0xff]  ;;  %p921_p11 = scmp.ne.s32.totalorder %s1031_s14, 1 }
  0x26   : > { %v942_v6 = vld [vmem:[%s1112_s7 + $0x78] sm:$0xff]  ;;  %598 = vmatpush.bf16.msra.mxu0 %v934_v5  ;;  %v941_v10 = vld [vmem:[%s1112_s7 + $0x70] sm:$0xff]  ;;  %v940_v14 = vld [vmem:[%s1112_s7 + $0x68] sm:$0xff] }
  0x27   : > { %v950_v7 = vld [vmem:[%s1112_s7 + $0xb8] sm:$0xff]  ;;  %612 = vmatpush.bf16.msra.mxu1 %v942_v6  ;;  %v949_v11 = vld [vmem:[%s1112_s7 + $0xb0] sm:$0xff]  ;;  %v948_v15 = vld [vmem:[%s1112_s7 + $0xa8] sm:$0xff] }
  0x28   : > { %v958_v8 = vld [vmem:[%s1112_s7 + $0xf8] sm:$0xff]  ;;  %626 = vmatpush.bf16.msra.mxu2 %v950_v7  ;;  %v957_v12 = vld [vmem:[%s1112_s7 + $0xf0] sm:$0xff]  ;;  %v956_v16 = vld [vmem:[%s1112_s7 + $0xe8] sm:$0xff] }
  0x29   : > { %640 = vmatpush.bf16.msra.mxu3 %v958_v8  ;;  %v931_v17 = vld [vmem:[%s1112_s7 + $0x20] sm:$0xff]  ;;  %v280_v20 = vld [vmem:[%s1114_s8] sm:$0xff]  ;;  %v281_v25 = vld [vmem:[%s1114_s8 + $0x8] sm:$0xff] }
  0x2a   : > { %599 = vmatpush.bf16.msra.mxu0 %v933_v9  ;;  %v939_v18 = vld [vmem:[%s1112_s7 + $0x60] sm:$0xff]  ;;  %v284_v23 = vunpack.c.l.bf16 %v280_v20  ;;  %v285_v24 = vunpack.c.h.bf16 %v280_v20  ;;  %v283_v28 = vld [vmem:[%s1114_s8 + $0x18] sm:$0xff]  ;;  %v286_v29 = vunpack.c.l.bf16 %v281_v25  ;;  %v287_v30 = vunpack.c.h.bf16 %v281_v25  ;;  %v930_v33 = vld [vmem:[%s1112_s7 + $0x18] sm:$0xff] }
  0x2b   : > { %613 = vmatpush.bf16.msra.mxu1 %v941_v10  ;;  %v947_v19 = vld [vmem:[%s1112_s7 + $0xa0] sm:$0xff]  ;;  %v938_v34 = vld [vmem:[%s1112_s7 + $0x58] sm:$0xff]  ;;  %v290_v43 = vunpack.c.l.bf16 %v283_v28  ;;  %v291_v44 = vunpack.c.h.bf16 %v283_v28  ;;  %v929_v52 = vld [vmem:[%s1112_s7 + $0x10] sm:$0xff] }
  0x2c   : > { %627 = vmatpush.bf16.msra.mxu2 %v949_v11  ;;  %v955_v21 = vld [vmem:[%s1112_s7 + $0xe0] sm:$0xff]  ;;  %vm1137_vm0 = vcmp.gt.f32.partialorder %v284_v23, 0.0  ;;  %vm1141_vm1 = vcmp.gt.f32.partialorder %v285_v24, 0.0  ;;  %v300_v35 = vmul.f32 0.20019531, %v284_v23  ;;  %v301_v36 = vmul.f32 0.20019531, %v285_v24  ;;  %v946_v39 = vld [vmem:[%s1112_s7 + $0x98] sm:$0xff] }
  0x2d   : > { %641 = vmatpush.bf16.msra.mxu3 %v957_v12  ;;  %v282_v22 = vld [vmem:[%s1114_s8 + $0x10] sm:$0xff]  ;;  %v954_v40 = vld [vmem:[%s1112_s7 + $0xd8] sm:$0xff]  ;;  %vm1157_vm4 = vcmp.gt.f32.partialorder %v286_v29, 0.0  ;;  %vm1161_vm5 = vcmp.gt.f32.partialorder %v287_v30, 0.0  ;;  %v302_v47 = vmul.f32 0.20019531, %v286_v29  ;;  %v303_v48 = vmul.f32 0.20019531, %v287_v30  ;;  %vm312_vm6 = vmpackc.low %vm1141_vm1, %vm1137_vm0 }
  0x2e   : > { %600 = vmatpush.bf16.msra.mxu0 %v932_v13  ;;  %v288_v26 = vunpack.c.l.bf16 %v282_v22  ;;  %v289_v27 = vunpack.c.h.bf16 %v282_v22  ;;  %vm1169_vm7 = vcmp.gt.f32.partialorder %v290_v43, 0.0  ;;  %vm1173_vm8 = vcmp.gt.f32.partialorder %v291_v44, 0.0  ;;  %v937_v53 = vld [vmem:[%s1112_s7 + $0x50] sm:$0xff]  ;;  %vm313_vm10 = vmpackc.low %vm1161_vm5, %vm1157_vm4  ;;  %v928_v61 = vld [vmem:[%s1112_s7 + $0x8] sm:$0xff] }
  0x2f   : > { %614 = vmatpush.bf16.msra.mxu1 %v940_v14  ;;  %v306_v51 = vmul.f32 0.20019531, %v290_v43  ;;  %v308_v54 = vpack.c.bf16 %v301_v36, %v300_v35  ;;  %v307_v56 = vmul.f32 0.20019531, %v291_v44  ;;  %v945_v57 = vld [vmem:[%s1112_s7 + $0x90] sm:$0xff]  ;;  %v309_v59 = vpack.c.bf16 %v303_v48, %v302_v47  ;;  %vm315_vm11 = vmpackc.low %vm1173_vm8, %vm1169_vm7  ;;  %v936_v62 = vld [vmem:[%s1112_s7 + $0x48] sm:$0xff] }
  0x30   : > { %628 = vmatpush.bf16.msra.mxu2 %v948_v15  ;;  %v304_v37 = vmul.f32 0.20019531, %v288_v26  ;;  %v305_v38 = vmul.f32 0.20019531, %v289_v27  ;;  %vm1149_vm2 = vcmp.gt.f32.partialorder %v288_v26, 0.0  ;;  %vm1153_vm3 = vcmp.gt.f32.partialorder %v289_v27, 0.0  ;;  %v953_v58 = vld [vmem:[%s1112_s7 + $0xd0] sm:$0xff]  ;;  %v944_v1 = vld [vmem:[%s1112_s7 + $0x88] sm:$0xff] }
  0x31   : > { %642 = vmatpush.bf16.msra.mxu3 %v956_v16  ;;  %vm314_vm9 = vmpackc.low %vm1153_vm3, %vm1149_vm2  ;;  %v311_v60 = vpack.c.bf16 %v307_v56, %v306_v51  ;;  %v316_v63 = vsel %vm312_vm6, %v280_v20, %v308_v54  ;;  %v952_v2 = vld [vmem:[%s1112_s7 + $0xc8] sm:$0xff]  ;;  %v317_v3 = vsel %vm313_vm10, %v281_v25, %v309_v59  ;;  %v927_v9 = vld [vmem:[%s1112_s7] sm:$0xff] }
  0x32   : > { %601 = vmatpush.bf16.msra.mxu0 %v931_v17  ;;  %v310_v55 = vpack.c.bf16 %v305_v38, %v304_v37  ;;  %v390_v5 = vunpack.c.l.b16 %v316_v63  ;;  %v391_v7 = vunpack.c.h.b16 %v316_v63  ;;  %v935_v10 = vld [vmem:[%s1112_s7 + $0x40] sm:$0xff]  ;;  %v392_v11 = vunpack.c.l.b16 %v317_v3  ;;  %v321_v35 = vld [vmem:[#allocation2 + $0x8] sm:$0xff] }
  0x33   : > { %615 = vmatpush.bf16.msra.mxu1 %v939_v18  ;;  %v319_v4 = vsel %vm315_vm11, %v283_v28, %v311_v60  ;;  %v393_v13 = vunpack.c.h.b16 %v317_v3  ;;  %v943_v15 = vld [vmem:[%s1112_s7 + $0x80] sm:$0xff] }
  0x34   : > { %629 = vmatpush.bf16.msra.mxu2 %v947_v19  ;;  %v318_v0 = vsel %vm314_vm9, %v282_v22, %v310_v55  ;;  %v396_v12 = vunpack.c.l.b16 %v319_v4  ;;  %v397_v14 = vunpack.c.h.b16 %v319_v4  ;;  %v951_v16 = vld [vmem:[%s1112_s7 + $0xc0] sm:$0xff] }
  0x35   : > { %643 = vmatpush.bf16.msra.mxu3 %v955_v21  ;;  %v394_v6 = vunpack.c.l.b16 %v318_v0  ;;  %v395_v8 = vunpack.c.h.b16 %v318_v0  ;;  %v320_v27 = vld [vmem:[#allocation2] sm:$0xff] }
  0x36   : > { %602 = vmatpush.bf16.msra.mxu0 %v930_v33  ;;  %v400_v19 = vpack.c.b16 %v396_v12, %v392_v11  ;;  %v401_v20 = vpack.c.b16 %v397_v14, %v393_v13 }
  0x37   : > { %616 = vmatpush.bf16.msra.mxu1 %v938_v34  ;;  %v398_v17 = vpack.c.b16 %v394_v6, %v390_v5  ;;  %v399_v18 = vpack.c.b16 %v395_v8, %v391_v7 }
  0x38   : > { %630 = vmatpush.bf16.msra.mxu2 %v946_v39 }
  0x39   : > { %644 = vmatpush.bf16.msra.mxu3 %v954_v40 }
  0x3a   : > { %603 = vmatpush.bf16.msra.mxu0 %v929_v52 }
  0x3b   : > { %617 = vmatpush.bf16.msra.mxu1 %v937_v53 }
  0x3c   : > { %631 = vmatpush.bf16.msra.mxu2 %v945_v57 }
  0x3d   : > { %645 = vmatpush.bf16.msra.mxu3 %v953_v58 }
  0x3e   : > { %604 = vmatpush.bf16.msra.mxu0 %v928_v61 }
  0x3f   : > { %618 = vmatpush.bf16.msra.mxu1 %v936_v62 }
  0x40   : > { %632 = vmatpush.bf16.msra.mxu2 %v944_v1 }
  0x41   : > { %646 = vmatpush.bf16.msra.mxu3 %v952_v2 }
  0x42   : > { %605 = vmatpush.bf16.msra.mxu0 %v927_v9 }
  0x43   : > { %619 = vmatpush.bf16.msra.mxu1 %v935_v10 }
  0x44   : > { %633 = vmatpush.bf16.msra.mxu2 %v943_v15 }
  0x45   : > { %647 = vmatpush.bf16.msra.mxu3 %v951_v16  ;;  %606 = vmatmul.bf16.vlgmr.msra.gmra.mxu0 %v398_v17 }
  0x46   : > { %620 = vmatmul.bf16.vlgmr.msra.gmra.mxu1 %v399_v18 }
  0x47   : > { %634 = vmatmul.bf16.vlgmr.msra.gmra.mxu2 %v400_v19 }
  0x48   : > { %648 = vmatmul.bf16.vlgmr.msra.gmra.mxu3 %v401_v20 }
  0xc2   : > { %v607_v21 = vpop.f32.mrf.mxu0 }
  0xc3   : > { %v621_v22 = vpop.f32.mrf.mxu1 }
  0xc4   : > { %v622_v23 = vadd.f32 %v621_v22, %v607_v21 }
  0xca   : > { %v635_v24 = vpop.f32.mrf.mxu2  ;;  %v609_v29 = vpop.f32.mrf.mxu0 }
  0xcb   : > { %v649_v25 = vpop.f32.mrf.mxu3  ;;  %v636_v26 = vadd.f32 %v635_v24, %v622_v23  ;;  %v623_v30 = vpop.f32.mrf.mxu1 }
  0xcc   : > { %v624_v32 = vadd.f32 %v623_v30, %v609_v29 }
  0xcd   : > { %v650_v28 = vadd.f32 %v649_v25, %v636_v26 }
  0xcf   : > { %v654_v31 = vadd.f32 %v650_v28, %v320_v27 }
  0xd1   : > { %656 = vst [vmem:[#allocation2] sm:$0xff] %v654_v31 }
  0xd2   : > { %v637_v33 = vpop.f32.mrf.mxu2 }
  0xd3   : > { %v638_v34 = vadd.f32 %v637_v33, %v624_v32  ;;  %v651_v36 = vpop.f32.mrf.mxu3 }
  0xd5   : > { %v652_v37 = vadd.f32 %v651_v36, %v638_v34  ;;  %661 = sbr.rel (%p921_p11) target bundleno = 228 (0xe4), region = 63 }
  0xd7   : > { %v655_v38 = vadd.f32 %v652_v37, %v321_v35 }
  0xd9   : > { %657 = vst [vmem:[#allocation2 + $0x8] sm:$0xff] %v655_v38 }
  0xda   : > { %v662_v39 = vld [vmem:[#allocation2] sm:$0xff] }
  0xdb   : > { %v1000_v40 = vld [vmem:[%s1233_s2] ss:$0 sm:$0xff] }
  0xdc   : > { %v668_v42 = vadd.f32 %v1000_v40, %v662_v39 }
  0xde   : > { %670 = vst [vmem:[%s1234_s3] sm:$0xff] %v668_v42 }
  0xe0   : > { %v663_v41 = vld [vmem:[#allocation2 + $0x8] sm:$0xff] }
  0xe1   : > { %v669_v43 = vadd.f32 %v1000_v40, %v663_v41 }
  0xe3   : > { %671 = vst [vmem:[%s1234_s3 + $0x8] sm:$0xff] %v669_v43 }
  0xe4 PF: > { %s13_s16 = sadd.s32 1, %s1039_s16   ;;  %s1251_s12 = smov %s1027_s13 }
  0xe5   : > { %p10_p12 = scmp.ge.s32.totalorder %s13_s16, 4   ;;  %s1252_s13 = smov %s1097_s20 }
  0xe6   : > { %s1253_s14 = smov %s1035_s15  ;;  %s1254_s15 = smov %s1256_s17 }
  0xe7   :  { %12 = sbr.rel (!%p10_p12) target bundleno = 3 (0x3), region = 101 }

// kernel: _lambda_.27
= control target key start
LH: loop header
LB: loop body
LE: loop exit
PB: predicated region body
PF: predicated region fallthrough
CT: control target
= control target key end

     0   :  { %s1104_s15 = smov 0   ;;  %s1106_s16 = smov 0   ;;  %s1186_s0 = inlined_call_operand.vmem [shape: bf16[4,16,512], index: 0, kind: input, shape index: {}]   ;;  %s1187_s1 = inlined_call_operand.vmem [shape: bf16[4,512,128], index: 1, kind: input, shape index: {}]   ;;  %s1188_s2 = inlined_call_operand.vmem [shape: f32[1,128], index: 2, kind: input, shape index: {}]   ;;  %s1189_s3 = inlined_call_operand.vmem [shape: f32[4,16,128], index: 3, kind: output, shape index: {0}]   ;;  %s1190_s4 = inlined_call_operand.vmem [shape: f32[4,1,2,128], index: 4, kind: output, shape index: {1}]  }
   0x1   :  { %s1108_s17 = smov 0  }
   0x2 LB: > { %s34_s18 = sadd.s32 1, %s1073_s16  ;;  %p857_p0 = scmp.ge.s32.totalorder %s1077_s17, 1  ;;  %s1077_s17 = sphi %s1108_s17, %s15_s17   ;;  %s1073_s16 = sphi %s1106_s16, %s1192_s16   ;;  %s1069_s15 = sphi %s1104_s15, %s1191_s15  }
   0x3   : > { %p36_p1 = scmp.ge.s32.totalorder %s34_s18, 4  ;;  %p220_p2 = scmp.lt.s32.totalorder %s1077_s17, 5 }
   0x5   : > { %s1194_s18 = smov (%p36_p1, %s34_s18), 0  ;;  %p221_p3 = pnand %p857_p0, %p220_p2 }
   0x6   : > { %p277_p4 = scmp.lt.s32.totalorder (!%p221_p3), %s1069_s15, 3 }
   0x7   : > { %224 = sbr.rel (%p221_p3) target bundleno = 213 (0xd5), region = 32 }
   0xc   : > { %s1196_s15 = smov (!%p277_p4, %s1069_s15), 3  ;;  %v1054_v62 = vld [vmem:[%s1188_s2] ss:$0 sm:$0xff]  ;;  %vm695_vm0 = vcmask 1040384  }
   0xd   : > { %s996_s19 = sshll.u32 %s1196_s15, 8  ;;  %s995_s23 = sshll.u32 %s1196_s15, 5 }
   0xe   : > { %s1128_s22 = scalar_lea.vmem %s1187_s1, %s996_s19  ;;  %s288_s26 = scalar_lea.vmem %s1186_s0, %s995_s23 }
   0xf   : > { %v1005_v0 = vld [vmem:[%s1128_s22 + $0x38] sm:$0xff]  ;;  %v1004_v4 = vld [vmem:[%s1128_s22 + $0x30] sm:$0xff]  ;;  %v1003_v8 = vld [vmem:[%s1128_s22 + $0x28] sm:$0xff]  ;;  %s997_s27 = sshll.u32 %s1196_s15, 4  ;;  %s864_s7 = sshll.u32 %s1196_s15, 1 }
  0x10   : > { %v1013_v1 = vld [vmem:[%s1128_s22 + $0x78] sm:$0xff]  ;;  %606 = vmatpush.bf16.msra.mxu0 %v1005_v0  ;;  %v1012_v5 = vld [vmem:[%s1128_s22 + $0x70] sm:$0xff]  ;;  %v1011_v9 = vld [vmem:[%s1128_s22 + $0x68] sm:$0xff]  ;;  %s309_s6 = scalar_lea.vmem %s1189_s3, %s997_s27  ;;  %s317_s10 = scalar_lea.vmem %s1190_s4, %s864_s7 }
  0x11   : > { %v1021_v2 = vld [vmem:[%s1128_s22 + $0xb8] sm:$0xff]  ;;  %620 = vmatpush.bf16.msra.mxu1 %v1013_v1  ;;  %v1020_v6 = vld [vmem:[%s1128_s22 + $0xb0] sm:$0xff]  ;;  %v1019_v10 = vld [vmem:[%s1128_s22 + $0xa8] sm:$0xff] }
  0x12   : > { %v1029_v3 = vld [vmem:[%s1128_s22 + $0xf8] sm:$0xff]  ;;  %634 = vmatpush.bf16.msra.mxu2 %v1021_v2  ;;  %v1028_v7 = vld [vmem:[%s1128_s22 + $0xf0] sm:$0xff]  ;;  %v1027_v11 = vld [vmem:[%s1128_s22 + $0xe8] sm:$0xff] }
  0x13   : > { %648 = vmatpush.bf16.msra.mxu3 %v1029_v3  ;;  %v1002_v12 = vld [vmem:[%s1128_s22 + $0x20] sm:$0xff]  ;;  %v1001_v16 = vld [vmem:[%s1128_s22 + $0x18] sm:$0xff]  ;;  %v1000_v20 = vld [vmem:[%s1128_s22 + $0x10] sm:$0xff] }
  0x14   : > { %607 = vmatpush.bf16.msra.mxu0 %v1004_v4  ;;  %v1010_v13 = vld [vmem:[%s1128_s22 + $0x60] sm:$0xff]  ;;  %v1009_v17 = vld [vmem:[%s1128_s22 + $0x58] sm:$0xff]  ;;  %v1008_v21 = vld [vmem:[%s1128_s22 + $0x50] sm:$0xff] }
  0x15   : > { %621 = vmatpush.bf16.msra.mxu1 %v1012_v5  ;;  %v1018_v14 = vld [vmem:[%s1128_s22 + $0xa0] sm:$0xff]  ;;  %v1017_v18 = vld [vmem:[%s1128_s22 + $0x98] sm:$0xff]  ;;  %v1016_v22 = vld [vmem:[%s1128_s22 + $0x90] sm:$0xff] }
  0x16   : > { %635 = vmatpush.bf16.msra.mxu2 %v1020_v6  ;;  %v1026_v15 = vld [vmem:[%s1128_s22 + $0xe0] sm:$0xff]  ;;  %v1025_v19 = vld [vmem:[%s1128_s22 + $0xd8] sm:$0xff]  ;;  %v326_v24 = vld [vmem:[%s288_s26 + $0x10] sm:$0xff] }
  0x17   : > { %649 = vmatpush.bf16.msra.mxu3 %v1028_v7  ;;  %v324_v23 = vld [vmem:[%s288_s26] sm:$0xff]  ;;  %v1024_v25 = vld [vmem:[%s1128_s22 + $0xd0] sm:$0xff]  ;;  %v325_v26 = vld [vmem:[%s288_s26 + $0x8] sm:$0xff]  ;;  %v332_v29 = vunpack.c.l.bf16 %v326_v24  ;;  %v333_v31 = vunpack.c.h.bf16 %v326_v24 }
  0x18   : > { %608 = vmatpush.bf16.msra.mxu0 %v1003_v8  ;;  %v327_v27 = vld [vmem:[%s288_s26 + $0x18] sm:$0xff]  ;;  %v328_v28 = vunpack.c.l.bf16 %v324_v23  ;;  %v329_v30 = vunpack.c.h.bf16 %v324_v23  ;;  %v999_v32 = vld [vmem:[%s1128_s22 + $0x8] sm:$0xff]  ;;  %v330_v34 = vunpack.c.l.bf16 %v325_v26  ;;  %v331_v36 = vunpack.c.h.bf16 %v325_v26  ;;  %v998_v44 = vld [vmem:[%s1128_s22] sm:$0xff] }
  0x19   : > { %622 = vmatpush.bf16.msra.mxu1 %v1011_v9  ;;  %v1007_v33 = vld [vmem:[%s1128_s22 + $0x48] sm:$0xff]  ;;  %v334_v35 = vunpack.c.l.bf16 %v327_v27  ;;  %v335_v37 = vunpack.c.h.bf16 %v327_v27  ;;  %v340_v41 = vmax.f32 %v332_v29, 0.0  ;;  %v341_v43 = vmax.f32 %v333_v31, 0.0  ;;  %v1006_v45 = vld [vmem:[%s1128_s22 + $0x40] sm:$0xff] }
  0x1a   : > { %636 = vmatpush.bf16.msra.mxu2 %v1019_v10  ;;  %v1015_v38 = vld [vmem:[%s1128_s22 + $0x88] sm:$0xff]  ;;  %v336_v40 = vmax.f32 %v328_v28, 0.0  ;;  %v337_v42 = vmax.f32 %v329_v30, 0.0  ;;  %v338_v46 = vmax.f32 %v330_v34, 0.0  ;;  %v339_v48 = vmax.f32 %v331_v36, 0.0  ;;  %v1014_v50 = vld [vmem:[%s1128_s22 + $0x80] sm:$0xff] }
  0x1b   : > { %650 = vmatpush.bf16.msra.mxu3 %v1027_v11  ;;  %v1023_v39 = vld [vmem:[%s1128_s22 + $0xc8] sm:$0xff]  ;;  %v342_v47 = vmax.f32 %v334_v35, 0.0  ;;  %v343_v49 = vmax.f32 %v335_v37, 0.0  ;;  %v1022_v51 = vld [vmem:[%s1128_s22 + $0xc0] sm:$0xff] }
  0x1c   : > { %609 = vmatpush.bf16.msra.mxu0 %v1002_v12  ;;  %v344_v52 = vpack.c.bf16 %v340_v41, %v336_v40  ;;  %v345_v53 = vpack.c.bf16 %v341_v43, %v337_v42 }
  0x1d   : > { %623 = vmatpush.bf16.msra.mxu1 %v1010_v13  ;;  %v346_v54 = vpack.c.bf16 %v342_v47, %v338_v46  ;;  %v347_v55 = vpack.c.bf16 %v343_v49, %v339_v48 }
  0x1e   : > { %637 = vmatpush.bf16.msra.mxu2 %v1018_v14 }
  0x1f   : > { %651 = vmatpush.bf16.msra.mxu3 %v1026_v15 }
  0x20   : > { %610 = vmatpush.bf16.msra.mxu0 %v1001_v16 }
  0x21   : > { %624 = vmatpush.bf16.msra.mxu1 %v1009_v17 }
  0x22   : > { %638 = vmatpush.bf16.msra.mxu2 %v1017_v18 }
  0x23   : > { %652 = vmatpush.bf16.msra.mxu3 %v1025_v19 }
  0x24   : > { %611 = vmatpush.bf16.msra.mxu0 %v1000_v20 }
  0x25   : > { %625 = vmatpush.bf16.msra.mxu1 %v1008_v21 }
  0x26   : > { %639 = vmatpush.bf16.msra.mxu2 %v1016_v22 }
  0x27   : > { %653 = vmatpush.bf16.msra.mxu3 %v1024_v25 }
  0x28   : > { %612 = vmatpush.bf16.msra.mxu0 %v999_v32 }
  0x29   : > { %626 = vmatpush.bf16.msra.mxu1 %v1007_v33 }
  0x2a   : > { %640 = vmatpush.bf16.msra.mxu2 %v1015_v38 }
  0x2b   : > { %654 = vmatpush.bf16.msra.mxu3 %v1023_v39 }
  0x2c   : > { %613 = vmatpush.bf16.msra.mxu0 %v998_v44 }
  0x2d   : > { %627 = vmatpush.bf16.msra.mxu1 %v1006_v45 }
  0x2e   : > { %641 = vmatpush.bf16.msra.mxu2 %v1014_v50 }
  0x2f   : > { %655 = vmatpush.bf16.msra.mxu3 %v1022_v51  ;;  %614 = vmatmul.bf16.vlgmr.msra.gmra.mxu0 %v344_v52 }
  0x30   : > { %628 = vmatmul.bf16.vlgmr.msra.gmra.mxu1 %v345_v53 }
  0x31   : > { %642 = vmatmul.bf16.vlgmr.msra.gmra.mxu2 %v346_v54 }
  0x32   : > { %656 = vmatmul.bf16.vlgmr.msra.gmra.mxu3 %v347_v55 }
  0xac   : > { %v615_v56 = vpop.f32.mrf.mxu0 }
  0xad   : > { %v629_v57 = vpop.f32.mrf.mxu1 }
  0xae   : > { %v630_v58 = vadd.f32 %v629_v57, %v615_v56 }
  0xb4   : > { %v643_v59 = vpop.f32.mrf.mxu2  ;;  %v617_v0 = vpop.f32.mrf.mxu0 }
  0xb5   : > { %v657_v60 = vpop.f32.mrf.mxu3  ;;  %v644_v61 = vadd.f32 %v643_v59, %v630_v58  ;;  %v631_v1 = vpop.f32.mrf.mxu1 }
  0xb6   : > { %v632_v3 = vadd.f32 %v631_v1, %v617_v0 }
  0xb7   : > { %v658_v63 = vadd.f32 %v657_v60, %v644_v61 }
  0xb9   : > { %v675_v2 = vadd.f32 %v1054_v62, %v658_v63 }
  0xbb   : > { %677 = vst [vmem:[%s309_s6] sm:$0xff] %v675_v2  ;;  %v686_v9 = vmul.f32 %v675_v2, %v675_v2 }
  0xbc   : > { %v645_v4 = vpop.f32.mrf.mxu2 }
  0xbd   : > { %v646_v5 = vadd.f32 %v645_v4, %v632_v3  ;;  %v659_v6 = vpop.f32.mrf.mxu3 }
  0xbf   : > { %v660_v7 = vadd.f32 %v659_v6, %v646_v5 }
  0xc1   : > { %v676_v8 = vadd.f32 %v1054_v62, %v660_v7 }
  0xc3   : > { %678 = vst [vmem:[%s309_s6 + $0x8] sm:$0xff] %v676_v8  ;;  %v679_v10 = vadd.f32 %v676_v8, %v675_v2  ;;  %v687_v11 = vmul.f32 %v676_v8, %v676_v8 }
  0xc5   : > { %v680_v12 = vrot.slane %v679_v10, 4  ;;  %v688_v13 = vadd.f32 %v687_v11, %v686_v9 }
  0xc7   : > { %v681_v14 = vadd.f32 %v680_v12, %v679_v10  ;;  %v689_v15 = vrot.slane %v688_v13, 4 }
  0xc9   : > { %v682_v16 = vrot.slane %v681_v14, 2  ;;  %v690_v17 = vadd.f32 %v689_v15, %v688_v13 }
  0xcb   : > { %v683_v18 = vadd.f32 %v682_v16, %v681_v14  ;;  %v691_v19 = vrot.slane %v690_v17, 2 }
  0xcd   : > { %v684_v20 = vrot.slane %v683_v18, 1  ;;  %v692_v21 = vadd.f32 %v691_v19, %v690_v17 }
  0xcf   : > { %v693_v22 = vrot.slane %v692_v21, 1  ;;  %v685_v23 = vadd.f32 %v684_v20, %v683_v18 }
  0xd1   : > { %v694_v24 = vadd.f32 %v693_v22, %v692_v21 }
  0xd3   : > { %v696_v25 = vsel %vm695_vm0, %v685_v23, %v694_v24 }
  0xd4   : > { %697 = vst [vmem:[%s317_s10] sm:$0x3] %v696_v25 }
  0xd5 PF: > { %s15_s17 = sadd.s32 1, %s1077_s17   ;;  %s1191_s15 = smov %s1073_s16 }
  0xd6   : > { %p12_p5 = scmp.ge.s32.totalorder %s15_s17, 6   ;;  %s1192_s16 = smov %s1194_s18 }
  0xd8   :  { %14 = sbr.rel (!%p12_p5) target bundleno = 2 (0x2), region = 85 }

// kernel: _lambda_.29
= control target key start
LH: loop header
LB: loop body
LE: loop exit
PB: predicated region body
PF: predicated region fallthrough
CT: control target
= control target key end

     0   :  { %s914_s15 = smov 0   ;;  %s916_s16 = smov 0   ;;  %s983_s0 = inlined_call_operand.vmem [shape: bf16[4,32,256], index: 0, kind: input, shape index: {}]   ;;  %s984_s1 = inlined_call_operand.vmem [shape: bf16[4,256,128], index: 1, kind: input, shape index: {}]   ;;  %s985_s2 = inlined_call_operand.vmem [shape: f32[1,128], index: 2, kind: input, shape index: {}]   ;;  %s986_s3 = inlined_call_operand.vmem [shape: f32[4,32,128], index: 3, kind: output, shape index: {0}]   ;;  %s987_s4 = inlined_call_operand.vmem [shape: f32[4,1,2,128], index: 4, kind: output, shape index: {1}]  }
   0x1   :  { %s918_s17 = smov 0  }
   0x2 LB: > { %s34_s18 = sadd.s32 1, %s883_s16  ;;  %p731_p0 = scmp.ge.s32.totalorder %s887_s17, 1  ;;  %s887_s17 = sphi %s918_s17, %s15_s17   ;;  %s883_s16 = sphi %s916_s16, %s989_s16   ;;  %s879_s15 = sphi %s914_s15, %s988_s15  }
   0x3   : > { %p36_p1 = scmp.ge.s32.totalorder %s34_s18, 4  ;;  %p220_p2 = scmp.lt.s32.totalorder %s887_s17, 5 }
   0x5   : > { %s991_s18 = smov (%p36_p1, %s34_s18), 0  ;;  %p221_p3 = pnand %p731_p0, %p220_p2 }
   0x6   : > { %p277_p4 = scmp.lt.s32.totalorder (!%p221_p3), %s879_s15, 3 }
   0x7   : > { %224 = sbr.rel (%p221_p3) target bundleno = 210 (0xd2), region = 32 }
   0xc   : > { %s993_s15 = smov (!%p277_p4, %s879_s15), 3  ;;  %v864_v41 = vld [vmem:[%s985_s2] ss:$0 sm:$0xff]  ;;  %vm569_vm0 = vcmask 1040384  }
   0xd   : > { %s806_s19 = sshll.u32 %s993_s15, 7  ;;  %s805_s23 = sshll.u32 %s993_s15, 5 }
   0xe   : > { %s938_s22 = scalar_lea.vmem %s984_s1, %s806_s19  ;;  %s288_s26 = scalar_lea.vmem %s983_s0, %s805_s23 }
   0xf   : > { %v815_v0 = vld [vmem:[%s938_s22 + $0x38] sm:$0xff]  ;;  %v814_v2 = vld [vmem:[%s938_s22 + $0x30] sm:$0xff]  ;;  %v813_v4 = vld [vmem:[%s938_s22 + $0x28] sm:$0xff]  ;;  %s309_s5 = scalar_lea.vmem %s986_s3, %s805_s23  ;;  %s738_s6 = sshll.u32 %s993_s15, 1 }
  0x10   : > { %v823_v1 = vld [vmem:[%s938_s22 + $0x78] sm:$0xff]  ;;  %482 = vmatpush.bf16.msra.mxu0 %v815_v0  ;;  %824 = vmatpush.bf16.msra.mxu2 %v815_v0  ;;  %v822_v3 = vld [vmem:[%s938_s22 + $0x70] sm:$0xff]  ;;  %v821_v5 = vld [vmem:[%s938_s22 + $0x68] sm:$0xff]  ;;  %s317_s9 = scalar_lea.vmem %s987_s4, %s738_s6 }
  0x11   : > { %501 = vmatpush.bf16.msra.mxu1 %v823_v1  ;;  %832 = vmatpush.bf16.msra.mxu3 %v823_v1  ;;  %v812_v6 = vld [vmem:[%s938_s22 + $0x20] sm:$0xff]  ;;  %v811_v8 = vld [vmem:[%s938_s22 + $0x18] sm:$0xff]  ;;  %v810_v10 = vld [vmem:[%s938_s22 + $0x10] sm:$0xff] }
  0x12   : > { %v820_v7 = vld [vmem:[%s938_s22 + $0x60] sm:$0xff]  ;;  %v819_v9 = vld [vmem:[%s938_s22 + $0x58] sm:$0xff]  ;;  %v327_v12 = vld [vmem:[%s288_s26 + $0x8] sm:$0xff] }
  0x13   : > { %v326_v11 = vld [vmem:[%s288_s26] sm:$0xff]  ;;  %v328_v13 = vld [vmem:[%s288_s26 + $0x10] sm:$0xff]  ;;  %v329_v14 = vld [vmem:[%s288_s26 + $0x18] sm:$0xff]  ;;  %v332_v17 = vunpack.c.l.bf16 %v327_v12  ;;  %v333_v22 = vunpack.c.h.bf16 %v327_v12 }
  0x14   : > { %483 = vmatpush.bf16.msra.mxu0 %v814_v2  ;;  %825 = vmatpush.bf16.msra.mxu2 %v814_v2  ;;  %v818_v15 = vld [vmem:[%s938_s22 + $0x50] sm:$0xff]  ;;  %v330_v16 = vunpack.c.l.bf16 %v326_v11  ;;  %v334_v18 = vunpack.c.l.bf16 %v328_v13  ;;  %v336_v19 = vunpack.c.l.bf16 %v329_v14  ;;  %v809_v20 = vld [vmem:[%s938_s22 + $0x8] sm:$0xff]  ;;  %v331_v21 = vunpack.c.h.bf16 %v326_v11  ;;  %v808_v30 = vld [vmem:[%s938_s22] sm:$0xff] }
  0x15   : > { %502 = vmatpush.bf16.msra.mxu1 %v822_v3  ;;  %833 = vmatpush.bf16.msra.mxu3 %v822_v3  ;;  %v335_v23 = vunpack.c.h.bf16 %v328_v13  ;;  %v337_v24 = vunpack.c.h.bf16 %v329_v14  ;;  %v817_v25 = vld [vmem:[%s938_s22 + $0x48] sm:$0xff]  ;;  %v340_v27 = vmax.f32 %v332_v17, 0.0  ;;  %v341_v32 = vmax.f32 %v333_v22, 0.0  ;;  %v816_v35 = vld [vmem:[%s938_s22 + $0x40] sm:$0xff] }
  0x16   : > { %v338_v26 = vmax.f32 %v330_v16, 0.0  ;;  %v342_v28 = vmax.f32 %v334_v18, 0.0  ;;  %v344_v29 = vmax.f32 %v336_v19, 0.0  ;;  %v339_v31 = vmax.f32 %v331_v21, 0.0 }
  0x17   : > { %v343_v33 = vmax.f32 %v335_v23, 0.0  ;;  %v345_v34 = vmax.f32 %v337_v24, 0.0 }
  0x18   : > { %484 = vmatpush.bf16.msra.mxu0 %v813_v4  ;;  %826 = vmatpush.bf16.msra.mxu2 %v813_v4  ;;  %v346_v36 = vpack.c.bf16 %v340_v27, %v338_v26  ;;  %v348_v37 = vpack.c.bf16 %v344_v29, %v342_v28  ;;  %v347_v38 = vpack.c.bf16 %v341_v32, %v339_v31 }
  0x19   : > { %503 = vmatpush.bf16.msra.mxu1 %v821_v5  ;;  %834 = vmatpush.bf16.msra.mxu3 %v821_v5  ;;  %v349_v39 = vpack.c.bf16 %v345_v34, %v343_v33 }
  0x1c   : > { %485 = vmatpush.bf16.msra.mxu0 %v812_v6  ;;  %827 = vmatpush.bf16.msra.mxu2 %v812_v6 }
  0x1d   : > { %504 = vmatpush.bf16.msra.mxu1 %v820_v7  ;;  %835 = vmatpush.bf16.msra.mxu3 %v820_v7 }
  0x20   : > { %486 = vmatpush.bf16.msra.mxu0 %v811_v8  ;;  %828 = vmatpush.bf16.msra.mxu2 %v811_v8 }
  0x21   : > { %505 = vmatpush.bf16.msra.mxu1 %v819_v9  ;;  %836 = vmatpush.bf16.msra.mxu3 %v819_v9 }
  0x24   : > { %487 = vmatpush.bf16.msra.mxu0 %v810_v10  ;;  %829 = vmatpush.bf16.msra.mxu2 %v810_v10 }
  0x25   : > { %506 = vmatpush.bf16.msra.mxu1 %v818_v15  ;;  %837 = vmatpush.bf16.msra.mxu3 %v818_v15 }
  0x28   : > { %488 = vmatpush.bf16.msra.mxu0 %v809_v20  ;;  %830 = vmatpush.bf16.msra.mxu2 %v809_v20 }
  0x29   : > { %507 = vmatpush.bf16.msra.mxu1 %v817_v25  ;;  %838 = vmatpush.bf16.msra.mxu3 %v817_v25 }
  0x2c   : > { %489 = vmatpush.bf16.msra.mxu0 %v808_v30  ;;  %831 = vmatpush.bf16.msra.mxu2 %v808_v30 }
  0x2d   : > { %508 = vmatpush.bf16.msra.mxu1 %v816_v35  ;;  %839 = vmatpush.bf16.msra.mxu3 %v816_v35 }
  0x2f   : > { %490 = vmatmul.bf16.vlgmr.msra.gmra.mxu0 %v346_v36  ;;  %495 = vmatmul.bf16.vlgmr.msra.gmra.mxu2 %v348_v37 }
  0x30   : > { %509 = vmatmul.bf16.vlgmr.msra.gmra.mxu1 %v347_v38  ;;  %514 = vmatmul.bf16.vlgmr.msra.gmra.mxu3 %v349_v39 }
  0xac   : > { %v491_v40 = vpop.f32.mrf.mxu0 }
  0xad   : > { %v510_v42 = vpop.f32.mrf.mxu1 }
  0xae   : > { %v511_v43 = vadd.f32 %v510_v42, %v491_v40 }
  0xb0   : > { %v539_v44 = vadd.f32 %v864_v41, %v511_v43 }
  0xb2   : > { %543 = vst [vmem:[%s309_s5] sm:$0xff] %v539_v44  ;;  %v496_v45 = vpop.f32.mrf.mxu2  ;;  %v556_v53 = vmul.f32 %v539_v44, %v539_v44 }
  0xb3   : > { %v515_v46 = vpop.f32.mrf.mxu3 }
  0xb4   : > { %v516_v47 = vadd.f32 %v515_v46, %v496_v45  ;;  %v493_v48 = vpop.f32.mrf.mxu0 }
  0xb5   : > { %v512_v49 = vpop.f32.mrf.mxu1 }
  0xb6   : > { %v541_v50 = vadd.f32 %v864_v41, %v516_v47  ;;  %v513_v51 = vadd.f32 %v512_v49, %v493_v48 }
  0xb8   : > { %545 = vst [vmem:[%s309_s5 + $0x10] sm:$0xff] %v541_v50  ;;  %v540_v52 = vadd.f32 %v864_v41, %v513_v51  ;;  %v558_v60 = vmul.f32 %v541_v50, %v541_v50 }
  0xba   : > { %544 = vst [vmem:[%s309_s5 + $0x8] sm:$0xff] %v540_v52  ;;  %v547_v54 = vadd.f32 %v540_v52, %v539_v44  ;;  %v557_v55 = vmul.f32 %v540_v52, %v540_v52  ;;  %v498_v56 = vpop.f32.mrf.mxu2 }
  0xbb   : > { %v517_v57 = vpop.f32.mrf.mxu3 }
  0xbc   : > { %v560_v58 = vadd.f32 %v557_v55, %v556_v53  ;;  %v518_v59 = vadd.f32 %v517_v57, %v498_v56  ;;  %v548_v62 = vadd.f32 %v547_v54, %v541_v50 }
  0xbe   : > { %v542_v61 = vadd.f32 %v864_v41, %v518_v59  ;;  %v561_v1 = vadd.f32 %v560_v58, %v558_v60 }
  0xc0   : > { %546 = vst [vmem:[%s309_s5 + $0x18] sm:$0xff] %v542_v61  ;;  %v549_v63 = vadd.f32 %v548_v62, %v542_v61  ;;  %v559_v0 = vmul.f32 %v542_v61, %v542_v61 }
  0xc2   : > { %v550_v2 = vrot.slane %v549_v63, 4  ;;  %v562_v3 = vadd.f32 %v561_v1, %v559_v0 }
  0xc4   : > { %v551_v4 = vadd.f32 %v550_v2, %v549_v63  ;;  %v563_v5 = vrot.slane %v562_v3, 4 }
  0xc6   : > { %v552_v6 = vrot.slane %v551_v4, 2  ;;  %v564_v7 = vadd.f32 %v563_v5, %v562_v3 }
  0xc8   : > { %v553_v8 = vadd.f32 %v552_v6, %v551_v4  ;;  %v565_v9 = vrot.slane %v564_v7, 2 }
  0xca   : > { %v554_v10 = vrot.slane %v553_v8, 1  ;;  %v566_v11 = vadd.f32 %v565_v9, %v564_v7 }
  0xcc   : > { %v567_v12 = vrot.slane %v566_v11, 1  ;;  %v555_v13 = vadd.f32 %v554_v10, %v553_v8 }
  0xce   : > { %v568_v14 = vadd.f32 %v567_v12, %v566_v11 }
  0xd0   : > { %v570_v15 = vsel %vm569_vm0, %v555_v13, %v568_v14 }
  0xd1   : > { %571 = vst [vmem:[%s317_s9] sm:$0x3] %v570_v15 }
  0xd2 PF: > { %s15_s17 = sadd.s32 1, %s887_s17   ;;  %s988_s15 = smov %s883_s16 }
  0xd3   : > { %p12_p5 = scmp.ge.s32.totalorder %s15_s17, 6   ;;  %s989_s16 = smov %s991_s18 }
  0xd5   :  { %14 = sbr.rel (!%p12_p5) target bundleno = 2 (0x2), region = 85 }

// kernel: _lambda_.31
= control target key start
LH: loop header
LB: loop body
LE: loop exit
PB: predicated region body
PF: predicated region fallthrough
CT: control target
= control target key end

     0   :  { %s1009_s15 = smov 0   ;;  %s1011_s16 = smov 0   ;;  %s1100_s0 = inlined_call_operand.vmem [shape: bf16[4,128,128], index: 0, kind: input, shape index: {}]   ;;  %s1101_s1 = inlined_call_operand.vmem [shape: bf16[4,128,128], index: 1, kind: input, shape index: {}]   ;;  %s1102_s2 = inlined_call_operand.vmem [shape: f32[1,128], index: 2, kind: input, shape index: {}]   ;;  %s1103_s3 = inlined_call_operand.vmem [shape: f32[4,128,128], index: 3, kind: output, shape index: {0}]   ;;  %s1104_s4 = inlined_call_operand.vmem [shape: f32[4,1,2,128], index: 4, kind: output, shape index: {1}]  }
   0x1   :  { %s1013_s17 = smov 0  }
   0x2 LB: > { %s34_s18 = sadd.s32 1, %s978_s16  ;;  %p819_p0 = scmp.ge.s32.totalorder %s982_s17, 1  ;;  %s982_s17 = sphi %s1013_s17, %s15_s17   ;;  %s978_s16 = sphi %s1011_s16, %s1106_s16   ;;  %s974_s15 = sphi %s1009_s15, %s1105_s15  }
   0x3   : > { %p36_p1 = scmp.ge.s32.totalorder %s34_s18, 4  ;;  %p217_p2 = scmp.lt.s32.totalorder %s982_s17, 5 }
   0x5   : > { %s1108_s18 = smov (%p36_p1, %s34_s18), 0  ;;  %p218_p3 = pnand %p819_p0, %p217_p2 }
   0x6   : > { %p271_p4 = scmp.lt.s32.totalorder (!%p218_p3), %s974_s15, 3 }
   0x7   : > { %221 = sbr.rel (%p218_p3) target bundleno = 241 (0xf1), region = 32 }
   0xc   : > { %s1110_s15 = smov (!%p271_p4, %s974_s15), 3  ;;  %v959_v56 = vld [vmem:[%s1102_s2] ss:$0 sm:$0xff]  ;;  %vm660_vm0 = vcmask 1040384  }
   0xd   : > { %s861_s19 = sshll.u32 %s1110_s15, 6  ;;  %s863_s26 = sshll.u32 %s1110_s15, 7 }
   0xe   : > { %s1033_s22 = scalar_lea.vmem %s1101_s1, %s861_s19  ;;  %s1043_s25 = scalar_lea.vmem %s1100_s0, %s861_s19 }
   0xf   : > { %v871_v0 = vld [vmem:[%s1033_s22 + $0x38] sm:$0xff]  ;;  %v870_v1 = vld [vmem:[%s1033_s22 + $0x30] sm:$0xff]  ;;  %v869_v2 = vld [vmem:[%s1033_s22 + $0x28] sm:$0xff]  ;;  %s1063_s5 = scalar_lea.vmem %s1103_s3, %s863_s26  ;;  %s826_s6 = sshll.u32 %s1110_s15, 1 }
  0x10   : > { %466 = vmatpush.bf16.msra.mxu0 %v871_v0  ;;  %911 = vmatpush.bf16.msra.mxu1 %v871_v0  ;;  %v868_v3 = vld [vmem:[%s1033_s22 + $0x20] sm:$0xff]  ;;  %v867_v4 = vld [vmem:[%s1033_s22 + $0x18] sm:$0xff]  ;;  %v866_v5 = vld [vmem:[%s1033_s22 + $0x10] sm:$0xff]  ;;  %s309_s9 = scalar_lea.vmem %s1104_s4, %s826_s6 }
  0x11   : > { %912 = vmatpush.bf16.msra.mxu2 %v871_v0  ;;  %913 = vmatpush.bf16.msra.mxu3 %v871_v0  ;;  %v873_v6 = vld [vmem:[%s1043_s25] sm:$0xff]   ;;  %v905_v7 = vld [vmem:[%s1043_s25 + $0x10] sm:$0xff]   ;;  %v865_v14 = vld [vmem:[%s1033_s22 + $0x8] sm:$0xff] }
  0x12   : > { %v907_v8 = vld [vmem:[%s1043_s25 + $0x20] sm:$0xff]   ;;  %v909_v9 = vld [vmem:[%s1043_s25 + $0x30] sm:$0xff]   ;;  %v874_v10 = vunpack.c.l.bf16 %v873_v6  ;;  %v875_v11 = vunpack.c.h.bf16 %v873_v6  ;;  %v882_v12 = vunpack.c.l.bf16 %v905_v7  ;;  %v883_v13 = vunpack.c.h.bf16 %v905_v7  ;;  %v904_v32 = vld [vmem:[%s1043_s25 + $0x8] sm:$0xff]  }
  0x13   : > { %v890_v15 = vunpack.c.l.bf16 %v907_v8  ;;  %v891_v16 = vunpack.c.h.bf16 %v907_v8  ;;  %v898_v17 = vunpack.c.l.bf16 %v909_v9  ;;  %v899_v18 = vunpack.c.h.bf16 %v909_v9  ;;  %v864_v23 = vld [vmem:[%s1033_s22] sm:$0xff]  ;;  %v906_v33 = vld [vmem:[%s1043_s25 + $0x18] sm:$0xff]   ;;  %v908_v34 = vld [vmem:[%s1043_s25 + $0x28] sm:$0xff]  }
  0x14   : > { %467 = vmatpush.bf16.msra.mxu0 %v870_v1  ;;  %914 = vmatpush.bf16.msra.mxu1 %v870_v1  ;;  %v362_v19 = vmax.f32 %v874_v10, 0.0  ;;  %v363_v20 = vmax.f32 %v875_v11, 0.0  ;;  %v366_v21 = vmax.f32 %v882_v12, 0.0  ;;  %v367_v22 = vmax.f32 %v883_v13, 0.0  ;;  %v910_v35 = vld [vmem:[%s1043_s25 + $0x38] sm:$0xff]  }
  0x15   : > { %915 = vmatpush.bf16.msra.mxu2 %v870_v1  ;;  %916 = vmatpush.bf16.msra.mxu3 %v870_v1  ;;  %v370_v24 = vmax.f32 %v890_v15, 0.0  ;;  %v371_v25 = vmax.f32 %v891_v16, 0.0  ;;  %v374_v26 = vmax.f32 %v898_v17, 0.0  ;;  %v375_v27 = vmax.f32 %v899_v18, 0.0 }
  0x16   : > { %v378_v28 = vpack.c.bf16 %v363_v20, %v362_v19  ;;  %v380_v29 = vpack.c.bf16 %v367_v22, %v366_v21  ;;  %v878_v36 = vunpack.c.l.bf16 %v904_v32  ;;  %v879_v37 = vunpack.c.h.bf16 %v904_v32 }
  0x17   : > { %v382_v30 = vpack.c.bf16 %v371_v25, %v370_v24  ;;  %v384_v31 = vpack.c.bf16 %v375_v27, %v374_v26  ;;  %v886_v38 = vunpack.c.l.bf16 %v906_v33  ;;  %v887_v39 = vunpack.c.h.bf16 %v906_v33 }
  0x18   : > { %468 = vmatpush.bf16.msra.mxu0 %v869_v2  ;;  %917 = vmatpush.bf16.msra.mxu1 %v869_v2  ;;  %v894_v40 = vunpack.c.l.bf16 %v908_v34  ;;  %v895_v41 = vunpack.c.h.bf16 %v908_v34  ;;  %v902_v42 = vunpack.c.l.bf16 %v910_v35  ;;  %v903_v43 = vunpack.c.h.bf16 %v910_v35 }
  0x19   : > { %918 = vmatpush.bf16.msra.mxu2 %v869_v2  ;;  %919 = vmatpush.bf16.msra.mxu3 %v869_v2  ;;  %v364_v44 = vmax.f32 %v878_v36, 0.0  ;;  %v365_v45 = vmax.f32 %v879_v37, 0.0  ;;  %v368_v46 = vmax.f32 %v886_v38, 0.0  ;;  %v369_v47 = vmax.f32 %v887_v39, 0.0 }
  0x1a   : > { %v372_v48 = vmax.f32 %v894_v40, 0.0  ;;  %v373_v49 = vmax.f32 %v895_v41, 0.0  ;;  %v376_v50 = vmax.f32 %v902_v42, 0.0  ;;  %v377_v51 = vmax.f32 %v903_v43, 0.0 }
  0x1b   : > { %v379_v52 = vpack.c.bf16 %v365_v45, %v364_v44  ;;  %v381_v53 = vpack.c.bf16 %v369_v47, %v368_v46 }
  0x1c   : > { %469 = vmatpush.bf16.msra.mxu0 %v868_v3  ;;  %920 = vmatpush.bf16.msra.mxu1 %v868_v3  ;;  %v383_v54 = vpack.c.bf16 %v373_v49, %v372_v48  ;;  %v385_v55 = vpack.c.bf16 %v377_v51, %v376_v50 }
  0x1d   : > { %921 = vmatpush.bf16.msra.mxu2 %v868_v3  ;;  %922 = vmatpush.bf16.msra.mxu3 %v868_v3 }
  0x20   : > { %470 = vmatpush.bf16.msra.mxu0 %v867_v4  ;;  %923 = vmatpush.bf16.msra.mxu1 %v867_v4 }
  0x21   : > { %924 = vmatpush.bf16.msra.mxu2 %v867_v4  ;;  %925 = vmatpush.bf16.msra.mxu3 %v867_v4 }
  0x24   : > { %471 = vmatpush.bf16.msra.mxu0 %v866_v5  ;;  %926 = vmatpush.bf16.msra.mxu1 %v866_v5 }
  0x25   : > { %927 = vmatpush.bf16.msra.mxu2 %v866_v5  ;;  %928 = vmatpush.bf16.msra.mxu3 %v866_v5 }
  0x28   : > { %472 = vmatpush.bf16.msra.mxu0 %v865_v14  ;;  %929 = vmatpush.bf16.msra.mxu1 %v865_v14 }
  0x29   : > { %930 = vmatpush.bf16.msra.mxu2 %v865_v14  ;;  %931 = vmatpush.bf16.msra.mxu3 %v865_v14 }
  0x2c   : > { %473 = vmatpush.bf16.msra.mxu0 %v864_v23  ;;  %932 = vmatpush.bf16.msra.mxu1 %v864_v23 }
  0x2d   : > { %933 = vmatpush.bf16.msra.mxu2 %v864_v23  ;;  %934 = vmatpush.bf16.msra.mxu3 %v864_v23 }
  0x2f   : > { %474 = vmatmul.bf16.vlgmr.msra.gmra.mxu0 %v378_v28  ;;  %484 = vmatmul.bf16.vlgmr.msra.gmra.mxu1 %v380_v29 }
  0x30   : > { %494 = vmatmul.bf16.vlgmr.msra.gmra.mxu2 %v382_v30  ;;  %504 = vmatmul.bf16.vlgmr.msra.gmra.mxu3 %v384_v31 }
  0x3f   : > { %479 = vmatmul.bf16.gmra.mxu0 %v379_v52  ;;  %489 = vmatmul.bf16.gmra.mxu1 %v381_v53 }
  0x40   : > { %499 = vmatmul.bf16.gmra.mxu2 %v383_v54  ;;  %509 = vmatmul.bf16.gmra.mxu3 %v385_v55 }
  0xac   : > { %v475_v57 = vpop.f32.mrf.mxu0  ;;  %v485_v58 = vpop.f32.mrf.mxu1 }
  0xad   : > { %v570_v59 = vadd.f32 %v959_v56, %v475_v57  ;;  %v574_v60 = vadd.f32 %v959_v56, %v485_v58 }
  0xaf   : > { %586 = vst [vmem:[%s1063_s5] sm:$0xff] %v570_v59  ;;  %v623_v14 = vmul.f32 %v570_v59, %v570_v59  ;;  %v627_v30 = vmul.f32 %v574_v60, %v574_v60 }
  0xb0   : > { %590 = vst [vmem:[%s1063_s5 + $0x20] sm:$0xff] %v574_v60 }
  0xb3   : > { %v495_v61 = vpop.f32.mrf.mxu2  ;;  %v505_v62 = vpop.f32.mrf.mxu3 }
  0xb4   : > { %v477_v63 = vpop.f32.mrf.mxu0  ;;  %v487_v0 = vpop.f32.mrf.mxu1  ;;  %v578_v1 = vadd.f32 %v959_v56, %v495_v61  ;;  %v1067_v4 = vadd.f32 %v959_v56, %v505_v62 }
  0xb5   : > { %v571_v2 = vadd.f32 %v959_v56, %v477_v63  ;;  %v575_v3 = vadd.f32 %v959_v56, %v487_v0 }
  0xb6   : > { %594 = vst [vmem:[%s1063_s5 + $0x40] sm:$0xff] %v578_v1  ;;  %v631_v46 = vmul.f32 %v578_v1, %v578_v1  ;;  %v635_v58 = vmul.f32 %v1067_v4, %v1067_v4 }
  0xb7   : > { %587 = vst [vmem:[%s1063_s5 + $0x8] sm:$0xff] %v571_v2  ;;  %v624_v13 = vmul.f32 %v571_v2, %v571_v2  ;;  %v602_v15 = vadd.f32 %v571_v2, %v570_v59  ;;  %v628_v33 = vmul.f32 %v575_v3, %v575_v3 }
  0xb8   : > { %591 = vst [vmem:[%s1063_s5 + $0x28] sm:$0xff] %v575_v3 }
  0xb9   : > { %598 = vst [vmem:[%s1063_s5 + $0x60] sm:$0xff] %v1067_v4  ;;  %v639_v19 = vadd.f32 %v624_v13, %v623_v14 }
  0xbb   : > { %v497_v5 = vpop.f32.mrf.mxu2  ;;  %v507_v6 = vpop.f32.mrf.mxu3 }
  0xbc   : > { %v480_v7 = vpop.f32.mrf.mxu0  ;;  %v490_v8 = vpop.f32.mrf.mxu1  ;;  %v579_v9 = vadd.f32 %v959_v56, %v497_v5  ;;  %v583_v12 = vadd.f32 %v959_v56, %v507_v6 }
  0xbd   : > { %v572_v10 = vadd.f32 %v959_v56, %v480_v7  ;;  %v576_v11 = vadd.f32 %v959_v56, %v490_v8 }
  0xbe   : > { %595 = vst [vmem:[%s1063_s5 + $0x48] sm:$0xff] %v579_v9  ;;  %v632_v49 = vmul.f32 %v579_v9, %v579_v9  ;;  %v636_v61 = vmul.f32 %v583_v12, %v583_v12 }
  0xbf   : > { %588 = vst [vmem:[%s1063_s5 + $0x10] sm:$0xff] %v572_v10  ;;  %v625_v16 = vmul.f32 %v572_v10, %v572_v10  ;;  %v603_v23 = vadd.f32 %v602_v15, %v572_v10  ;;  %v629_v40 = vmul.f32 %v576_v11, %v576_v11 }
  0xc0   : > { %592 = vst [vmem:[%s1063_s5 + $0x30] sm:$0xff] %v576_v11 }
  0xc1   : > { %599 = vst [vmem:[%s1063_s5 + $0x68] sm:$0xff] %v583_v12  ;;  %v640_v27 = vadd.f32 %v639_v19, %v625_v16 }
  0xc3   : > { %v500_v17 = vpop.f32.mrf.mxu2  ;;  %v510_v18 = vpop.f32.mrf.mxu3 }
  0xc4   : > { %v482_v20 = vpop.f32.mrf.mxu0  ;;  %v492_v21 = vpop.f32.mrf.mxu1  ;;  %v580_v22 = vadd.f32 %v959_v56, %v500_v17  ;;  %v584_v26 = vadd.f32 %v959_v56, %v510_v18 }
  0xc5   : > { %v573_v24 = vadd.f32 %v959_v56, %v482_v20  ;;  %v577_v25 = vadd.f32 %v959_v56, %v492_v21 }
  0xc6   : > { %596 = vst [vmem:[%s1063_s5 + $0x50] sm:$0xff] %v580_v22  ;;  %v633_v53 = vmul.f32 %v580_v22, %v580_v22 }
  0xc7   : > { %589 = vst [vmem:[%s1063_s5 + $0x18] sm:$0xff] %v573_v24  ;;  %v604_v28 = vadd.f32 %v603_v23, %v573_v24  ;;  %v626_v29 = vmul.f32 %v573_v24, %v573_v24  ;;  %v630_v44 = vmul.f32 %v577_v25, %v577_v25 }
  0xc8   : > { %593 = vst [vmem:[%s1063_s5 + $0x38] sm:$0xff] %v577_v25 }
  0xc9   : > { %v605_v31 = vadd.f32 %v604_v28, %v574_v60  ;;  %v641_v32 = vadd.f32 %v640_v27, %v626_v29  ;;  %600 = vst [vmem:[%s1063_s5 + $0x70] sm:$0xff] %v584_v26 }
  0xcb   : > { %v642_v34 = vadd.f32 %v641_v32, %v627_v30  ;;  %v606_v35 = vadd.f32 %v605_v31, %v575_v3  ;;  %v502_v36 = vpop.f32.mrf.mxu2  ;;  %v512_v37 = vpop.f32.mrf.mxu3 }
  0xcc   : > { %v581_v38 = vadd.f32 %v959_v56, %v502_v36  ;;  %v585_v39 = vadd.f32 %v959_v56, %v512_v37 }
  0xcd   : > { %v607_v41 = vadd.f32 %v606_v35, %v576_v11  ;;  %v643_v42 = vadd.f32 %v642_v34, %v628_v33 }
  0xce   : > { %597 = vst [vmem:[%s1063_s5 + $0x58] sm:$0xff] %v581_v38  ;;  %v634_v56 = vmul.f32 %v581_v38, %v581_v38  ;;  %v638_v6 = vmul.f32 %v585_v39, %v585_v39 }
  0xcf   : > { %v608_v43 = vadd.f32 %v607_v41, %v577_v25  ;;  %v644_v45 = vadd.f32 %v643_v42, %v629_v40  ;;  %601 = vst [vmem:[%s1063_s5 + $0x78] sm:$0xff] %v585_v39 }
  0xd1   : > { %v609_v47 = vadd.f32 %v608_v43, %v578_v1  ;;  %v645_v48 = vadd.f32 %v644_v45, %v630_v44  ;;  %v637_v1 = vmul.f32 %v584_v26, %v584_v26 }
  0xd3   : > { %v646_v50 = vadd.f32 %v645_v48, %v631_v46  ;;  %v610_v51 = vadd.f32 %v609_v47, %v579_v9 }
  0xd5   : > { %v611_v52 = vadd.f32 %v610_v51, %v580_v22  ;;  %v647_v54 = vadd.f32 %v646_v50, %v632_v49 }
  0xd7   : > { %v648_v55 = vadd.f32 %v647_v54, %v633_v53  ;;  %v612_v57 = vadd.f32 %v611_v52, %v581_v38 }
  0xd9   : > { %v613_v59 = vadd.f32 %v612_v57, %v1067_v4  ;;  %v649_v60 = vadd.f32 %v648_v55, %v634_v56 }
  0xdb   : > { %v650_v62 = vadd.f32 %v649_v60, %v635_v58  ;;  %v614_v63 = vadd.f32 %v613_v59, %v583_v12 }
  0xdd   : > { %v615_v0 = vadd.f32 %v614_v63, %v584_v26  ;;  %v651_v2 = vadd.f32 %v650_v62, %v636_v61 }
  0xdf   : > { %v652_v3 = vadd.f32 %v651_v2, %v637_v1  ;;  %v616_v5 = vadd.f32 %v615_v0, %v585_v39 }
  0xe1   : > { %v617_v7 = vrot.slane %v616_v5, 4  ;;  %v653_v8 = vadd.f32 %v652_v3, %v638_v6 }
  0xe3   : > { %v618_v9 = vadd.f32 %v617_v7, %v616_v5  ;;  %v654_v10 = vrot.slane %v653_v8, 4 }
  0xe5   : > { %v619_v11 = vrot.slane %v618_v9, 2  ;;  %v655_v13 = vadd.f32 %v654_v10, %v653_v8 }
  0xe7   : > { %v620_v14 = vadd.f32 %v619_v11, %v618_v9  ;;  %v656_v15 = vrot.slane %v655_v13, 2 }
  0xe9   : > { %v621_v4 = vrot.slane %v620_v14, 1  ;;  %v657_v16 = vadd.f32 %v656_v15, %v655_v13 }
  0xeb   : > { %v658_v17 = vrot.slane %v657_v16, 1  ;;  %v622_v12 = vadd.f32 %v621_v4, %v620_v14 }
  0xed   : > { %v659_v18 = vadd.f32 %v658_v17, %v657_v16 }
  0xef   : > { %v661_v19 = vsel %vm660_vm0, %v622_v12, %v659_v18 }
  0xf0   : > { %662 = vst [vmem:[%s309_s9] sm:$0x3] %v661_v19 }
  0xf1 PF: > { %s15_s17 = sadd.s32 1, %s982_s17   ;;  %s1105_s15 = smov %s978_s16 }
  0xf2   : > { %p12_p5 = scmp.ge.s32.totalorder %s15_s17, 6   ;;  %s1106_s16 = smov %s1108_s18 }
  0xf4   :  { %14 = sbr.rel (!%p12_p5) target bundleno = 2 (0x2), region = 85 }

// kernel: _lambda_.32
= control target key start
LH: loop header
LB: loop body
LE: loop exit
PB: predicated region body
PF: predicated region fallthrough
CT: control target
= control target key end

     0   :  { %vm214_vm0 = vcmask 64512   ;;  %s894_s0 = inlined_call_operand.vmem [shape: f32[512,8], index: 0, kind: input, shape index: {}]   ;;  %s895_s1 = inlined_call_operand.vmem [shape: f32[1,8], index: 1, kind: input, shape index: {}]   ;;  %s896_s2 = inlined_call_operand.vmem [shape: f32[1,8], index: 2, kind: input, shape index: {}]   ;;  %s897_s3 = inlined_call_operand.vmem [shape: f32[512,8], index: 3, kind: output, shape index: {}]  }
   0x1   :  { %v14_v0 = vld [vmem:[%s894_s0] sm:$0xff]  ;;  %v15_v3 = vld [vmem:[%s894_s0 + $0x8] sm:$0xff]  ;;  %v16_v6 = vld [vmem:[%s894_s0 + $0x10] sm:$0xff] }
   0x2   :  { %v311_v1 = vld [vmem:[%s895_s1] ss:$0 sm:$0xff]  ;;  %v17_v7 = vld [vmem:[%s894_s0 + $0x18] sm:$0xff]  ;;  %v19_v12 = vld [vmem:[%s894_s0 + $0x28] sm:$0xff] }
   0x3   :  { %v316_v2 = vld [vmem:[%s896_s2] ss:$0 sm:$0xff]  ;;  %v82_v4 = vsub.f32 %v14_v0, %v311_v1  ;;  %v83_v5 = vsub.f32 %v15_v3, %v311_v1  ;;  %v84_v9 = vsub.f32 %v16_v6, %v311_v1  ;;  %v85_v10 = vsub.f32 %v17_v7, %v311_v1  ;;  %v20_v13 = vld [vmem:[%s894_s0 + $0x30] sm:$0xff]  ;;  %v21_v14 = vld [vmem:[%s894_s0 + $0x38] sm:$0xff] }
   0x4   :  { %v18_v8 = vld [vmem:[%s894_s0 + $0x20] sm:$0xff]  ;;  %v87_v17 = vsub.f32 %v19_v12, %v311_v1  ;;  %v88_v18 = vsub.f32 %v20_v13, %v311_v1  ;;  %v23_v20 = vld [vmem:[%s894_s0 + $0x48] sm:$0xff]  ;;  %v89_v23 = vsub.f32 %v21_v14, %v311_v1  ;;  %v24_v24 = vld [vmem:[%s894_s0 + $0x50] sm:$0xff] }
   0x5   :  { %v86_v11 = vsub.f32 %v18_v8, %v311_v1  ;;  %v150_v15 = vmul.f32 %v316_v2, %v82_v4  ;;  %v151_v16 = vmul.f32 %v316_v2, %v83_v5  ;;  %v22_v19 = vld [vmem:[%s894_s0 + $0x40] sm:$0xff]  ;;  %v152_v21 = vmul.f32 %v316_v2, %v84_v9  ;;  %v25_v27 = vld [vmem:[%s894_s0 + $0x58] sm:$0xff]  ;;  %v27_v33 = vld [vmem:[%s894_s0 + $0x68] sm:$0xff] }
   0x6   :  { %v153_v22 = vmul.f32 %v316_v2, %v85_v10  ;;  %v90_v26 = vsub.f32 %v22_v19, %v311_v1  ;;  %v155_v28 = vmul.f32 %v316_v2, %v87_v17  ;;  %v91_v29 = vsub.f32 %v23_v20, %v311_v1  ;;  %v26_v30 = vld [vmem:[%s894_s0 + $0x60] sm:$0xff]  ;;  %v28_v36 = vld [vmem:[%s894_s0 + $0x70] sm:$0xff]  ;;  %v29_v39 = vld [vmem:[%s894_s0 + $0x78] sm:$0xff] }
   0x7   :  { %215 = vst.msk [vmem:[%s897_s3] sm:$0xff] %vm214_vm0, %v150_v15  ;;  %v154_v25 = vmul.f32 %v316_v2, %v86_v11  ;;  %v156_v31 = vmul.f32 %v316_v2, %v88_v18  ;;  %v92_v32 = vsub.f32 %v24_v24, %v311_v1  ;;  %v157_v34 = vmul.f32 %v316_v2, %v89_v23  ;;  %v30_v42 = vld [vmem:[%s894_s0 + $0x80] sm:$0xff]  ;;  %v31_v45 = vld [vmem:[%s894_s0 + $0x88] sm:$0xff]  ;;  %v32_v48 = vld [vmem:[%s894_s0 + $0x90] sm:$0xff] }
   0x8   :  { %216 = vst.msk [vmem:[%s897_s3 + $0x8] sm:$0xff] %vm214_vm0, %v151_v16  ;;  %v93_v35 = vsub.f32 %v25_v27, %v311_v1  ;;  %v158_v37 = vmul.f32 %v316_v2, %v90_v26  ;;  %v94_v38 = vsub.f32 %v26_v30, %v311_v1  ;;  %v159_v40 = vmul.f32 %v316_v2, %v91_v29  ;;  %v33_v51 = vld [vmem:[%s894_s0 + $0x98] sm:$0xff]  ;;  %v34_v54 = vld [vmem:[%s894_s0 + $0xa0] sm:$0xff]  ;;  %v35_v57 = vld [vmem:[%s894_s0 + $0xa8] sm:$0xff] }
   0x9   :  { %217 = vst.msk [vmem:[%s897_s3 + $0x10] sm:$0xff] %vm214_vm0, %v152_v21  ;;  %v95_v41 = vsub.f32 %v27_v33, %v311_v1  ;;  %v160_v43 = vmul.f32 %v316_v2, %v92_v32  ;;  %v96_v44 = vsub.f32 %v28_v36, %v311_v1  ;;  %v97_v47 = vsub.f32 %v29_v39, %v311_v1  ;;  %v36_v60 = vld [vmem:[%s894_s0 + $0xb0] sm:$0xff]  ;;  %v37_v63 = vld [vmem:[%s894_s0 + $0xb8] sm:$0xff]  ;;  %v38_v4 = vld [vmem:[%s894_s0 + $0xc0] sm:$0xff] }
   0xa   :  { %218 = vst.msk [vmem:[%s897_s3 + $0x18] sm:$0xff] %vm214_vm0, %v153_v22  ;;  %v161_v46 = vmul.f32 %v316_v2, %v93_v35  ;;  %v162_v49 = vmul.f32 %v316_v2, %v94_v38  ;;  %v98_v50 = vsub.f32 %v30_v42, %v311_v1  ;;  %v99_v53 = vsub.f32 %v31_v45, %v311_v1  ;;  %v39_v7 = vld [vmem:[%s894_s0 + $0xc8] sm:$0xff]  ;;  %v40_v10 = vld [vmem:[%s894_s0 + $0xd0] sm:$0xff]  ;;  %v41_v13 = vld [vmem:[%s894_s0 + $0xd8] sm:$0xff] }
   0xb   :  { %219 = vst.msk [vmem:[%s897_s3 + $0x20] sm:$0xff] %vm214_vm0, %v154_v25  ;;  %v163_v52 = vmul.f32 %v316_v2, %v95_v41  ;;  %v164_v55 = vmul.f32 %v316_v2, %v96_v44  ;;  %v100_v56 = vsub.f32 %v32_v48, %v311_v1  ;;  %v165_v58 = vmul.f32 %v316_v2, %v97_v47  ;;  %v42_v16 = vld [vmem:[%s894_s0 + $0xe0] sm:$0xff]  ;;  %v43_v19 = vld [vmem:[%s894_s0 + $0xe8] sm:$0xff]  ;;  %v44_v22 = vld [vmem:[%s894_s0 + $0xf0] sm:$0xff] }
   0xc   :  { %220 = vst.msk [vmem:[%s897_s3 + $0x28] sm:$0xff] %vm214_vm0, %v155_v28  ;;  %v101_v59 = vsub.f32 %v33_v51, %v311_v1  ;;  %v166_v61 = vmul.f32 %v316_v2, %v98_v50  ;;  %v102_v62 = vsub.f32 %v34_v54, %v311_v1  ;;  %v167_v0 = vmul.f32 %v316_v2, %v99_v53  ;;  %v45_v25 = vld [vmem:[%s894_s0 + $0xf8] sm:$0xff]  ;;  %v46_v28 = vld [vmem:[%s894_s0 + $0x100] sm:$0xff]  ;;  %v51_v44 = vld [vmem:[%s894_s0 + $0x128] sm:$0xff] }
   0xd   :  { %221 = vst.msk [vmem:[%s897_s3 + $0x30] sm:$0xff] %vm214_vm0, %v156_v31  ;;  %v103_v3 = vsub.f32 %v35_v57, %v311_v1  ;;  %v168_v5 = vmul.f32 %v316_v2, %v100_v56  ;;  %v104_v6 = vsub.f32 %v36_v60, %v311_v1  ;;  %v105_v9 = vsub.f32 %v37_v63, %v311_v1  ;;  %v47_v31 = vld [vmem:[%s894_s0 + $0x108] sm:$0xff]  ;;  %v77_v41 = vld [vmem:[%s894_s0 + $0x1f8] sm:$0xff]  ;;  %v52_v47 = vld [vmem:[%s894_s0 + $0x130] sm:$0xff] }
   0xe   :  { %222 = vst.msk [vmem:[%s897_s3 + $0x38] sm:$0xff] %vm214_vm0, %v157_v34  ;;  %v169_v8 = vmul.f32 %v316_v2, %v101_v59  ;;  %v170_v11 = vmul.f32 %v316_v2, %v102_v62  ;;  %v106_v12 = vsub.f32 %v38_v4, %v311_v1  ;;  %v107_v15 = vsub.f32 %v39_v7, %v311_v1  ;;  %v48_v34 = vld [vmem:[%s894_s0 + $0x110] sm:$0xff]  ;;  %v53_v51 = vld [vmem:[%s894_s0 + $0x138] sm:$0xff]  ;;  %v54_v54 = vld [vmem:[%s894_s0 + $0x140] sm:$0xff] }
   0xf   :  { %223 = vst.msk [vmem:[%s897_s3 + $0x40] sm:$0xff] %vm214_vm0, %v158_v37  ;;  %v171_v14 = vmul.f32 %v316_v2, %v103_v3  ;;  %v172_v17 = vmul.f32 %v316_v2, %v104_v6  ;;  %v108_v18 = vsub.f32 %v40_v10, %v311_v1  ;;  %v173_v20 = vmul.f32 %v316_v2, %v105_v9  ;;  %v49_v37 = vld [vmem:[%s894_s0 + $0x118] sm:$0xff] }
  0x10   :  { %224 = vst.msk [vmem:[%s897_s3 + $0x48] sm:$0xff] %vm214_vm0, %v159_v40  ;;  %v109_v21 = vsub.f32 %v41_v13, %v311_v1  ;;  %v174_v23 = vmul.f32 %v316_v2, %v106_v12  ;;  %v110_v24 = vsub.f32 %v42_v16, %v311_v1  ;;  %v175_v26 = vmul.f32 %v316_v2, %v107_v15  ;;  %v50_v40 = vld [vmem:[%s894_s0 + $0x120] sm:$0xff] }
  0x11   :  { %225 = vst.msk [vmem:[%s897_s3 + $0x50] sm:$0xff] %vm214_vm0, %v160_v43  ;;  %v111_v27 = vsub.f32 %v43_v19, %v311_v1  ;;  %v176_v29 = vmul.f32 %v316_v2, %v108_v18  ;;  %v112_v30 = vsub.f32 %v44_v22, %v311_v1  ;;  %v113_v33 = vsub.f32 %v45_v25, %v311_v1 }
  0x12   :  { %226 = vst.msk [vmem:[%s897_s3 + $0x58] sm:$0xff] %vm214_vm0, %v161_v46  ;;  %v177_v32 = vmul.f32 %v316_v2, %v109_v21  ;;  %v178_v35 = vmul.f32 %v316_v2, %v110_v24  ;;  %v114_v36 = vsub.f32 %v46_v28, %v311_v1  ;;  %v115_v39 = vsub.f32 %v47_v31, %v311_v1 }
  0x13   :  { %227 = vst.msk [vmem:[%s897_s3 + $0x60] sm:$0xff] %vm214_vm0, %v162_v49  ;;  %v179_v38 = vmul.f32 %v316_v2, %v111_v27  ;;  %v180_v42 = vmul.f32 %v316_v2, %v112_v30  ;;  %v116_v43 = vsub.f32 %v48_v34, %v311_v1  ;;  %v181_v45 = vmul.f32 %v316_v2, %v113_v33 }
  0x14   :  { %228 = vst.msk [vmem:[%s897_s3 + $0x68] sm:$0xff] %vm214_vm0, %v163_v52  ;;  %v117_v46 = vsub.f32 %v49_v37, %v311_v1  ;;  %v145_v48 = vsub.f32 %v77_v41, %v311_v1  ;;  %v182_v49 = vmul.f32 %v316_v2, %v114_v36  ;;  %v118_v50 = vsub.f32 %v50_v40, %v311_v1  ;;  %v70_v41 = vld [vmem:[%s894_s0 + $0x1c0] sm:$0xff] }
  0x15   :  { %229 = vst.msk [vmem:[%s897_s3 + $0x70] sm:$0xff] %vm214_vm0, %v164_v55  ;;  %v183_v52 = vmul.f32 %v316_v2, %v115_v39  ;;  %v119_v53 = vsub.f32 %v51_v44, %v311_v1  ;;  %v184_v56 = vmul.f32 %v316_v2, %v116_v43  ;;  %v120_v57 = vsub.f32 %v52_v47, %v311_v1  ;;  %v71_v44 = vld [vmem:[%s894_s0 + $0x1c8] sm:$0xff]  ;;  %v72_v47 = vld [vmem:[%s894_s0 + $0x1d0] sm:$0xff] }
  0x16   :  { %230 = vst.msk [vmem:[%s897_s3 + $0x78] sm:$0xff] %vm214_vm0, %v165_v58  ;;  %v635_v55 = vmul.f32 %v316_v2, %v145_v48  ;;  %v55_v58 = vld [vmem:[%s894_s0 + $0x148] sm:$0xff]  ;;  %v185_v59 = vmul.f32 %v316_v2, %v117_v46  ;;  %v121_v60 = vsub.f32 %v53_v51, %v311_v1  ;;  %v186_v62 = vmul.f32 %v316_v2, %v118_v50  ;;  %v73_v50 = vld [vmem:[%s894_s0 + $0x1d8] sm:$0xff] }
  0x17   :  { %231 = vst.msk [vmem:[%s897_s3 + $0x80] sm:$0xff] %vm214_vm0, %v166_v61  ;;  %v56_v61 = vld [vmem:[%s894_s0 + $0x150] sm:$0xff]  ;;  %v122_v63 = vsub.f32 %v54_v54, %v311_v1  ;;  %v187_v3 = vmul.f32 %v316_v2, %v119_v53  ;;  %v123_v4 = vsub.f32 %v55_v58, %v311_v1  ;;  %v188_v6 = vmul.f32 %v316_v2, %v120_v57  ;;  %v74_v53 = vld [vmem:[%s894_s0 + $0x1e0] sm:$0xff]  ;;  %v75_v57 = vld [vmem:[%s894_s0 + $0x1e8] sm:$0xff] }
  0x18   :  { %232 = vst.msk [vmem:[%s897_s3 + $0x88] sm:$0xff] %vm214_vm0, %v167_v0  ;;  %v57_v0 = vld [vmem:[%s894_s0 + $0x158] sm:$0xff]  ;;  %v124_v7 = vsub.f32 %v56_v61, %v311_v1  ;;  %v189_v9 = vmul.f32 %v316_v2, %v121_v60  ;;  %v76_v60 = vld [vmem:[%s894_s0 + $0x1f0] sm:$0xff] }
  0x19   :  { %233 = vst.msk [vmem:[%s897_s3 + $0x90] sm:$0xff] %vm214_vm0, %v168_v5  ;;  %v58_v5 = vld [vmem:[%s894_s0 + $0x160] sm:$0xff]  ;;  %v125_v10 = vsub.f32 %v57_v0, %v311_v1  ;;  %v190_v12 = vmul.f32 %v316_v2, %v122_v63  ;;  %v191_v15 = vmul.f32 %v316_v2, %v123_v4  ;;  %v143_v0 = vsub.f32 %v75_v57, %v311_v1 }
  0x1a   :  { %234 = vst.msk [vmem:[%s897_s3 + $0x98] sm:$0xff] %vm214_vm0, %v169_v8  ;;  %v59_v8 = vld [vmem:[%s894_s0 + $0x168] sm:$0xff]  ;;  %v126_v13 = vsub.f32 %v58_v5, %v311_v1  ;;  %v192_v18 = vmul.f32 %v316_v2, %v124_v7  ;;  %v144_v4 = vsub.f32 %v76_v60, %v311_v1 }
  0x1b   :  { %235 = vst.msk [vmem:[%s897_s3 + $0xa0] sm:$0xff] %vm214_vm0, %v170_v11  ;;  %v60_v11 = vld [vmem:[%s894_s0 + $0x170] sm:$0xff]  ;;  %v127_v16 = vsub.f32 %v59_v8, %v311_v1  ;;  %v193_v21 = vmul.f32 %v316_v2, %v125_v10 }
  0x1c   :  { %236 = vst.msk [vmem:[%s897_s3 + $0xa8] sm:$0xff] %vm214_vm0, %v171_v14  ;;  %v61_v14 = vld [vmem:[%s894_s0 + $0x178] sm:$0xff]  ;;  %v128_v19 = vsub.f32 %v60_v11, %v311_v1  ;;  %v194_v24 = vmul.f32 %v316_v2, %v126_v13  ;;  %v212_v7 = vmul.f32 %v316_v2, %v144_v4 }
  0x1d   :  { %237 = vst.msk [vmem:[%s897_s3 + $0xb0] sm:$0xff] %vm214_vm0, %v172_v17  ;;  %v62_v17 = vld [vmem:[%s894_s0 + $0x180] sm:$0xff]  ;;  %v129_v22 = vsub.f32 %v61_v14, %v311_v1  ;;  %v195_v27 = vmul.f32 %v316_v2, %v127_v16 }
  0x1e   :  { %238 = vst.msk [vmem:[%s897_s3 + $0xb8] sm:$0xff] %vm214_vm0, %v173_v20  ;;  %v63_v20 = vld [vmem:[%s894_s0 + $0x188] sm:$0xff]  ;;  %v130_v25 = vsub.f32 %v62_v17, %v311_v1  ;;  %v196_v30 = vmul.f32 %v316_v2, %v128_v19 }
  0x1f   :  { %239 = vst.msk [vmem:[%s897_s3 + $0xc0] sm:$0xff] %vm214_vm0, %v174_v23  ;;  %v64_v23 = vld [vmem:[%s894_s0 + $0x190] sm:$0xff]  ;;  %v131_v28 = vsub.f32 %v63_v20, %v311_v1  ;;  %v197_v33 = vmul.f32 %v316_v2, %v129_v22 }
  0x20   :  { %240 = vst.msk [vmem:[%s897_s3 + $0xc8] sm:$0xff] %vm214_vm0, %v175_v26  ;;  %v65_v26 = vld [vmem:[%s894_s0 + $0x198] sm:$0xff]  ;;  %v132_v31 = vsub.f32 %v64_v23, %v311_v1  ;;  %v198_v36 = vmul.f32 %v316_v2, %v130_v25 }
  0x21   :  { %241 = vst.msk [vmem:[%s897_s3 + $0xd0] sm:$0xff] %vm214_vm0, %v176_v29  ;;  %v66_v29 = vld [vmem:[%s894_s0 + $0x1a0] sm:$0xff]  ;;  %v133_v34 = vsub.f32 %v65_v26, %v311_v1  ;;  %v199_v39 = vmul.f32 %v316_v2, %v131_v28 }
  0x22   :  { %242 = vst.msk [vmem:[%s897_s3 + $0xd8] sm:$0xff] %vm214_vm0, %v177_v32  ;;  %v67_v32 = vld [vmem:[%s894_s0 + $0x1a8] sm:$0xff]  ;;  %v134_v37 = vsub.f32 %v66_v29, %v311_v1 }
  0x23   :  { %243 = vst.msk [vmem:[%s897_s3 + $0xe0] sm:$0xff] %vm214_vm0, %v178_v35  ;;  %v68_v35 = vld [vmem:[%s894_s0 + $0x1b0] sm:$0xff]  ;;  %v135_v40 = vsub.f32 %v67_v32, %v311_v1 }
  0x24   :  { %244 = vst.msk [vmem:[%s897_s3 + $0xe8] sm:$0xff] %vm214_vm0, %v179_v38  ;;  %v69_v38 = vld [vmem:[%s894_s0 + $0x1b8] sm:$0xff]  ;;  %v136_v43 = vsub.f32 %v68_v35, %v311_v1  ;;  %v202_v48 = vmul.f32 %v316_v2, %v134_v37 }
  0x25   :  { %245 = vst.msk [vmem:[%s897_s3 + $0xf0] sm:$0xff] %vm214_vm0, %v180_v42  ;;  %v200_v42 = vmul.f32 %v316_v2, %v132_v31  ;;  %v137_v46 = vsub.f32 %v69_v38, %v311_v1  ;;  %v203_v51 = vmul.f32 %v316_v2, %v135_v40 }
  0x26   :  { %246 = vst.msk [vmem:[%s897_s3 + $0xf8] sm:$0xff] %vm214_vm0, %v181_v45  ;;  %v201_v45 = vmul.f32 %v316_v2, %v133_v34  ;;  %v204_v54 = vmul.f32 %v316_v2, %v136_v43 }
  0x27   :  { %247 = vst.msk [vmem:[%s897_s3 + $0x100] sm:$0xff] %vm214_vm0, %v182_v49  ;;  %v138_v49 = vsub.f32 %v70_v41, %v311_v1  ;;  %v205_v58 = vmul.f32 %v316_v2, %v137_v46 }
  0x28   :  { %248 = vst.msk [vmem:[%s897_s3 + $0x108] sm:$0xff] %vm214_vm0, %v183_v52  ;;  %v139_v52 = vsub.f32 %v71_v44, %v311_v1 }
  0x29   :  { %249 = vst.msk [vmem:[%s897_s3 + $0x110] sm:$0xff] %vm214_vm0, %v184_v56  ;;  %v140_v56 = vsub.f32 %v72_v47, %v311_v1  ;;  %v206_v61 = vmul.f32 %v316_v2, %v138_v49 }
  0x2a   :  { %250 = vst.msk [vmem:[%s897_s3 + $0x118] sm:$0xff] %vm214_vm0, %v185_v59  ;;  %v141_v59 = vsub.f32 %v73_v50, %v311_v1  ;;  %v207_v63 = vmul.f32 %v316_v2, %v139_v52 }
  0x2b   :  { %251 = vst.msk [vmem:[%s897_s3 + $0x120] sm:$0xff] %vm214_vm0, %v186_v62  ;;  %v142_v62 = vsub.f32 %v74_v53, %v311_v1  ;;  %v211_v1 = vmul.f32 %v316_v2, %v143_v0 }
  0x2c   :  { %252 = vst.msk [vmem:[%s897_s3 + $0x128] sm:$0xff] %vm214_vm0, %v187_v3  ;;  %v208_v3 = vmul.f32 %v316_v2, %v140_v56  ;;  %v209_v5 = vmul.f32 %v316_v2, %v141_v59 }
  0x2d   :  { %253 = vst.msk [vmem:[%s897_s3 + $0x130] sm:$0xff] %vm214_vm0, %v188_v6  ;;  %v210_v6 = vmul.f32 %v316_v2, %v142_v62 }
  0x2e   :  { %254 = vst.msk [vmem:[%s897_s3 + $0x138] sm:$0xff] %vm214_vm0, %v189_v9 }
  0x2f   :  { %255 = vst.msk [vmem:[%s897_s3 + $0x140] sm:$0xff] %vm214_vm0, %v190_v12 }
  0x30   :  { %256 = vst.msk [vmem:[%s897_s3 + $0x148] sm:$0xff] %vm214_vm0, %v191_v15 }
  0x31   :  { %257 = vst.msk [vmem:[%s897_s3 + $0x150] sm:$0xff] %vm214_vm0, %v192_v18 }
  0x32   :  { %258 = vst.msk [vmem:[%s897_s3 + $0x158] sm:$0xff] %vm214_vm0, %v193_v21 }
  0x33   :  { %259 = vst.msk [vmem:[%s897_s3 + $0x160] sm:$0xff] %vm214_vm0, %v194_v24 }
  0x34   :  { %260 = vst.msk [vmem:[%s897_s3 + $0x168] sm:$0xff] %vm214_vm0, %v195_v27 }
  0x35   :  { %261 = vst.msk [vmem:[%s897_s3 + $0x170] sm:$0xff] %vm214_vm0, %v196_v30 }
  0x36   :  { %262 = vst.msk [vmem:[%s897_s3 + $0x178] sm:$0xff] %vm214_vm0, %v197_v33 }
  0x37   :  { %263 = vst.msk [vmem:[%s897_s3 + $0x180] sm:$0xff] %vm214_vm0, %v198_v36 }
  0x38   :  { %264 = vst.msk [vmem:[%s897_s3 + $0x188] sm:$0xff] %vm214_vm0, %v199_v39 }
  0x39   :  { %265 = vst.msk [vmem:[%s897_s3 + $0x190] sm:$0xff] %vm214_vm0, %v200_v42 }
  0x3a   :  { %266 = vst.msk [vmem:[%s897_s3 + $0x198] sm:$0xff] %vm214_vm0, %v201_v45 }
  0x3b   :  { %267 = vst.msk [vmem:[%s897_s3 + $0x1a0] sm:$0xff] %vm214_vm0, %v202_v48 }
  0x3c   :  { %268 = vst.msk [vmem:[%s897_s3 + $0x1a8] sm:$0xff] %vm214_vm0, %v203_v51 }
  0x3d   :  { %269 = vst.msk [vmem:[%s897_s3 + $0x1b0] sm:$0xff] %vm214_vm0, %v204_v54 }
  0x3e   :  { %270 = vst.msk [vmem:[%s897_s3 + $0x1b8] sm:$0xff] %vm214_vm0, %v205_v58 }
  0x3f   :  { %271 = vst.msk [vmem:[%s897_s3 + $0x1c0] sm:$0xff] %vm214_vm0, %v206_v61 }
  0x40   :  { %272 = vst.msk [vmem:[%s897_s3 + $0x1c8] sm:$0xff] %vm214_vm0, %v207_v63 }
  0x41   :  { %273 = vst.msk [vmem:[%s897_s3 + $0x1d0] sm:$0xff] %vm214_vm0, %v208_v3 }
  0x42   :  { %274 = vst.msk [vmem:[%s897_s3 + $0x1d8] sm:$0xff] %vm214_vm0, %v209_v5 }
  0x43   :  { %275 = vst.msk [vmem:[%s897_s3 + $0x1e0] sm:$0xff] %vm214_vm0, %v210_v6 }
  0x44   :  { %276 = vst.msk [vmem:[%s897_s3 + $0x1e8] sm:$0xff] %vm214_vm0, %v211_v1 }
  0x45   :  { %277 = vst.msk [vmem:[%s897_s3 + $0x1f0] sm:$0xff] %vm214_vm0, %v212_v7 }
  0x46   :  { %278 = vst.msk [vmem:[%s897_s3 + $0x1f8] sm:$0xff] %vm214_vm0, %v635_v55 }

// kernel: _lambda_.33
= control target key start
LH: loop header
LB: loop body
LE: loop exit
PB: predicated region body
PF: predicated region fallthrough
CT: control target
= control target key end

     0   :  { %s1234_s12 = smov 0   ;;  %s1236_s13 = smov 0   ;;  %s1391_s0 = inlined_call_operand.vmem [shape: bf16[4,512,128], index: 0, kind: input, shape index: {}]   ;;  %s1392_s1 = inlined_call_operand.vmem [shape: bf16[4,128,128], index: 1, kind: input, shape index: {}]   ;;  %s1393_s2 = inlined_call_operand.vmem [shape: f32[1,128], index: 2, kind: input, shape index: {}]   ;;  %s1394_s3 = inlined_call_operand.vmem [shape: f32[4,512,128], index: 3, kind: output, shape index: {}]  }
   0x1   :  { %s1238_s14 = smov 0   ;;  %s1240_s15 = smov 0  }
   0x2   :  { %s1242_s16 = smov 0  }
   0x3 LB: > { %s28_s17 = sadd.s32 1, %s1204_s14  ;;  %s32_s18 = sadd.s32 1, %s1208_s15  ;;  %s1212_s16 = sphi %s1242_s16, %s13_s16   ;;  %s1208_s15 = sphi %s1240_s15, %s1398_s15   ;;  %s1204_s14 = sphi %s1238_s14, %s1397_s14   ;;  %s1200_s13 = sphi %s1236_s13, %s1396_s13   ;;  %s1196_s12 = sphi %s1234_s12, %s1395_s12  }
   0x4   : > { %p30_p0 = scmp.ge.s32.totalorder %s28_s17, 2  ;;  %p914_p1 = scmp.ge.s32.totalorder %s1212_s16, 1 }
   0x5   : > { %p187_p2 = scmp.lt.s32.totalorder %s1212_s16, 9 }
   0x6   : > { %s1400_s17 = smov (%p30_p0, %s28_s17), 0  ;;  %s1402_s18 = smov (!%p30_p0, %s32_s18), %s1208_s15 }
   0x7   : > { %p188_p3 = pnand %p914_p1, %p187_p2  ;;  %p34_p4 = scmp.ge.s32.totalorder %s1402_s18, 4 }
   0x8   : > { %p232_p5 = scmp.lt.s32.totalorder (!%p188_p3), %s1200_s13, 3  ;;  %s915_s20 = sshll.u32 (!%p188_p3), %s1196_s12, 5 }
   0x9   : > { %s1404_s18 = smov (%p34_p4, %s1402_s18), 0  ;;  %191 = sbr.rel (%p188_p3) target bundleno = 249 (0xf9), region = 32 }
   0xa   : > { %p234_p6 = scmp.lt.s32.totalorder (!%p188_p3), %s915_s20, 63 }
   0xe   : > { %s1406_s13 = smov (!%p232_p5, %s1200_s13), 3  ;;  %s1408_s20 = smov (!%p234_p6, %s915_s20), 63 }
   0xf   : > { %s916_s19 = sshll.u32 %s1406_s13, 6 }
  0x10   : > { %s1267_s23 = scalar_lea.vmem %s1392_s1, %s916_s19  ;;  %s1272_s24 = sadd.s32 %s916_s19, %s1408_s20 }
  0x11   : > { %v965_v0 = vld [vmem:[%s1267_s23 + $0x38] sm:$0xff]  ;;  %v964_v1 = vld [vmem:[%s1267_s23 + $0x30] sm:$0xff]  ;;  %v963_v2 = vld [vmem:[%s1267_s23 + $0x28] sm:$0xff]  ;;  %s917_s25 = sshll.u32 %s1272_s24, 2  ;;  %s922_s4 = sshll.u32 %s1272_s24, 3 }
  0x12   : > { %508 = vmatpush.bf16.msra.mxu0 %v965_v0  ;;  %1045 = vmatpush.bf16.msra.mxu1 %v965_v0  ;;  %v962_v3 = vld [vmem:[%s1267_s23 + $0x20] sm:$0xff]  ;;  %v961_v4 = vld [vmem:[%s1267_s23 + $0x18] sm:$0xff]  ;;  %s1280_s28 = scalar_lea.vmem %s1391_s0, %s917_s25  ;;  %v960_v5 = vld [vmem:[%s1267_s23 + $0x10] sm:$0xff]  ;;  %s1312_s7 = scalar_lea.vmem %s1394_s3, %s922_s4 }
  0x13   : > { %1046 = vmatpush.bf16.msra.mxu2 %v965_v0  ;;  %1047 = vmatpush.bf16.msra.mxu3 %v965_v0  ;;  %v967_v6 = vld [vmem:[%s1280_s28] sm:$0xff]   ;;  %v959_v14 = vld [vmem:[%s1267_s23 + $0x8] sm:$0xff]  ;;  %v1031_v56 = vld [vmem:[%s1280_s28 + $0x10] sm:$0xff]  }
  0x14   : > { %v1033_v7 = vld [vmem:[%s1280_s28 + $0x20] sm:$0xff]   ;;  %v968_v10 = vunpack.c.l.bf16 %v967_v6  ;;  %v969_v11 = vunpack.c.h.bf16 %v967_v6  ;;  %v1030_v32 = vld [vmem:[%s1280_s28 + $0x8] sm:$0xff]   ;;  %v1035_v57 = vld [vmem:[%s1280_s28 + $0x30] sm:$0xff]   ;;  %v976_v60 = vunpack.c.l.bf16 %v1031_v56  ;;  %v977_v61 = vunpack.c.h.bf16 %v1031_v56 }
  0x15   : > { %v1037_v8 = vld [vmem:[%s1280_s28 + $0x40] sm:$0xff]   ;;  %v984_v12 = vunpack.c.l.bf16 %v1033_v7  ;;  %v985_v13 = vunpack.c.h.bf16 %v1033_v7  ;;  %v1034_v33 = vld [vmem:[%s1280_s28 + $0x28] sm:$0xff]   ;;  %v972_v36 = vunpack.c.l.bf16 %v1030_v32  ;;  %v973_v37 = vunpack.c.h.bf16 %v1030_v32  ;;  %v1039_v58 = vld [vmem:[%s1280_s28 + $0x50] sm:$0xff]  }
  0x16   : > { %509 = vmatpush.bf16.msra.mxu0 %v964_v1  ;;  %1048 = vmatpush.bf16.msra.mxu1 %v964_v1  ;;  %v1041_v9 = vld [vmem:[%s1280_s28 + $0x60] sm:$0xff]   ;;  %v1000_v15 = vunpack.c.l.bf16 %v1037_v8  ;;  %v1001_v16 = vunpack.c.h.bf16 %v1037_v8  ;;  %v364_v19 = vmax.f32 %v968_v10, 0.0  ;;  %v365_v20 = vmax.f32 %v969_v11, 0.0  ;;  %v1038_v34 = vld [vmem:[%s1280_s28 + $0x48] sm:$0xff]   ;;  %v1043_v59 = vld [vmem:[%s1280_s28 + $0x70] sm:$0xff]  }
  0x17   : > { %1049 = vmatpush.bf16.msra.mxu2 %v964_v1  ;;  %1050 = vmatpush.bf16.msra.mxu3 %v964_v1  ;;  %v1016_v17 = vunpack.c.l.bf16 %v1041_v9  ;;  %v1017_v18 = vunpack.c.h.bf16 %v1041_v9  ;;  %v372_v21 = vmax.f32 %v984_v12, 0.0  ;;  %v373_v22 = vmax.f32 %v985_v13, 0.0  ;;  %v958_v23 = vld [vmem:[%s1267_s23] sm:$0xff]  ;;  %v1042_v35 = vld [vmem:[%s1280_s28 + $0x68] sm:$0xff]  }
  0x18   : > { %v380_v24 = vmax.f32 %v1000_v15, 0.0  ;;  %v381_v25 = vmax.f32 %v1001_v16, 0.0  ;;  %v396_v28 = vpack.c.bf16 %v365_v20, %v364_v19  ;;  %v988_v38 = vunpack.c.l.bf16 %v1034_v33  ;;  %v1032_v16 = vld [vmem:[%s1280_s28 + $0x18] sm:$0xff]  }
  0x19   : > { %v388_v26 = vmax.f32 %v1016_v17, 0.0  ;;  %v389_v27 = vmax.f32 %v1017_v18, 0.0  ;;  %v400_v29 = vpack.c.bf16 %v373_v22, %v372_v21  ;;  %v989_v39 = vunpack.c.h.bf16 %v1034_v33  ;;  %v1036_v17 = vld [vmem:[%s1280_s28 + $0x38] sm:$0xff]  }
  0x1a   : > { %510 = vmatpush.bf16.msra.mxu0 %v963_v2  ;;  %1051 = vmatpush.bf16.msra.mxu1 %v963_v2  ;;  %v404_v30 = vpack.c.bf16 %v381_v25, %v380_v24  ;;  %v1004_v40 = vunpack.c.l.bf16 %v1038_v34  ;;  %v1005_v41 = vunpack.c.h.bf16 %v1038_v34  ;;  %v1020_v42 = vunpack.c.l.bf16 %v1042_v35  ;;  %v1040_v18 = vld [vmem:[%s1280_s28 + $0x58] sm:$0xff]  }
  0x1b   : > { %1052 = vmatpush.bf16.msra.mxu2 %v963_v2  ;;  %1053 = vmatpush.bf16.msra.mxu3 %v963_v2  ;;  %v408_v31 = vpack.c.bf16 %v389_v27, %v388_v26  ;;  %v1021_v43 = vunpack.c.h.bf16 %v1042_v35  ;;  %v366_v44 = vmax.f32 %v972_v36, 0.0  ;;  %v367_v45 = vmax.f32 %v973_v37, 0.0  ;;  %v1044_v19 = vld [vmem:[%s1280_s28 + $0x78] sm:$0xff]  }
  0x1c   : > { %v374_v46 = vmax.f32 %v988_v38, 0.0  ;;  %v375_v47 = vmax.f32 %v989_v39, 0.0  ;;  %v382_v48 = vmax.f32 %v1004_v40, 0.0  ;;  %v383_v49 = vmax.f32 %v1005_v41, 0.0  ;;  %v1304_v40 = vld [vmem:[%s1393_s2] ss:$0 sm:$0xff] }
  0x1d   : > { %v390_v50 = vmax.f32 %v1020_v42, 0.0  ;;  %v391_v51 = vmax.f32 %v1021_v43, 0.0  ;;  %v397_v52 = vpack.c.bf16 %v367_v45, %v366_v44  ;;  %v992_v62 = vunpack.c.l.bf16 %v1035_v57 }
  0x1e   : > { %511 = vmatpush.bf16.msra.mxu0 %v962_v3  ;;  %1054 = vmatpush.bf16.msra.mxu1 %v962_v3  ;;  %v401_v53 = vpack.c.bf16 %v375_v47, %v374_v46  ;;  %v405_v54 = vpack.c.bf16 %v383_v49, %v382_v48  ;;  %v993_v63 = vunpack.c.h.bf16 %v1035_v57  ;;  %v1008_v0 = vunpack.c.l.bf16 %v1039_v58 }
  0x1f   : > { %1055 = vmatpush.bf16.msra.mxu2 %v962_v3  ;;  %1056 = vmatpush.bf16.msra.mxu3 %v962_v3  ;;  %v409_v55 = vpack.c.bf16 %v391_v51, %v390_v50  ;;  %v1009_v1 = vunpack.c.h.bf16 %v1039_v58  ;;  %v1024_v2 = vunpack.c.l.bf16 %v1043_v59  ;;  %v1025_v3 = vunpack.c.h.bf16 %v1043_v59 }
  0x20   : > { %v376_v6 = vmax.f32 %v992_v62, 0.0  ;;  %v377_v7 = vmax.f32 %v993_v63, 0.0  ;;  %v384_v8 = vmax.f32 %v1008_v0, 0.0  ;;  %v980_v20 = vunpack.c.l.bf16 %v1032_v16 }
  0x21   : > { %v385_v9 = vmax.f32 %v1009_v1, 0.0  ;;  %v392_v10 = vmax.f32 %v1024_v2, 0.0  ;;  %v393_v11 = vmax.f32 %v1025_v3, 0.0  ;;  %v981_v21 = vunpack.c.h.bf16 %v1032_v16 }
  0x22   : > { %512 = vmatpush.bf16.msra.mxu0 %v961_v4  ;;  %1057 = vmatpush.bf16.msra.mxu1 %v961_v4  ;;  %v402_v13 = vpack.c.bf16 %v377_v7, %v376_v6  ;;  %v996_v22 = vunpack.c.l.bf16 %v1036_v17  ;;  %v1012_v24 = vunpack.c.l.bf16 %v1040_v18  ;;  %v1013_v25 = vunpack.c.h.bf16 %v1040_v18 }
  0x23   : > { %1058 = vmatpush.bf16.msra.mxu2 %v961_v4  ;;  %1059 = vmatpush.bf16.msra.mxu3 %v961_v4  ;;  %v368_v4 = vmax.f32 %v976_v60, 0.0  ;;  %v410_v15 = vpack.c.bf16 %v393_v11, %v392_v10  ;;  %v1028_v26 = vunpack.c.l.bf16 %v1044_v19  ;;  %v1029_v27 = vunpack.c.h.bf16 %v1044_v19 }
  0x24   : > { %v386_v32 = vmax.f32 %v1012_v24, 0.0  ;;  %v387_v33 = vmax.f32 %v1013_v25, 0.0 }
  0x25   : > { %v394_v34 = vmax.f32 %v1028_v26, 0.0  ;;  %v395_v35 = vmax.f32 %v1029_v27, 0.0 }
  0x26   : > { %513 = vmatpush.bf16.msra.mxu0 %v960_v5  ;;  %1060 = vmatpush.bf16.msra.mxu1 %v960_v5  ;;  %v407_v38 = vpack.c.bf16 %v387_v33, %v386_v32 }
  0x27   : > { %1061 = vmatpush.bf16.msra.mxu2 %v960_v5  ;;  %1062 = vmatpush.bf16.msra.mxu3 %v960_v5  ;;  %v369_v5 = vmax.f32 %v977_v61, 0.0  ;;  %v411_v39 = vpack.c.bf16 %v395_v35, %v394_v34 }
  0x29   : > { %v398_v12 = vpack.c.bf16 %v369_v5, %v368_v4 }
  0x2a   : > { %514 = vmatpush.bf16.msra.mxu0 %v959_v14  ;;  %1063 = vmatpush.bf16.msra.mxu1 %v959_v14 }
  0x2b   : > { %1064 = vmatpush.bf16.msra.mxu2 %v959_v14  ;;  %1065 = vmatpush.bf16.msra.mxu3 %v959_v14  ;;  %v406_v14 = vpack.c.bf16 %v385_v9, %v384_v8 }
  0x2e   : > { %515 = vmatpush.bf16.msra.mxu0 %v958_v23  ;;  %1066 = vmatpush.bf16.msra.mxu1 %v958_v23 }
  0x2f   : > { %1067 = vmatpush.bf16.msra.mxu2 %v958_v23  ;;  %1068 = vmatpush.bf16.msra.mxu3 %v958_v23  ;;  %v997_v23 = vunpack.c.h.bf16 %v1036_v17 }
  0x31   : > { %516 = vmatmul.bf16.vlgmr.msra.gmra.mxu0 %v396_v28  ;;  %536 = vmatmul.bf16.vlgmr.msra.gmra.mxu1 %v400_v29  ;;  %v370_v28 = vmax.f32 %v980_v20, 0.0  ;;  %v371_v29 = vmax.f32 %v981_v21, 0.0 }
  0x32   : > { %556 = vmatmul.bf16.vlgmr.msra.gmra.mxu2 %v404_v30  ;;  %576 = vmatmul.bf16.vlgmr.msra.gmra.mxu3 %v408_v31  ;;  %v378_v30 = vmax.f32 %v996_v22, 0.0  ;;  %v379_v31 = vmax.f32 %v997_v23, 0.0 }
  0x33   : > { %v399_v36 = vpack.c.bf16 %v371_v29, %v370_v28 }
  0x34   : > { %v403_v37 = vpack.c.bf16 %v379_v31, %v378_v30 }
  0x41   : > { %521 = vmatmul.bf16.gmra.mxu0 %v397_v52  ;;  %541 = vmatmul.bf16.gmra.mxu1 %v401_v53 }
  0x42   : > { %561 = vmatmul.bf16.gmra.mxu2 %v405_v54  ;;  %581 = vmatmul.bf16.gmra.mxu3 %v409_v55 }
  0x51   : > { %526 = vmatmul.bf16.gmra.mxu0 %v398_v12  ;;  %546 = vmatmul.bf16.gmra.mxu1 %v402_v13 }
  0x52   : > { %566 = vmatmul.bf16.gmra.mxu2 %v406_v14  ;;  %586 = vmatmul.bf16.gmra.mxu3 %v410_v15 }
  0x61   : > { %531 = vmatmul.bf16.gmra.mxu0 %v399_v36  ;;  %551 = vmatmul.bf16.gmra.mxu1 %v403_v37 }
  0x62   : > { %571 = vmatmul.bf16.gmra.mxu2 %v407_v38  ;;  %591 = vmatmul.bf16.gmra.mxu3 %v411_v39 }
  0xae   : > { %v517_v41 = vpop.f32.mrf.mxu0  ;;  %v537_v42 = vpop.f32.mrf.mxu1 }
  0xaf   : > { %v700_v43 = vadd.f32 %v1304_v40, %v517_v41  ;;  %v708_v44 = vadd.f32 %v1304_v40, %v537_v42 }
  0xb1   : > { %1110 = vtanh.f32 %v700_v43 }
  0xb2   : > { %1112 = vtanh.f32 %v708_v44 }
  0xb5   : > { %v557_v45 = vpop.f32.mrf.mxu2  ;;  %v577_v46 = vpop.f32.mrf.mxu3 }
  0xb6   : > { %v716_v47 = vadd.f32 %v1304_v40, %v557_v45  ;;  %v724_v48 = vadd.f32 %v1304_v40, %v577_v46  ;;  %v519_v49 = vpop.f32.mrf.mxu0  ;;  %v539_v50 = vpop.f32.mrf.mxu1 }
  0xb7   : > { %v1111_v51 = vpop.eup %1110  ;;  %v701_v52 = vadd.f32 %v1304_v40, %v519_v49  ;;  %v709_v53 = vadd.f32 %v1304_v40, %v539_v50 }
  0xb8   : > { %v1113_v54 = vpop.eup %1112  ;;  %764 = vst [vmem:[%s1312_s7] sm:$0xff] %v1111_v51  ;;  %1114 = vtanh.f32 %v716_v47 }
  0xb9   : > { %772 = vst [vmem:[%s1312_s7 + $0x40] sm:$0xff] %v1113_v54  ;;  %1116 = vtanh.f32 %v724_v48 }
  0xba   : > { %1118 = vtanh.f32 %v701_v52 }
  0xbb   : > { %1120 = vtanh.f32 %v709_v53 }
  0xbd   : > { %v559_v55 = vpop.f32.mrf.mxu2  ;;  %v579_v56 = vpop.f32.mrf.mxu3 }
  0xbe   : > { %v1115_v57 = vpop.eup %1114  ;;  %v717_v58 = vadd.f32 %v1304_v40, %v559_v55  ;;  %v725_v59 = vadd.f32 %v1304_v40, %v579_v56  ;;  %v522_v60 = vpop.f32.mrf.mxu0 }
  0xbf   : > { %v542_v61 = vpop.f32.mrf.mxu1  ;;  %v1117_v62 = vpop.eup %1116  ;;  %780 = vst [vmem:[%s1312_s7 + $0x80] sm:$0xff] %v1115_v57  ;;  %v702_v63 = vadd.f32 %v1304_v40, %v522_v60 }
  0xc0   : > { %v710_v0 = vadd.f32 %v1304_v40, %v542_v61  ;;  %v1119_v1 = vpop.eup %1118  ;;  %788 = vst [vmem:[%s1312_s7 + $0xc0] sm:$0xff] %v1117_v62  ;;  %1122 = vtanh.f32 %v717_v58 }
  0xc1   : > { %v1121_v2 = vpop.eup %1120  ;;  %765 = vst [vmem:[%s1312_s7 + $0x8] sm:$0xff] %v1119_v1  ;;  %1124 = vtanh.f32 %v725_v59 }
  0xc2   : > { %773 = vst [vmem:[%s1312_s7 + $0x48] sm:$0xff] %v1121_v2  ;;  %1126 = vtanh.f32 %v702_v63 }
  0xc3   : > { %1128 = vtanh.f32 %v710_v0 }
  0xc5   : > { %v562_v3 = vpop.f32.mrf.mxu2  ;;  %v582_v4 = vpop.f32.mrf.mxu3 }
  0xc6   : > { %v1123_v5 = vpop.eup %1122  ;;  %v718_v6 = vadd.f32 %v1304_v40, %v562_v3  ;;  %v726_v7 = vadd.f32 %v1304_v40, %v582_v4  ;;  %v524_v8 = vpop.f32.mrf.mxu0 }
  0xc7   : > { %v544_v9 = vpop.f32.mrf.mxu1  ;;  %v1125_v10 = vpop.eup %1124  ;;  %781 = vst [vmem:[%s1312_s7 + $0x88] sm:$0xff] %v1123_v5  ;;  %v703_v11 = vadd.f32 %v1304_v40, %v524_v8 }
  0xc8   : > { %v711_v12 = vadd.f32 %v1304_v40, %v544_v9  ;;  %v1127_v13 = vpop.eup %1126  ;;  %789 = vst [vmem:[%s1312_s7 + $0xc8] sm:$0xff] %v1125_v10  ;;  %1130 = vtanh.f32 %v718_v6 }
  0xc9   : > { %v1129_v14 = vpop.eup %1128  ;;  %766 = vst [vmem:[%s1312_s7 + $0x10] sm:$0xff] %v1127_v13  ;;  %1132 = vtanh.f32 %v726_v7 }
  0xca   : > { %774 = vst [vmem:[%s1312_s7 + $0x50] sm:$0xff] %v1129_v14  ;;  %1134 = vtanh.f32 %v703_v11 }
  0xcb   : > { %1136 = vtanh.f32 %v711_v12 }
  0xcd   : > { %v564_v15 = vpop.f32.mrf.mxu2  ;;  %v584_v16 = vpop.f32.mrf.mxu3 }
  0xce   : > { %v1131_v17 = vpop.eup %1130  ;;  %v719_v18 = vadd.f32 %v1304_v40, %v564_v15  ;;  %v727_v19 = vadd.f32 %v1304_v40, %v584_v16  ;;  %v527_v20 = vpop.f32.mrf.mxu0 }
  0xcf   : > { %v547_v21 = vpop.f32.mrf.mxu1  ;;  %v1133_v22 = vpop.eup %1132  ;;  %782 = vst [vmem:[%s1312_s7 + $0x90] sm:$0xff] %v1131_v17  ;;  %v704_v23 = vadd.f32 %v1304_v40, %v527_v20 }
  0xd0   : > { %v712_v24 = vadd.f32 %v1304_v40, %v547_v21  ;;  %v1135_v25 = vpop.eup %1134  ;;  %790 = vst [vmem:[%s1312_s7 + $0xd0] sm:$0xff] %v1133_v22  ;;  %1138 = vtanh.f32 %v719_v18 }
  0xd1   : > { %v1137_v26 = vpop.eup %1136  ;;  %767 = vst [vmem:[%s1312_s7 + $0x18] sm:$0xff] %v1135_v25  ;;  %1140 = vtanh.f32 %v727_v19 }
  0xd2   : > { %775 = vst [vmem:[%s1312_s7 + $0x58] sm:$0xff] %v1137_v26  ;;  %1142 = vtanh.f32 %v704_v23 }
  0xd3   : > { %1144 = vtanh.f32 %v712_v24 }
  0xd5   : > { %v567_v27 = vpop.f32.mrf.mxu2  ;;  %v587_v28 = vpop.f32.mrf.mxu3 }
  0xd6   : > { %v1139_v29 = vpop.eup %1138  ;;  %v720_v30 = vadd.f32 %v1304_v40, %v567_v27  ;;  %v728_v31 = vadd.f32 %v1304_v40, %v587_v28  ;;  %v529_v32 = vpop.f32.mrf.mxu0 }
  0xd7   : > { %v549_v33 = vpop.f32.mrf.mxu1  ;;  %v1141_v34 = vpop.eup %1140  ;;  %783 = vst [vmem:[%s1312_s7 + $0x98] sm:$0xff] %v1139_v29  ;;  %v705_v35 = vadd.f32 %v1304_v40, %v529_v32 }
  0xd8   : > { %v713_v36 = vadd.f32 %v1304_v40, %v549_v33  ;;  %v1143_v37 = vpop.eup %1142  ;;  %791 = vst [vmem:[%s1312_s7 + $0xd8] sm:$0xff] %v1141_v34  ;;  %1146 = vtanh.f32 %v720_v30 }
  0xd9   : > { %v1145_v38 = vpop.eup %1144  ;;  %768 = vst [vmem:[%s1312_s7 + $0x20] sm:$0xff] %v1143_v37  ;;  %1148 = vtanh.f32 %v728_v31 }
  0xda   : > { %776 = vst [vmem:[%s1312_s7 + $0x60] sm:$0xff] %v1145_v38  ;;  %1150 = vtanh.f32 %v705_v35 }
  0xdb   : > { %1152 = vtanh.f32 %v713_v36 }
  0xdd   : > { %v569_v39 = vpop.f32.mrf.mxu2  ;;  %v589_v41 = vpop.f32.mrf.mxu3 }
  0xde   : > { %v1147_v42 = vpop.eup %1146  ;;  %v721_v43 = vadd.f32 %v1304_v40, %v569_v39  ;;  %v729_v44 = vadd.f32 %v1304_v40, %v589_v41  ;;  %v532_v45 = vpop.f32.mrf.mxu0 }
  0xdf   : > { %v552_v46 = vpop.f32.mrf.mxu1  ;;  %v1149_v47 = vpop.eup %1148  ;;  %784 = vst [vmem:[%s1312_s7 + $0xa0] sm:$0xff] %v1147_v42  ;;  %v706_v48 = vadd.f32 %v1304_v40, %v532_v45 }
  0xe0   : > { %v714_v49 = vadd.f32 %v1304_v40, %v552_v46  ;;  %v1151_v50 = vpop.eup %1150  ;;  %792 = vst [vmem:[%s1312_s7 + $0xe0] sm:$0xff] %v1149_v47  ;;  %1154 = vtanh.f32 %v721_v43 }
  0xe1   : > { %v1153_v51 = vpop.eup %1152  ;;  %769 = vst [vmem:[%s1312_s7 + $0x28] sm:$0xff] %v1151_v50  ;;  %1156 = vtanh.f32 %v729_v44 }
  0xe2   : > { %777 = vst [vmem:[%s1312_s7 + $0x68] sm:$0xff] %v1153_v51  ;;  %1158 = vtanh.f32 %v706_v48 }
  0xe3   : > { %1160 = vtanh.f32 %v714_v49 }
  0xe5   : > { %v572_v52 = vpop.f32.mrf.mxu2  ;;  %v592_v53 = vpop.f32.mrf.mxu3 }
  0xe6   : > { %v1155_v54 = vpop.eup %1154  ;;  %v722_v55 = vadd.f32 %v1304_v40, %v572_v52  ;;  %v730_v56 = vadd.f32 %v1304_v40, %v592_v53  ;;  %v534_v57 = vpop.f32.mrf.mxu0 }
  0xe7   : > { %v554_v58 = vpop.f32.mrf.mxu1  ;;  %v1157_v59 = vpop.eup %1156  ;;  %785 = vst [vmem:[%s1312_s7 + $0xa8] sm:$0xff] %v1155_v54  ;;  %v707_v60 = vadd.f32 %v1304_v40, %v534_v57 }
  0xe8   : > { %v715_v61 = vadd.f32 %v1304_v40, %v554_v58  ;;  %v1159_v62 = vpop.eup %1158  ;;  %793 = vst [vmem:[%s1312_s7 + $0xe8] sm:$0xff] %v1157_v59  ;;  %1162 = vtanh.f32 %v722_v55 }
  0xe9   : > { %v1161_v63 = vpop.eup %1160  ;;  %770 = vst [vmem:[%s1312_s7 + $0x30] sm:$0xff] %v1159_v62  ;;  %1164 = vtanh.f32 %v730_v56 }
  0xea   : > { %778 = vst [vmem:[%s1312_s7 + $0x70] sm:$0xff] %v1161_v63  ;;  %1166 = vtanh.f32 %v707_v60 }
  0xeb   : > { %1168 = vtanh.f32 %v715_v61 }
  0xed   : > { %v574_v0 = vpop.f32.mrf.mxu2  ;;  %v594_v1 = vpop.f32.mrf.mxu3 }
  0xee   : > { %v1163_v2 = vpop.eup %1162  ;;  %v723_v3 = vadd.f32 %v1304_v40, %v574_v0  ;;  %v731_v4 = vadd.f32 %v1304_v40, %v594_v1 }
  0xef   : > { %v1165_v5 = vpop.eup %1164  ;;  %786 = vst [vmem:[%s1312_s7 + $0xb0] sm:$0xff] %v1163_v2 }
  0xf0   : > { %v1167_v6 = vpop.eup %1166  ;;  %794 = vst [vmem:[%s1312_s7 + $0xf0] sm:$0xff] %v1165_v5  ;;  %1170 = vtanh.f32 %v723_v3 }
  0xf1   : > { %v1169_v7 = vpop.eup %1168  ;;  %771 = vst [vmem:[%s1312_s7 + $0x38] sm:$0xff] %v1167_v6  ;;  %1172 = vtanh.f32 %v731_v4 }
  0xf2   : > { %779 = vst [vmem:[%s1312_s7 + $0x78] sm:$0xff] %v1169_v7 }
  0xf6   : > { %v1171_v8 = vpop.eup %1170 }
  0xf7   : > { %v1173_v9 = vpop.eup %1172  ;;  %787 = vst [vmem:[%s1312_s7 + $0xb8] sm:$0xff] %v1171_v8 }
  0xf8   : > { %795 = vst [vmem:[%s1312_s7 + $0xf8] sm:$0xff] %v1173_v9 }
  0xf9 PF: > { %s13_s16 = sadd.s32 1, %s1212_s16   ;;  %s1395_s12 = smov %s1204_s14 }
  0xfa   : > { %p10_p7 = scmp.ge.s32.totalorder %s13_s16, 10   ;;  %s1396_s13 = smov %s1208_s15 }
  0xfb   : > { %s1397_s14 = smov %s1400_s17  ;;  %s1398_s15 = smov %s1404_s18 }
  0xfc   :  { %12 = sbr.rel (!%p10_p7) target bundleno = 3 (0x3), region = 73 }

</bundles_post_ra>
